<compile_context>
chip_gen: v7x
topology: tpu7x:2x2x1
jax: 0.10.0
libtpu: 0.0.40
codegen_flags: <defaults>
</compile_context>

<pallas_src>
import functools

import numpy as np

import jax
import jax.numpy as jnp
from jax.experimental import pallas as pl
from jax.experimental.pallas import tpu as pltpu

_TAPS = ((0, 0), (0, 1), (1, 0), (1, 1))   # (dy, dx) of a 2x2 / stride-2 pool


def _round_up(n, m):
    return (n + m - 1) // m * m


# ---------------------------------------------------------------------------
# Fused forward kernel (all GEMMs bf16 x bf16 -> f32 accumulate, single pass)
# ---------------------------------------------------------------------------
def _fused_cnn_kernel(x_ref, ptap_ref, a1_ref, b1_ref, a2_ref, b2_ref,
                      wf_ref, bf_ref, o_ref):
    c1 = ptap_ref.shape[1] // 4          # pool1 tap chunk width (256)
    c2 = a1_ref.shape[1] // 4            # pool2 tap chunk width (256)
    c3 = a2_ref.shape[1] // 4            # pool3 tap chunk width (128)

    def gemm(a, b):
        # bf16 operands, f32 accumulation: one MXU pass (review item 1).
        return jnp.dot(a, b, preferred_element_type=jnp.float32)

    def chunk_max(y, chunk):
        # Max over the 4 pooling taps.  Chunks are 128-aligned lane slices, so
        # this is pure vreg selection + VPU max (no relayout, no MXU).
        m = jnp.maximum(y[:, 0 * chunk:1 * chunk], y[:, 1 * chunk:2 * chunk])
        m = jnp.maximum(m, y[:, 2 * chunk:3 * chunk])
        return jnp.maximum(m, y[:, 3 * chunk:4 * chunk])

    x = x_ref[...].astype(jnp.bfloat16)                       # (bt, 784)

    # pool1: one concatenated one-hot tap-gather GEMM + VPU chunk max.
    g1 = chunk_max(gemm(x, ptap_ref[...]), c1)                # (bt, 256); lanes >=196 are 0

    # conv1 + bias + ReLU + pool2 (pool2 decimation folded per-tap into a1).
    g2 = chunk_max(gemm(g1.astype(jnp.bfloat16), a1_ref[...]), c2)
    h2 = jnp.maximum(g2 + b1_ref[...], 0.0)                   # (bt, 256); lanes >=180 are 0

    # conv2 + bias + ReLU + pool3 (pool3 decimation folded per-tap into a2).
    g3 = chunk_max(gemm(h2.astype(jnp.bfloat16), a2_ref[...]), c3)
    h3 = jnp.maximum(g3 + b2_ref[...], 0.0)                   # (bt, 128); lanes >=20 are 0

    # fc, padded to 128 output lanes so the only HBM store is lane-dense.
    o_ref[...] = (gemm(h3.astype(jnp.bfloat16), wf_ref[...])
                  + bf_ref[...]).astype(o_ref.dtype)


# ---------------------------------------------------------------------------
# Batch-independent operand preparation (weight-side only; no activation glue)
# ---------------------------------------------------------------------------
@functools.lru_cache(maxsize=None)
def _pool_tap_gather(C, H, W, chunk):
    """(C*H*W, 4*chunk) 0/1 matrix; chunk k gathers tap k of a 2x2/stride-2 max
    pool onto the decimated c-major grid.  Columns >= C*(H//2)*(W//2) inside
    each chunk stay zero so the later chunk-max leaves them at exactly 0."""
    Ho, Wo = H // 2, W // 2
    assert C * Ho * Wo <= chunk and chunk % 128 == 0
    m = np.zeros((C * H * W, 4 * chunk), np.float32)
    c, ho, wo = np.meshgrid(np.arange(C), np.arange(Ho), np.arange(Wo),
                            indexing="ij")
    cols = (c * Ho * Wo + ho * Wo + wo).ravel()
    for k, (dy, dx) in enumerate(_TAPS):
        rows = (c * H * W + (2 * ho + dy) * W + (2 * wo + dx)).ravel()
        m[rows, k * chunk + cols] = 1.0
    return m


def _conv_pool_matrix(w, Hi, Wi, k_pad, chunk):
    """3x3 VALID conv on a c-major (Cin, Hi, Wi) volume followed by the per-tap
    2x2/stride-2 pooling decimation, as one (k_pad, 4*chunk) GEMM matrix.
    Tap k occupies lanes [k*chunk, k*chunk + Cout*Hp*Wp); everything else 0."""
    Cout, Cin, K, _ = w.shape
    Ho, Wo = Hi - K + 1, Wi - K + 1        # conv output grid
    Hp, Wp = Ho // 2, Wo // 2              # pooled grid
    assert Cin * Hi * Wi <= k_pad and Cout * Hp * Wp <= chunk
    dy = np.array([t[0] for t in _TAPS])
    dx = np.array([t[1] for t in _TAPS])
    tap, co, ci, kh, kw, hp, wp = np.meshgrid(
        np.arange(4), np.arange(Cout), np.arange(Cin), np.arange(K),
        np.arange(K), np.arange(Hp), np.arange(Wp), indexing="ij")
    rows = (ci * Hi * Wi + (2 * hp + dy[tap] + kh) * Wi
            + (2 * wp + dx[tap] + kw)).ravel()
    cols = (tap * chunk + co * Hp * Wp + hp * Wp + wp).ravel()
    vals = w[co.ravel(), ci.ravel(), kh.ravel(), kw.ravel()]
    return jnp.zeros((k_pad, 4 * chunk), jnp.float32).at[rows, cols].add(vals)


def _pad_bias(b, reps, width):
    """Per-channel bias repeated over the pooled grid, zero-padded to `width`."""
    n = b.shape[0] * reps
    return jnp.zeros((1, width), jnp.float32).at[0, :n].set(jnp.repeat(b, reps))


def _batch_tiling(N, batch_tile):
    """Pick (tile_rows, padded_rows): avoid any HBM pad copy of x whenever a
    dividing tile exists, keep tiles multiples of 8 sublanes, and prefer >= 2
    grid steps (v7x megacore) when the batch allows it."""
    bt_cap = max(8, (min(batch_tile, N) // 8) * 8)
    if N % 8 == 0:
        cap = min(bt_cap, N // 2) if N >= 16 else bt_cap
        cap = max(8, (cap // 8) * 8)
        for t in range(cap, 7, -8):
            if N % t == 0:
                return t, N                      # no padding needed
    if N <= batch_tile:
        return N, N                              # single full-extent tile
    return bt_cap, _round_up(N, bt_cap)          # last resort: pad once


# ---------------------------------------------------------------------------
# SimpleCNN forward
# ---------------------------------------------------------------------------
@functools.partial(jax.jit, static_argnames=("batch_tile",))
def forward(params, x, *, batch_tile=256):
    N, Cin, H, W = x.shape
    C1 = params["w1"].shape[0]
    C2 = params["w2"].shape[0]
    n_out = params["wfc"].shape[0]

    H1, W1 = H // 2, W // 2                      # pool1 grid (14x14)
    H2, W2 = H1 - 2, W1 - 2                      # conv1 grid (12x12)
    H3, W3 = H2 // 2, W2 // 2                    # pool2 grid (6x6)
    H4, W4 = H3 - 2, W3 - 2                      # conv2 grid (4x4)
    H5, W5 = H4 // 2, W4 // 2                    # pool3 grid (2x2)

    f_in = Cin * H * W                           # 784
    c_p1 = _round_up(Cin * H1 * W1, 128)         # 256-lane pool1 tap chunk
    c_p2 = _round_up(C1 * H3 * W3, 128)          # 256-lane pool2 tap chunk
    c_p3 = _round_up(C2 * H5 * W5, 128)          # 128-lane pool3 tap chunk
    f_fc = _round_up(n_out, 128)                 # 128-lane dense logits
    n_flat = C2 * H5 * W5                        # 20 fc input features

    # Constant GEMM operands (batch independent; fetched into VMEM once since
    # their index_maps are constant).  Stored in bf16 (review item 9).
    ptap = jnp.asarray(_pool_tap_gather(Cin, H, W, c_p1)).astype(jnp.bfloat16)
    a1 = _conv_pool_matrix(params["w1"], H1, W1, c_p1, c_p2).astype(jnp.bfloat16)
    a2 = _conv_pool_matrix(params["w2"], H3, W3, c_p2, c_p3).astype(jnp.bfloat16)
    wf = (jnp.zeros((c_p3, f_fc), jnp.float32)
          .at[:n_flat, :n_out].set(params["wfc"].T)).astype(jnp.bfloat16)
    b1 = _pad_bias(params["b1"], H3 * W3, c_p2)
    b2 = _pad_bias(params["b2"], H5 * W5, c_p3)
    bf = jnp.zeros((1, f_fc), jnp.float32).at[0, :n_out].set(params["bfc"])

    # Batch tiling (rows on the sublane axis).
    bt, n_pad = _batch_tiling(N, batch_tile)
    x2 = x.reshape(N, f_in).astype(jnp.float32)
    if n_pad != N:
        x2 = jnp.pad(x2, ((0, n_pad - N), (0, 0)))
    grid = (n_pad // bt,)

    flops = 2 * n_pad * (f_in * 4 * c_p1 + c_p1 * 4 * c_p2
                         + c_p2 * 4 * c_p3 + c_p3 * f_fc)
    bytes_accessed = (4 * n_pad * (f_in + f_fc)
                      + 2 * (ptap.size + a1.size + a2.size + wf.size)
                      + 4 * (b1.size + b2.size + bf.size))

    out = pl.pallas_call(
        _fused_cnn_kernel,
        out_shape=jax.ShapeDtypeStruct((n_pad, f_fc), jnp.float32),
        grid=grid,
        in_specs=[
            pl.BlockSpec((bt, f_in), lambda i: (i, 0)),        # batch-tiled input
            pl.BlockSpec(ptap.shape, lambda i: (0, 0)),        # constants below:
            pl.BlockSpec(a1.shape, lambda i: (0, 0)),          #   fetched once
            pl.BlockSpec(b1.shape, lambda i: (0, 0)),
            pl.BlockSpec(a2.shape, lambda i: (0, 0)),
            pl.BlockSpec(b2.shape, lambda i: (0, 0)),
            pl.BlockSpec(wf.shape, lambda i: (0, 0)),
            pl.BlockSpec(bf.shape, lambda i: (0, 0)),
        ],
        out_specs=pl.BlockSpec((bt, f_fc), lambda i: (i, 0)),
        compiler_params=pltpu.CompilerParams(
            dimension_semantics=("parallel",),
            vmem_limit_bytes=32 * 1024 * 1024),
        cost_estimate=pl.CostEstimate(
            flops=flops, transcendentals=0, bytes_accessed=bytes_accessed),
    )(x2, ptap, a1, b1, a2, b2, wf, bf)

    return out[:N, :n_out]


# ---------------------------------------------------------------------------
# Parameter init (PyTorch-style uniform) and a float64 host reference
# ---------------------------------------------------------------------------
def init_params(key):
    def u(k, shape, fan_in):
        bound = 1.0 / jnp.sqrt(jnp.float32(fan_in))
        return jax.random.uniform(k, shape, jnp.float32, -bound, bound)

    k1, k2, k3, k4, k5, k6 = jax.random.split(key, 6)
    return {
        "w1": u(k1, (5, 1, 3, 3), 1 * 3 * 3),
        "b1": u(k2, (5,), 1 * 3 * 3),
        "w2": u(k3, (5, 5, 3, 3), 5 * 3 * 3),
        "b2": u(k4, (5,), 5 * 3 * 3),
        "wfc": u(k5, (10, 20), 20),
        "bfc": u(k6, (10,), 20),
    }


def reference(params, x):
    """Pure NumPy float64 re-implementation of SimpleCNN.forward (ground truth)."""
    p = {k: np.asarray(v, np.float64) for k, v in params.items()}
    v = np.asarray(x, np.float64)

    def pool(a):
        n, c, h, w = a.shape
        return a.reshape(n, c, h // 2, 2, w // 2, 2).max(axis=(3, 5))

    def conv(a, w, b):
        n, c, h, wd = a.shape
        co, _, k, _ = w.shape
        ho, wo = h - k + 1, wd - k + 1
        out = np.zeros((n, co, ho, wo))
        for kh in range(k):
            for kw in range(k):
                out += np.einsum("ncij,oc->noij",
                                 a[:, :, kh:kh + ho, kw:kw + wo], w[:, :, kh, kw])
        return out + b.reshape(1, -1, 1, 1)

    v = pool(v)
    v = np.maximum(conv(v, p["w1"], p["b1"]), 0.0)
    v = pool(v)
    v = np.maximum(conv(v, p["w2"], p["b2"]), 0.0)
    v = pool(v)
    v = v.reshape(v.shape[0], -1)
    return v @ p["wfc"].T + p["bfc"]


if __name__ == "__main__":
    key = jax.random.PRNGKey(0)
    pkey, xkey = jax.random.split(key)
    params = init_params(pkey)
    # Input implied by the module: 1 channel, 28x28 (fc expects 5*2*2 features).
    x = jax.random.normal(xkey, (2, 1, 28, 28), jnp.float32)

    out = forward(params, x)
    jax.block_until_ready(out)

    ref = reference(params, x)
    assert out.shape == (2, 10)
    # Tolerance covers bf16 MXU operand rounding (DEFAULT precision, f32
    # accumulation) vs the float64 reference; max-pool selection is exact.
    assert np.allclose(np.asarray(out), ref, atol=2e-2, rtol=2e-2), \
        "Pallas output mismatch"
    print("KERNEL_OK")
</pallas_src>

<mosaic_0001>
module attributes {stable_mosaic.version = 11 : i64} {
  func.func private @main(%arg0: i32) attributes {dimension_semantics = [#tpu.dimension_semantics<core_parallel>], iteration_bounds = array<i64: 2>, tpu.core_type = #tpu.core_type<sc_scalar_subcore>, window_params = []} {
    return
  }
}

module attributes {stable_mosaic.version = 11 : i64} {
  func.func private @main(%arg0: i32) attributes {dimension_semantics = [#tpu.dimension_semantics<core_parallel>], iteration_bounds = array<i64: 2>, tpu.core_type = #tpu.core_type<sc_scalar_subcore>, window_params = []} {
    return
  }
}

module attributes {stable_mosaic.version = 11 : i64} {
  func.func @_fused_cnn_kernel(%arg0: i32, %arg1: memref<2x784xf32, #tpu.memory_space<vmem>>, %arg2: memref<784x1024xbf16, #tpu.memory_space<vmem>>, %arg3: memref<256x1024xbf16, #tpu.memory_space<vmem>>, %arg4: memref<1x256xf32, #tpu.memory_space<vmem>>, %arg5: memref<256x512xbf16, #tpu.memory_space<vmem>>, %arg6: memref<1x128xf32, #tpu.memory_space<vmem>>, %arg7: memref<128x128xbf16, #tpu.memory_space<vmem>>, %arg8: memref<1x128xf32, #tpu.memory_space<vmem>>, %arg9: memref<2x128xf32, #tpu.memory_space<vmem>>) attributes {dimension_semantics = [#tpu.dimension_semantics<parallel>], iteration_bounds = array<i64: 1>, scalar_prefetch = 0 : i64, scratch_operands = 0 : i64, tpu.core_type = #tpu.core_type<tc>, window_params = [{transform_indices = @transform_0, window_bounds = array<i64: 2, 784>}, {pipeline_mode = #tpu.pipeline_mode<synchronous>, transform_indices = @transform_1, window_bounds = array<i64: 784, 1024>}, {pipeline_mode = #tpu.pipeline_mode<synchronous>, transform_indices = @transform_2, window_bounds = array<i64: 256, 1024>}, {pipeline_mode = #tpu.pipeline_mode<synchronous>, transform_indices = @transform_3, window_bounds = array<i64: 1, 256>}, {pipeline_mode = #tpu.pipeline_mode<synchronous>, transform_indices = @transform_4, window_bounds = array<i64: 256, 512>}, {pipeline_mode = #tpu.pipeline_mode<synchronous>, transform_indices = @transform_5, window_bounds = array<i64: 1, 128>}, {pipeline_mode = #tpu.pipeline_mode<synchronous>, transform_indices = @transform_6, window_bounds = array<i64: 128, 128>}, {pipeline_mode = #tpu.pipeline_mode<synchronous>, transform_indices = @transform_7, window_bounds = array<i64: 1, 128>}, {transform_indices = @transform_8, window_bounds = array<i64: 2, 128>}]} {
    %c0 = arith.constant 0 : index
    %c0_0 = arith.constant 0 : index
    %0 = vector.load %arg1[%c0, %c0_0] : memref<2x784xf32, #tpu.memory_space<vmem>>, vector<2x784xf32>
    %1 = arith.truncf %0 : vector<2x784xf32> to vector<2x784xbf16>
    %c0_1 = arith.constant 0 : index
    %c0_2 = arith.constant 0 : index
    %2 = vector.load %arg2[%c0_1, %c0_2] : memref<784x1024xbf16, #tpu.memory_space<vmem>>, vector<784x1024xbf16>
    %cst = arith.constant dense<0.000000e+00> : vector<2x1024xf32>
    %3 = tpu.matmul %1, %2, %cst {dimension_numbers = #tpu.dot_dimension_numbers<[1], [0], [0], [1], [0, 0, 1, 1], [], []>} : vector<2x784xbf16>, vector<784x1024xbf16>, vector<2x1024xf32> -> vector<2x1024xf32>
    %4 = vector.extract_strided_slice %3 {offsets = [0, 0], sizes = [2, 256], strides = [1, 1]} : vector<2x1024xf32> to vector<2x256xf32>
    %5 = vector.extract_strided_slice %3 {offsets = [0, 256], sizes = [2, 256], strides = [1, 1]} : vector<2x1024xf32> to vector<2x256xf32>
    %6 = arith.maximumf %4, %5 : vector<2x256xf32>
    %7 = vector.extract_strided_slice %3 {offsets = [0, 512], sizes = [2, 256], strides = [1, 1]} : vector<2x1024xf32> to vector<2x256xf32>
    %8 = arith.maximumf %6, %7 : vector<2x256xf32>
    %9 = vector.extract_strided_slice %3 {offsets = [0, 768], sizes = [2, 256], strides = [1, 1]} : vector<2x1024xf32> to vector<2x256xf32>
    %10 = arith.maximumf %8, %9 : vector<2x256xf32>
    %11 = arith.truncf %10 : vector<2x256xf32> to vector<2x256xbf16>
    %c0_3 = arith.constant 0 : index
    %c0_4 = arith.constant 0 : index
    %12 = vector.load %arg3[%c0_3, %c0_4] : memref<256x1024xbf16, #tpu.memory_space<vmem>>, vector<256x1024xbf16>
    %cst_5 = arith.constant dense<0.000000e+00> : vector<2x1024xf32>
    %13 = tpu.matmul %11, %12, %cst_5 {dimension_numbers = #tpu.dot_dimension_numbers<[1], [0], [0], [1], [0, 0, 1, 1], [], []>} : vector<2x256xbf16>, vector<256x1024xbf16>, vector<2x1024xf32> -> vector<2x1024xf32>
    %14 = vector.extract_strided_slice %13 {offsets = [0, 0], sizes = [2, 256], strides = [1, 1]} : vector<2x1024xf32> to vector<2x256xf32>
    %15 = vector.extract_strided_slice %13 {offsets = [0, 256], sizes = [2, 256], strides = [1, 1]} : vector<2x1024xf32> to vector<2x256xf32>
    %16 = arith.maximumf %14, %15 : vector<2x256xf32>
    %17 = vector.extract_strided_slice %13 {offsets = [0, 512], sizes = [2, 256], strides = [1, 1]} : vector<2x1024xf32> to vector<2x256xf32>
    %18 = arith.maximumf %16, %17 : vector<2x256xf32>
    %19 = vector.extract_strided_slice %13 {offsets = [0, 768], sizes = [2, 256], strides = [1, 1]} : vector<2x1024xf32> to vector<2x256xf32>
    %20 = arith.maximumf %18, %19 : vector<2x256xf32>
    %c0_6 = arith.constant 0 : index
    %c0_7 = arith.constant 0 : index
    %21 = vector.load %arg4[%c0_6, %c0_7] : memref<1x256xf32, #tpu.memory_space<vmem>>, vector<1x256xf32>
    %22 = vector.broadcast %21 : vector<1x256xf32> to vector<2x256xf32>
    %23 = arith.addf %20, %22 : vector<2x256xf32>
    %cst_8 = arith.constant 0.000000e+00 : f32
    %24 = vector.broadcast %cst_8 : f32 to vector<2x256xf32>
    %25 = arith.maximumf %23, %24 : vector<2x256xf32>
    %26 = arith.truncf %25 : vector<2x256xf32> to vector<2x256xbf16>
    %c0_9 = arith.constant 0 : index
    %c0_10 = arith.constant 0 : index
    %27 = vector.load %arg5[%c0_9, %c0_10] : memref<256x512xbf16, #tpu.memory_space<vmem>>, vector<256x512xbf16>
    %cst_11 = arith.constant dense<0.000000e+00> : vector<2x512xf32>
    %28 = tpu.matmul %26, %27, %cst_11 {dimension_numbers = #tpu.dot_dimension_numbers<[1], [0], [0], [1], [0, 0, 1, 1], [], []>} : vector<2x256xbf16>, vector<256x512xbf16>, vector<2x512xf32> -> vector<2x512xf32>
    %29 = vector.extract_strided_slice %28 {offsets = [0, 0], sizes = [2, 128], strides = [1, 1]} : vector<2x512xf32> to vector<2x128xf32>
    %30 = vector.extract_strided_slice %28 {offsets = [0, 128], sizes = [2, 128], strides = [1, 1]} : vector<2x512xf32> to vector<2x128xf32>
    %31 = arith.maximumf %29, %30 : vector<2x128xf32>
    %32 = vector.extract_strided_slice %28 {offsets = [0, 256], sizes = [2, 128], strides = [1, 1]} : vector<2x512xf32> to vector<2x128xf32>
    %33 = arith.maximumf %31, %32 : vector<2x128xf32>
    %34 = vector.extract_strided_slice %28 {offsets = [0, 384], sizes = [2, 128], strides = [1, 1]} : vector<2x512xf32> to vector<2x128xf32>
    %35 = arith.maximumf %33, %34 : vector<2x128xf32>
    %c0_12 = arith.constant 0 : index
    %c0_13 = arith.constant 0 : index
    %36 = vector.load %arg6[%c0_12, %c0_13] : memref<1x128xf32, #tpu.memory_space<vmem>>, vector<1x128xf32>
    %37 = vector.broadcast %36 : vector<1x128xf32> to vector<2x128xf32>
    %38 = arith.addf %35, %37 : vector<2x128xf32>
    %cst_14 = arith.constant 0.000000e+00 : f32
    %39 = vector.broadcast %cst_14 : f32 to vector<2x128xf32>
    %40 = arith.maximumf %38, %39 : vector<2x128xf32>
    %41 = arith.truncf %40 : vector<2x128xf32> to vector<2x128xbf16>
    %c0_15 = arith.constant 0 : index
    %c0_16 = arith.constant 0 : index
    %42 = vector.load %arg7[%c0_15, %c0_16] : memref<128x128xbf16, #tpu.memory_space<vmem>>, vector<128x128xbf16>
    %cst_17 = arith.constant dense<0.000000e+00> : vector<2x128xf32>
    %43 = tpu.matmul %41, %42, %cst_17 {dimension_numbers = #tpu.dot_dimension_numbers<[1], [0], [0], [1], [0, 0, 1, 1], [], []>} : vector<2x128xbf16>, vector<128x128xbf16>, vector<2x128xf32> -> vector<2x128xf32>
    %c0_18 = arith.constant 0 : index
    %c0_19 = arith.constant 0 : index
    %44 = vector.load %arg8[%c0_18, %c0_19] : memref<1x128xf32, #tpu.memory_space<vmem>>, vector<1x128xf32>
    %45 = vector.broadcast %44 : vector<1x128xf32> to vector<2x128xf32>
    %46 = arith.addf %43, %45 : vector<2x128xf32>
    %c0_20 = arith.constant 0 : index
    %c0_21 = arith.constant 0 : index
    %47 = vector.load %arg9[%c0_20, %c0_21] : memref<2x128xf32, #tpu.memory_space<vmem>>, vector<2x128xf32>
    tpu.vector_store %arg9[%c0_20, %c0_21], %46 {strides = array<i32>} : memref<2x128xf32, #tpu.memory_space<vmem>>, vector<2x128xf32>,
    return
  }
  func.func @transform_0(%arg0: i32) -> (i32, i32) {
    %c0_i32 = arith.constant 0 : i32
    %c0_i32_0 = arith.constant 0 : i32
    return %arg0, %c0_i32 : i32, i32
  }
  func.func @transform_1(%arg0: i32) -> (i32, i32) {
    %c0_i32 = arith.constant 0 : i32
    %c0_i32_0 = arith.constant 0 : i32
    %c0_i32_1 = arith.constant 0 : i32
    return %c0_i32, %c0_i32_0 : i32, i32
  }
  func.func @transform_2(%arg0: i32) -> (i32, i32) {
    %c0_i32 = arith.constant 0 : i32
    %c0_i32_0 = arith.constant 0 : i32
    %c0_i32_1 = arith.constant 0 : i32
    return %c0_i32, %c0_i32_0 : i32, i32
  }
  func.func @transform_3(%arg0: i32) -> (i32, i32) {
    %c0_i32 = arith.constant 0 : i32
    %c0_i32_0 = arith.constant 0 : i32
    %c0_i32_1 = arith.constant 0 : i32
    return %c0_i32, %c0_i32_0 : i32, i32
  }
  func.func @transform_4(%arg0: i32) -> (i32, i32) {
    %c0_i32 = arith.constant 0 : i32
    %c0_i32_0 = arith.constant 0 : i32
    %c0_i32_1 = arith.constant 0 : i32
    return %c0_i32, %c0_i32_0 : i32, i32
  }
  func.func @transform_5(%arg0: i32) -> (i32, i32) {
    %c0_i32 = arith.constant 0 : i32
    %c0_i32_0 = arith.constant 0 : i32
    %c0_i32_1 = arith.constant 0 : i32
    return %c0_i32, %c0_i32_0 : i32, i32
  }
  func.func @transform_6(%arg0: i32) -> (i32, i32) {
    %c0_i32 = arith.constant 0 : i32
    %c0_i32_0 = arith.constant 0 : i32
    %c0_i32_1 = arith.constant 0 : i32
    return %c0_i32, %c0_i32_0 : i32, i32
  }
  func.func @transform_7(%arg0: i32) -> (i32, i32) {
    %c0_i32 = arith.constant 0 : i32
    %c0_i32_0 = arith.constant 0 : i32
    %c0_i32_1 = arith.constant 0 : i32
    return %c0_i32, %c0_i32_0 : i32, i32
  }
  func.func @transform_8(%arg0: i32) -> (i32, i32) {
    %c0_i32 = arith.constant 0 : i32
    %c0_i32_0 = arith.constant 0 : i32
    return %arg0, %c0_i32 : i32, i32
  }
}

</mosaic_0001>

<bundles_post_ra>
// kernel: forward.1
= control target key start
LH: loop header
LB: loop body
LE: loop exit
PB: predicated region body
PF: predicated region fallthrough
CT: control target
= control target key end

     0   :  { %v39_v3 = vlaneseq  ;;  %v5469_v9 = vmov 0   ;;  %v5470_v10 = vmov 1983009808   ;;  %vm2434_vm0 = vcmask 130048   ;;  %s7456_s0 = inlined_call_operand.vmem [shape: f32[2,784], index: 0, kind: input, shape index: {}]   ;;  %s7457_s1 = inlined_call_operand.vmem [shape: bf16[784,1024], index: 1, kind: input, shape index: {}]   ;;  %s7458_s2 = inlined_call_operand.vmem [shape: bf16[256,1024], index: 2, kind: input, shape index: {}]   ;;  %s7459_s3 = inlined_call_operand.vmem [shape: f32[1,256], index: 3, kind: input, shape index: {}]   ;;  %s7460_s4 = inlined_call_operand.vmem [shape: bf16[256,512], index: 4, kind: input, shape index: {}]   ;;  %s7461_s5 = inlined_call_operand.vmem [shape: f32[1,128], index: 5, kind: input, shape index: {}]   ;;  %s7462_s6 = inlined_call_operand.vmem [shape: bf16[128,128], index: 6, kind: input, shape index: {}]   ;;  %s7463_s7 = inlined_call_operand.vmem [shape: f32[1,128], index: 7, kind: input, shape index: {}]   ;;  %s7464_s8 = inlined_call_operand.hbm [shape: f32[2,128], index: 8, kind: output, shape index: {}]  }
   0x1   :  { %v82_v0 = vld [vmem:[%s7457_s1] sm:$0xff]  ;;  %2593 = vmatprep.mubr.bf16.mxu1 %v5469_v9  ;;  %v37_v11 = vunpack.c.l.s4 %v5470_v10  ;;  %v83_v15 = vld [vmem:[%s7457_s1 + $0x8] sm:$0xff] }
   0x2   :  { %v86_v1 = vld [vmem:[%s7457_s1 + $0x20] sm:$0xff]  ;;  %v87_v16 = vld [vmem:[%s7457_s1 + $0x28] sm:$0xff]  ;;  %v5555_v22 = vshrl.u32 %v39_v3, 7 }
   0x3   :  { %v466_v2 = vld [vmem:[%s7457_s1 + $0xc00] sm:$0xff]  ;;  %v4664_v4 = vcombine.high %v82_v0, %v86_v1  ;;  %v4663_v5 = vcombine.low %v82_v0, %v86_v1  ;;  %v4666_v18 = vcombine.high %v83_v15, %v87_v16  ;;  %v5553_v20 = vld [vmem:[%s7456_s0 + $0x8] sm:$0x3f]  ;;  %v38_v21 = vunpack.c.0.s8 %v37_v11 }
   0x4   :  { %v470_v6 = vld [vmem:[%s7457_s1 + $0xc20] sm:$0xff]  ;;  %v52_v24 = vcombine.high %v5553_v20, %v5553_v20  ;;  %v91_v27 = vld [vmem:[%s7457_s1 + $0x48] sm:$0xff]  ;;  %v4665_v32 = vcombine.low %v83_v15, %v87_v16 }
   0x5   :  { %v90_v7 = vld [vmem:[%s7457_s1 + $0x40] sm:$0xff]  ;;  %v5048_v12 = vcombine.high %v466_v2, %v470_v6  ;;  %v5047_v14 = vcombine.low %v466_v2, %v470_v6  ;;  %2438 = vmatprep.subr.bf16.mxu0 %v4664_v4  ;;  %v5560_v26 = vsub.s32 %v38_v21, %v5555_v22  ;;  %v95_v28 = vld [vmem:[%s7457_s1 + $0x68] sm:$0xff] }
   0x6   :  { %v94_v8 = vld [vmem:[%s7457_s1 + $0x60] sm:$0xff]  ;;  %2439 = vmatpush1.bf16.msra.mxu0 %v4663_v5  ;;  %v4674_v35 = vcombine.high %v91_v27, %v95_v28  ;;  %v99_v37 = vld [vmem:[%s7457_s1 + $0x88] sm:$0xff]  ;;  %v4673_v41 = vcombine.low %v91_v27, %v95_v28 }
   0x7   :  { %v4672_v13 = vcombine.high %v90_v7, %v94_v8  ;;  %v98_v17 = vld [vmem:[%s7457_s1 + $0x80] sm:$0xff]  ;;  %2561 = vmatprep.subr.bf16.mxu1 %v5048_v12  ;;  %v4671_v23 = vcombine.low %v90_v7, %v94_v8  ;;  %v66_v31 = vrot.slane %v52_v24, %v5560_v26  ;;  %v103_v38 = vld [vmem:[%s7457_s1 + $0xa8] sm:$0xff] }
   0x8   :  { %v102_v19 = vld [vmem:[%s7457_s1 + $0xa0] sm:$0xff]  ;;  %2562 = vmatpush1.bf16.msra.mxu1 %v5047_v14  ;;  %v4682_v43 = vcombine.high %v99_v37, %v103_v38  ;;  %v107_v45 = vld [vmem:[%s7457_s1 + $0xc8] sm:$0xff]  ;;  %v4681_v49 = vcombine.low %v99_v37, %v103_v38 }
   0x9   :  { %2440 = vmatprep.subr.bf16.mxu0 %v4672_v13  ;;  %v4680_v25 = vcombine.high %v98_v17, %v102_v19  ;;  %2602 = vmatprep.subr.bf16.mxu1 %v4666_v18  ;;  %v106_v29 = vld [vmem:[%s7457_s1 + $0xc0] sm:$0xff]  ;;  %v4679_v33 = vcombine.low %v98_v17, %v102_v19  ;;  %v5575_v34 = vpack.c.bf16 %v66_v31, %v66_v31  ;;  %v111_v46 = vld [vmem:[%s7457_s1 + $0xe8] sm:$0xff] }
   0xa   :  { %v110_v30 = vld [vmem:[%s7457_s1 + $0xe0] sm:$0xff]  ;;  %2441 = vmatpush1.bf16.msra.mxu0 %v4671_v23  ;;  %v4690_v51 = vcombine.high %v107_v45, %v111_v46  ;;  %v115_v53 = vld [vmem:[%s7457_s1 + $0x108] sm:$0xff]  ;;  %v4689_v57 = vcombine.low %v107_v45, %v111_v46 }
   0xb   :  { %2442 = vmatprep.subr.bf16.mxu0 %v4680_v25  ;;  %v4688_v36 = vcombine.high %v106_v29, %v110_v30  ;;  %v114_v39 = vld [vmem:[%s7457_s1 + $0x100] sm:$0xff]  ;;  %5055 = vmatmul.mubr.msk.bf16.vlgmr.msra.gmra.mrb[0].mxu1 %vm2434_vm0, %v5575_v34  ;;  %v4687_v42 = vcombine.low %v106_v29, %v110_v30  ;;  %v119_v54 = vld [vmem:[%s7457_s1 + $0x128] sm:$0xff] }
   0xc   :  { %v118_v40 = vld [vmem:[%s7457_s1 + $0x120] sm:$0xff]  ;;  %2603 = vmatpush1.bf16.msra.mxu1 %v4665_v32  ;;  %v4698_v59 = vcombine.high %v115_v53, %v119_v54  ;;  %v123_v61 = vld [vmem:[%s7457_s1 + $0x148] sm:$0xff]  ;;  %v4697_v3 = vcombine.low %v115_v53, %v119_v54 }
   0xd   :  { %2604 = vmatprep.subr.bf16.mxu1 %v4674_v35  ;;  %v4696_v44 = vcombine.high %v114_v39, %v118_v40  ;;  %v122_v47 = vld [vmem:[%s7457_s1 + $0x140] sm:$0xff]  ;;  %v4695_v50 = vcombine.low %v114_v39, %v118_v40  ;;  %v127_v63 = vld [vmem:[%s7457_s1 + $0x168] sm:$0xff] }
   0xe   :  { %2443 = vmatpush1.bf16.msra.mxu0 %v4679_v33  ;;  %v126_v48 = vld [vmem:[%s7457_s1 + $0x160] sm:$0xff]  ;;  %v4706_v6 = vcombine.high %v123_v61, %v127_v63  ;;  %v131_v8 = vld [vmem:[%s7457_s1 + $0x188] sm:$0xff]  ;;  %v4705_v14 = vcombine.low %v123_v61, %v127_v63 }
   0xf   :  { %2444 = vmatprep.subr.bf16.mxu0 %v4688_v36  ;;  %v4704_v52 = vcombine.high %v122_v47, %v126_v48  ;;  %v130_v55 = vld [vmem:[%s7457_s1 + $0x180] sm:$0xff]  ;;  %v4703_v58 = vcombine.low %v122_v47, %v126_v48  ;;  %v135_v10 = vld [vmem:[%s7457_s1 + $0x1a8] sm:$0xff] }
  0x10   :  { %2605 = vmatpush1.bf16.msra.mxu1 %v4673_v41  ;;  %v134_v56 = vld [vmem:[%s7457_s1 + $0x1a0] sm:$0xff]  ;;  %v4714_v16 = vcombine.high %v131_v8, %v135_v10  ;;  %v139_v18 = vld [vmem:[%s7457_s1 + $0x1c8] sm:$0xff]  ;;  %v4713_v24 = vcombine.low %v131_v8, %v135_v10 }
  0x11   :  { %2606 = vmatprep.subr.bf16.mxu1 %v4682_v43  ;;  %v4712_v60 = vcombine.high %v130_v55, %v134_v56  ;;  %v5621_v62 = vld [vmem:[%s7456_s0] sm:$0xff]  ;;  %v4711_v4 = vcombine.low %v130_v55, %v134_v56  ;;  %v143_v19 = vld [vmem:[%s7457_s1 + $0x1e8] sm:$0xff] }
  0x12   :  { %2445 = vmatpush1.bf16.msra.mxu0 %v4687_v42  ;;  %v138_v0 = vld [vmem:[%s7457_s1 + $0x1c0] sm:$0xff]  ;;  %v5634_v2 = vrot.slane %v5621_v62, %v5560_v26  ;;  %v4722_v27 = vcombine.high %v139_v18, %v143_v19  ;;  %v147_v29 = vld [vmem:[%s7457_s1 + $0x208] sm:$0xff]  ;;  %v4721_v33 = vcombine.low %v139_v18, %v143_v19 }
  0x13   :  { %2446 = vmatprep.subr.bf16.mxu0 %v4696_v44  ;;  %v142_v1 = vld [vmem:[%s7457_s1 + $0x1e0] sm:$0xff]  ;;  %v151_v30 = vld [vmem:[%s7457_s1 + $0x228] sm:$0xff] }
  0x14   :  { %2607 = vmatpush1.bf16.msra.mxu1 %v4681_v49  ;;  %v50_v5 = vcombine.high %v5634_v2, %v5634_v2  ;;  %v4720_v7 = vcombine.high %v138_v0, %v142_v1  ;;  %v146_v11 = vld [vmem:[%s7457_s1 + $0x200] sm:$0xff]  ;;  %v4719_v15 = vcombine.low %v138_v0, %v142_v1  ;;  %v4730_v36 = vcombine.high %v147_v29, %v151_v30  ;;  %v155_v38 = vld [vmem:[%s7457_s1 + $0x248] sm:$0xff] }
  0x15   :  { %2608 = vmatprep.subr.bf16.mxu1 %v4690_v51  ;;  %v150_v12 = vld [vmem:[%s7457_s1 + $0x220] sm:$0xff]  ;;  %v159_v39 = vld [vmem:[%s7457_s1 + $0x268] sm:$0xff]  ;;  %v4729_v42 = vcombine.low %v147_v29, %v151_v30 }
  0x16   :  { %2447 = vmatpush1.bf16.msra.mxu0 %v4695_v50  ;;  %v5650_v13 = vpack.c.bf16 %v50_v5, %v50_v5  ;;  %v4728_v17 = vcombine.high %v146_v11, %v150_v12  ;;  %v154_v21 = vld [vmem:[%s7457_s1 + $0x240] sm:$0xff]  ;;  %v4727_v25 = vcombine.low %v146_v11, %v150_v12  ;;  %v4738_v44 = vcombine.high %v155_v38, %v159_v39  ;;  %v163_v46 = vld [vmem:[%s7457_s1 + $0x288] sm:$0xff] }
  0x17   :  { %2448 = vmatprep.subr.bf16.mxu0 %v4704_v52  ;;  %v158_v23 = vld [vmem:[%s7457_s1 + $0x260] sm:$0xff]  ;;  %v167_v47 = vld [vmem:[%s7457_s1 + $0x2a8] sm:$0xff]  ;;  %v4737_v50 = vcombine.low %v155_v38, %v159_v39 }
  0x18   :  { %2609 = vmatpush1.bf16.msra.mxu1 %v4689_v57  ;;  %2470 = vmatprep.mubr.bf16.mxu0 %v5650_v13  ;;  %v4736_v28 = vcombine.high %v154_v21, %v158_v23  ;;  %v162_v31 = vld [vmem:[%s7457_s1 + $0x280] sm:$0xff]  ;;  %v4735_v35 = vcombine.low %v154_v21, %v158_v23  ;;  %v4746_v52 = vcombine.high %v163_v46, %v167_v47  ;;  %v171_v54 = vld [vmem:[%s7457_s1 + $0x2c8] sm:$0xff] }
  0x19   :  { %2610 = vmatprep.subr.bf16.mxu1 %v4698_v59  ;;  %2634 = vmatprep.mubr.bf16.mxu1 %v5650_v13  ;;  %v166_v32 = vld [vmem:[%s7457_s1 + $0x2a0] sm:$0xff]  ;;  %v175_v55 = vld [vmem:[%s7457_s1 + $0x2e8] sm:$0xff] }
  0x1a   :  { %2449 = vmatpush1.bf16.msra.mxu0 %v4703_v58  ;;  %v4744_v37 = vcombine.high %v162_v31, %v166_v32  ;;  %v170_v40 = vld [vmem:[%s7457_s1 + $0x2c0] sm:$0xff]  ;;  %v4743_v43 = vcombine.low %v162_v31, %v166_v32  ;;  %v4745_v58 = vcombine.low %v163_v46, %v167_v47  ;;  %v179_v63 = vld [vmem:[%s7457_s1 + $0x308] sm:$0xff] }
  0x1b   :  { %2450 = vmatprep.subr.bf16.mxu0 %v4712_v60  ;;  %v174_v41 = vld [vmem:[%s7457_s1 + $0x2e0] sm:$0xff]  ;;  %v4754_v60 = vcombine.high %v171_v54, %v175_v55  ;;  %v183_v0 = vld [vmem:[%s7457_s1 + $0x328] sm:$0xff] }
  0x1c   :  { %2611 = vmatpush1.bf16.msra.mxu1 %v4697_v3  ;;  %v4752_v45 = vcombine.high %v170_v40, %v174_v41  ;;  %v178_v48 = vld [vmem:[%s7457_s1 + $0x300] sm:$0xff]  ;;  %v4751_v51 = vcombine.low %v170_v40, %v174_v41  ;;  %v187_v8 = vld [vmem:[%s7457_s1 + $0x348] sm:$0xff] }
  0x1d   :  { %2612 = vmatprep.subr.bf16.mxu1 %v4706_v6  ;;  %v182_v49 = vld [vmem:[%s7457_s1 + $0x320] sm:$0xff]  ;;  %v4762_v6 = vcombine.high %v179_v63, %v183_v0  ;;  %v191_v10 = vld [vmem:[%s7457_s1 + $0x368] sm:$0xff] }
  0x1e   :  { %2451 = vmatpush1.bf16.msra.mxu0 %v4711_v4  ;;  %v4760_v53 = vcombine.high %v178_v48, %v182_v49  ;;  %v186_v56 = vld [vmem:[%s7457_s1 + $0x340] sm:$0xff]  ;;  %v4759_v59 = vcombine.low %v178_v48, %v182_v49  ;;  %v4753_v4 = vcombine.low %v171_v54, %v175_v55  ;;  %v195_v19 = vld [vmem:[%s7457_s1 + $0x388] sm:$0xff] }
  0x1f   :  { %2452 = vmatprep.subr.bf16.mxu0 %v4720_v7  ;;  %v190_v57 = vld [vmem:[%s7457_s1 + $0x360] sm:$0xff]  ;;  %v199_v21 = vld [vmem:[%s7457_s1 + $0x3a8] sm:$0xff] }
  0x20   :  { %2613 = vmatpush1.bf16.msra.mxu1 %v4705_v14  ;;  %v4768_v61 = vcombine.high %v186_v56, %v190_v57  ;;  %v194_v1 = vld [vmem:[%s7457_s1 + $0x380] sm:$0xff]  ;;  %v4767_v5 = vcombine.low %v186_v56, %v190_v57  ;;  %v35_v14 = vcombine.high %v5621_v62, %v5621_v62  ;;  %v203_v30 = vld [vmem:[%s7457_s1 + $0x3c8] sm:$0xff]  ;;  %v4777_v38 = vcombine.low %v195_v19, %v199_v21 }
  0x21   :  { %2614 = vmatprep.subr.bf16.mxu1 %v4714_v16  ;;  %v198_v3 = vld [vmem:[%s7457_s1 + $0x3a0] sm:$0xff]  ;;  %v207_v31 = vld [vmem:[%s7457_s1 + $0x3e8] sm:$0xff] }
  0x22   :  { %2453 = vmatpush1.bf16.msra.mxu0 %v4719_v15  ;;  %v4776_v7 = vcombine.high %v194_v1, %v198_v3  ;;  %v202_v11 = vld [vmem:[%s7457_s1 + $0x3c0] sm:$0xff]  ;;  %v4761_v15 = vcombine.low %v179_v63, %v183_v0  ;;  %v4775_v16 = vcombine.low %v194_v1, %v198_v3  ;;  %v211_v40 = vld [vmem:[%s7457_s1 + $0x408] sm:$0xff] }
  0x23   :  { %2454 = vmatprep.subr.bf16.mxu0 %v4728_v17  ;;  %v206_v12 = vld [vmem:[%s7457_s1 + $0x3e0] sm:$0xff]  ;;  %v4770_v17 = vcombine.high %v187_v8, %v191_v10  ;;  %v215_v41 = vld [vmem:[%s7457_s1 + $0x428] sm:$0xff] }
  0x24   :  { %2615 = vmatpush1.bf16.msra.mxu1 %v4713_v24  ;;  %v4784_v18 = vcombine.high %v202_v11, %v206_v12  ;;  %v210_v62 = vld [vmem:[%s7457_s1 + $0x400] sm:$0xff]  ;;  %v5753_v24 = vrot.slane %v35_v14, %v5560_v26  ;;  %v219_v46 = vld [vmem:[%s7457_s1 + $0x448] sm:$0xff]  ;;  %v4794_v48 = vcombine.high %v211_v40, %v215_v41 }
  0x25   :  { %2616 = vmatprep.subr.bf16.mxu1 %v4722_v27  ;;  %v214_v23 = vld [vmem:[%s7457_s1 + $0x420] sm:$0xff]  ;;  %v4783_v27 = vcombine.low %v202_v11, %v206_v12  ;;  %v223_v47 = vld [vmem:[%s7457_s1 + $0x468] sm:$0xff] }
  0x26   :  { %2455 = vmatpush1.bf16.msra.mxu0 %v4727_v25  ;;  %v4769_v25 = vcombine.low %v187_v8, %v191_v10  ;;  %v4792_v29 = vcombine.high %v210_v62, %v214_v23  ;;  %v218_v32 = vld [vmem:[%s7457_s1 + $0x440] sm:$0xff]  ;;  %v4791_v39 = vcombine.low %v210_v62, %v214_v23  ;;  %v227_v54 = vld [vmem:[%s7457_s1 + $0x488] sm:$0xff]  ;;  %v4802_v56 = vcombine.high %v219_v46, %v223_v47 }
  0x27   :  { %2456 = vmatprep.subr.bf16.mxu0 %v4736_v28  ;;  %v4778_v28 = vcombine.high %v195_v19, %v199_v21  ;;  %v231_v55 = vld [vmem:[%s7457_s1 + $0x4a8] sm:$0xff]  ;;  %v250_v1 = vld [vmem:[%s7457_s1 + $0x540] sm:$0xff] }
  0x28   :  { %2617 = vmatpush1.bf16.msra.mxu1 %v4721_v33  ;;  %v222_v33 = vld [vmem:[%s7457_s1 + $0x460] sm:$0xff]  ;;  %v235_v63 = vld [vmem:[%s7457_s1 + $0x4c8] sm:$0xff] }
  0x29   :  { %2618 = vmatprep.subr.bf16.mxu1 %v4730_v36  ;;  %v5771_v36 = vpack.c.bf16 %v5634_v2, %v5634_v2  ;;  %v4786_v2 = vcombine.high %v203_v30, %v207_v31  ;;  %v239_v0 = vld [vmem:[%s7457_s1 + $0x4e8] sm:$0xff]  ;;  %v254_v3 = vld [vmem:[%s7457_s1 + $0x560] sm:$0xff] }
  0x2a   :  { %2457 = vmatpush1.bf16.msra.mxu0 %v4735_v35  ;;  %v51_v35 = vcombine.high %v5753_v24, %v5753_v24  ;;  %v243_v8 = vld [vmem:[%s7457_s1 + $0x508] sm:$0xff]  ;;  %v258_v11 = vld [vmem:[%s7457_s1 + $0x580] sm:$0xff]  ;;  %v4818_v14 = vcombine.high %v235_v63, %v239_v0 }
  0x2b   :  { %2458 = vmatprep.subr.bf16.mxu0 %v4744_v37  ;;  %v5775_v37 = vrot.slane %v5553_v20, %v5560_v26  ;;  %v226_v20 = vld [vmem:[%s7457_s1 + $0x480] sm:$0xff]  ;;  %v247_v10 = vld [vmem:[%s7457_s1 + $0x528] sm:$0xff] }
  0x2c   :  { %2619 = vmatpush1.bf16.msra.mxu1 %v4729_v42  ;;  %v4800_v42 = vcombine.high %v218_v32, %v222_v33  ;;  %v230_v26 = vld [vmem:[%s7457_s1 + $0x4a0] sm:$0xff]  ;;  %v255_v19 = vld [vmem:[%s7457_s1 + $0x568] sm:$0xff]  ;;  %v4826_v21 = vcombine.high %v243_v8, %v247_v10 }
  0x2d   :  { %2620 = vmatprep.subr.bf16.mxu1 %v4738_v44  ;;  %v4785_v44 = vcombine.low %v203_v30, %v207_v31  ;;  %v4808_v49 = vcombine.high %v226_v20, %v230_v26  ;;  %v262_v12 = vld [vmem:[%s7457_s1 + $0x5a0] sm:$0xff]  ;;  %v263_v30 = vld [vmem:[%s7457_s1 + $0x5a8] sm:$0xff] }
  0x2e   :  { %2459 = vmatpush1.bf16.msra.mxu0 %v4743_v43  ;;  %v5789_v43 = vpack.c.bf16 %v51_v35, %v51_v35  ;;  %v4840_v62 = vcombine.high %v258_v11, %v262_v12  ;;  %v266_v23 = vld [vmem:[%s7457_s1 + $0x5c0] sm:$0xff] }
  0x2f   :  { %2460 = vmatprep.subr.bf16.mxu0 %v4752_v45  ;;  %v4799_v45 = vcombine.low %v218_v32, %v222_v33  ;;  %v274_v31 = vld [vmem:[%s7457_s1 + $0x600] sm:$0xff] }
  0x30   :  { %2621 = vmatpush1.bf16.msra.mxu1 %v4737_v50  ;;  %v234_v50 = vld [vmem:[%s7457_s1 + $0x4c0] sm:$0xff] }
  0x31   :  { %2622 = vmatprep.subr.bf16.mxu1 %v4746_v52  ;;  %v4793_v52 = vcombine.low %v211_v40, %v215_v41  ;;  %v278_v32 = vld [vmem:[%s7457_s1 + $0x620] sm:$0xff]  ;;  %v267_v40 = vld [vmem:[%s7457_s1 + $0x5c8] sm:$0xff] }
  0x32   :  { %2461 = vmatpush1.bf16.msra.mxu0 %v4751_v51  ;;  %v238_v51 = vld [vmem:[%s7457_s1 + $0x4e0] sm:$0xff]  ;;  %v271_v41 = vld [vmem:[%s7457_s1 + $0x5e8] sm:$0xff] }
  0x33   :  { %2462 = vmatprep.subr.bf16.mxu0 %v4760_v53  ;;  %v4807_v53 = vcombine.low %v226_v20, %v230_v26  ;;  %v4816_v57 = vcombine.high %v234_v50, %v238_v51  ;;  %v282_v20 = vld [vmem:[%s7457_s1 + $0x640] sm:$0xff] }
  0x34   :  { %2623 = vmatpush1.bf16.msra.mxu1 %v4745_v58  ;;  %v242_v58 = vld [vmem:[%s7457_s1 + $0x500] sm:$0xff] }
  0x35   :  { %2624 = vmatprep.subr.bf16.mxu1 %v4754_v60  ;;  %v4801_v60 = vcombine.low %v219_v46, %v223_v47  ;;  %v286_v26 = vld [vmem:[%s7457_s1 + $0x660] sm:$0xff]  ;;  %v275_v46 = vld [vmem:[%s7457_s1 + $0x608] sm:$0xff] }
  0x36   :  { %2463 = vmatpush1.bf16.msra.mxu0 %v4759_v59  ;;  %v246_v59 = vld [vmem:[%s7457_s1 + $0x520] sm:$0xff]  ;;  %v279_v47 = vld [vmem:[%s7457_s1 + $0x628] sm:$0xff] }
  0x37   :  { %2464 = vmatprep.subr.bf16.mxu0 %v4768_v61  ;;  %v4815_v61 = vcombine.low %v234_v50, %v238_v51  ;;  %v290_v50 = vld [vmem:[%s7457_s1 + $0x680] sm:$0xff] }
  0x38   :  { %2625 = vmatpush1.bf16.msra.mxu1 %v4753_v4  ;;  %v4810_v4 = vcombine.high %v227_v54, %v231_v55  ;;  %v294_v51 = vld [vmem:[%s7457_s1 + $0x6a0] sm:$0xff] }
  0x39   :  { %2626 = vmatprep.subr.bf16.mxu1 %v4762_v6  ;;  %v4809_v6 = vcombine.low %v227_v54, %v231_v55  ;;  %v4858_v54 = vcombine.high %v275_v46, %v279_v47  ;;  %v4872_v55 = vcombine.high %v290_v50, %v294_v51 }
  0x3a   :  { %2465 = vmatpush1.bf16.msra.mxu0 %v4767_v5  ;;  %v4824_v5 = vcombine.high %v242_v58, %v246_v59 }
  0x3b   :  { %2466 = vmatprep.subr.bf16.mxu0 %v4776_v7  ;;  %v4823_v7 = vcombine.low %v242_v58, %v246_v59 }
  0x3c   :  { %2627 = vmatpush1.bf16.msra.mxu1 %v4761_v15  ;;  %v4832_v15 = vcombine.high %v250_v1, %v254_v3 }
  0x3d   :  { %2628 = vmatprep.subr.bf16.mxu1 %v4770_v17  ;;  %v4831_v17 = vcombine.low %v250_v1, %v254_v3 }
  0x3e   :  { %2467 = vmatpush1.bf16.msra.mxu0 %v4775_v16  ;;  %v4817_v16 = vcombine.low %v235_v63, %v239_v0 }
  0x3f   :  { %2468 = vmatprep.subr.bf16.mxu0 %v4784_v18  ;;  %v251_v18 = vld [vmem:[%s7457_s1 + $0x548] sm:$0xff] }
  0x40   :  { %2629 = vmatpush1.bf16.msra.mxu1 %v4769_v25  ;;  %v270_v25 = vld [vmem:[%s7457_s1 + $0x5e0] sm:$0xff]  ;;  %v4834_v33 = vcombine.high %v251_v18, %v255_v19 }
  0x41   :  { %2630 = vmatprep.subr.bf16.mxu1 %v4778_v28  ;;  %v4839_v28 = vcombine.low %v258_v11, %v262_v12  ;;  %v4848_v35 = vcombine.high %v266_v23, %v270_v25 }
  0x42   :  { %2469 = vmatpush1.bf16.msra.mxu0 %v4783_v27  ;;  %v4825_v27 = vcombine.low %v243_v8, %v247_v10 }
  0x43   :  { %2479 = vmatprep.subr.bf16.mxu0 %v4792_v29  ;;  %v259_v29 = vld [vmem:[%s7457_s1 + $0x588] sm:$0xff] }
  0x44   :  { %2631 = vmatpush1.bf16.msra.mxu1 %v4777_v38  ;;  %v4833_v38 = vcombine.low %v251_v18, %v255_v19 }
  0x45   :  { %2471 = vmatmul.mubr.bf16.vlgmr.msra.gmra.mrb[0].mxu0 %v5771_v36  ;;  %2632 = vmatprep.subr.bf16.mxu1 %v4786_v2  ;;  %v4842_v2 = vcombine.high %v259_v29, %v263_v30 }
  0x46   :  { %2480 = vmatpush1.bf16.msra.mxu0 %v4791_v39  ;;  %2511 = vmatprep.mubr.bf16.mxu0 %v5789_v43  ;;  %v4847_v39 = vcombine.low %v266_v23, %v270_v25 }
  0x47   :  { %2481 = vmatprep.subr.bf16.mxu0 %v4800_v42  ;;  %v4856_v42 = vcombine.high %v274_v31, %v278_v32 }
  0x48   :  { %2633 = vmatpush1.bf16.msra.mxu1 %v4785_v44  ;;  %v4841_v44 = vcombine.low %v259_v29, %v263_v30 }
  0x49   :  { %2643 = vmatprep.subr.bf16.mxu1 %v4794_v48  ;;  %v4850_v48 = vcombine.high %v267_v40, %v271_v41 }
  0x4a   :  { %2482 = vmatpush1.bf16.msra.mxu0 %v4799_v45  ;;  %v4855_v45 = vcombine.low %v274_v31, %v278_v32 }
  0x4b   :  { %2483 = vmatprep.subr.bf16.mxu0 %v4808_v49  ;;  %2635 = vmatmul.mubr.bf16.vlgmr.msra.gmra.mrb[4].mxu1 %v5771_v36  ;;  %v4864_v49 = vcombine.high %v282_v20, %v286_v26 }
  0x4c   :  { %2644 = vmatpush1.bf16.msra.mxu1 %v4793_v52  ;;  %2675 = vmatprep.mubr.bf16.mxu1 %v5789_v43  ;;  %v4849_v52 = vcombine.low %v267_v40, %v271_v41 }
  0x4d   :  { %2645 = vmatprep.subr.bf16.mxu1 %v4802_v56  ;;  %v283_v56 = vld [vmem:[%s7457_s1 + $0x648] sm:$0xff] }
  0x4e   :  { %2484 = vmatpush1.bf16.msra.mxu0 %v4807_v53  ;;  %v4863_v53 = vcombine.low %v282_v20, %v286_v26 }
  0x4f   :  { %2485 = vmatprep.subr.bf16.mxu0 %v4816_v57 }
  0x50   :  { %2646 = vmatpush1.bf16.msra.mxu1 %v4801_v60 }
  0x51   :  { %2647 = vmatprep.subr.bf16.mxu1 %v4810_v4 }
  0x52   :  { %2486 = vmatpush1.bf16.msra.mxu0 %v4815_v61 }
  0x53   :  { %2487 = vmatprep.subr.bf16.mxu0 %v4824_v5 }
  0x54   :  { %2648 = vmatpush1.bf16.msra.mxu1 %v4809_v6 }
  0x55   :  { %2649 = vmatprep.subr.bf16.mxu1 %v4818_v14 }
  0x56   :  { %2488 = vmatpush1.bf16.msra.mxu0 %v4823_v7 }
  0x57   :  { %2489 = vmatprep.subr.bf16.mxu0 %v4832_v15 }
  0x58   :  { %2650 = vmatpush1.bf16.msra.mxu1 %v4817_v16 }
  0x59   :  { %2651 = vmatprep.subr.bf16.mxu1 %v4826_v21 }
  0x5a   :  { %2490 = vmatpush1.bf16.msra.mxu0 %v4831_v17 }
  0x5b   :  { %2491 = vmatprep.subr.bf16.mxu0 %v4840_v62 }
  0x5c   :  { %2652 = vmatpush1.bf16.msra.mxu1 %v4825_v27 }
  0x5d   :  { %2653 = vmatprep.subr.bf16.mxu1 %v4834_v33 }
  0x5e   :  { %2492 = vmatpush1.bf16.msra.mxu0 %v4839_v28 }
  0x5f   :  { %2493 = vmatprep.subr.bf16.mxu0 %v4848_v35 }
  0x60   :  { %2654 = vmatpush1.bf16.msra.mxu1 %v4833_v38 }
  0x61   :  { %2655 = vmatprep.subr.bf16.mxu1 %v4842_v2 }
  0x62   :  { %2494 = vmatpush1.bf16.msra.mxu0 %v4847_v39 }
  0x63   :  { %2495 = vmatprep.subr.bf16.mxu0 %v4856_v42 }
  0x64   :  { %2656 = vmatpush1.bf16.msra.mxu1 %v4841_v44 }
  0x65   :  { %2657 = vmatprep.subr.bf16.mxu1 %v4850_v48 }
  0x66   :  { %2496 = vmatpush1.bf16.msra.mxu0 %v4855_v45 }
  0x67   :  { %2497 = vmatprep.subr.bf16.mxu0 %v4864_v49 }
  0x68   :  { %13 = vsyncpa [#allocation3], 0  ;;  %v287_v57 = vld [vmem:[%s7457_s1 + $0x668] sm:$0xff]  ;;  %v298_v58 = vld [vmem:[%s7457_s1 + $0x6c0] sm:$0xff]  ;;  %2658 = vmatpush1.bf16.msra.mxu1 %v4849_v52  ;;  %v4857_v60 = vcombine.low %v275_v46, %v279_v47  ;;  %v4871_v61 = vcombine.low %v290_v50, %v294_v51  ;;  %v67_v52 = vcombine.high %v5775_v37, %v5775_v37  ;;  %vm5472_vm1 = vmmov 0   ;;  %s5473_s25 = smov [#allocation2]  }
  0x69   :  { %v302_v59 = vld [vmem:[%s7457_s1 + $0x6e0] sm:$0xff]  ;;  %2659 = vmatprep.subr.bf16.mxu1 %v4858_v54  ;;  %v4866_v63 = vcombine.high %v283_v56, %v287_v57  ;;  %v291_v1 = vld [vmem:[%s7457_s1 + $0x688] sm:$0xff]  ;;  %v4865_v6 = vcombine.low %v283_v56, %v287_v57  ;;  %s4655_s26 = sshll.u32 %s5473_s25, 4  ;;  %s4656_s26 = int_to_ptr.vmem [resolvable:$true] %s4655_s26 }
  0x6a   :  { %2498 = vmatpush1.bf16.msra.mxu0 %v4863_v53  ;;  %v4880_v0 = vcombine.high %v298_v58, %v302_v59  ;;  %v295_v3 = vld [vmem:[%s7457_s1 + $0x6a8] sm:$0xff]  ;;  %v306_v4 = vld [vmem:[%s7457_s1 + $0x700] sm:$0xff]  ;;  %v4879_v7 = vcombine.low %v298_v58, %v302_v59  ;;  %v5979_v53 = vpack.c.bf16 %v5753_v24, %v5753_v24  ;;  %s5445_s27 = scalar_lea.vmem %s4656_s26, 32  ;;  %p5450_p1 = scmp.lt.s32.totalorder %s4656_s26, %s4656_s26 }
  0x6b   :  { %2499 = vmatprep.subr.bf16.mxu0 %v4872_v55  ;;  %v310_v5 = vld [vmem:[%s7457_s1 + $0x720] sm:$0xff]  ;;  %v4874_v8 = vcombine.high %v291_v1, %v295_v3  ;;  %v299_v11 = vld [vmem:[%s7457_s1 + $0x6c8] sm:$0xff]  ;;  %v4873_v16 = vcombine.low %v291_v1, %v295_v3  ;;  %p5446_p0 = scmp.ne.s32.totalorder %s4656_s26, %s5445_s27  ;;  %p5451_p2 = scmp.lt.s32.totalorder %s5445_s27, %s5445_s27 }
  0x6c   :  { %2660 = vmatpush1.bf16.msra.mxu1 %v4857_v60  ;;  %v4888_v10 = vcombine.high %v306_v4, %v310_v5  ;;  %v303_v12 = vld [vmem:[%s7457_s1 + $0x6e8] sm:$0xff]  ;;  %v314_v14 = vld [vmem:[%s7457_s1 + $0x740] sm:$0xff]  ;;  %v4887_v17 = vcombine.low %v306_v4, %v310_v5 }
  0x6d   :  { %2661 = vmatprep.subr.bf16.mxu1 %v4866_v63  ;;  %v318_v15 = vld [vmem:[%s7457_s1 + $0x760] sm:$0xff]  ;;  %v4882_v18 = vcombine.high %v299_v11, %v303_v12  ;;  %v307_v21 = vld [vmem:[%s7457_s1 + $0x708] sm:$0xff]  ;;  %v4881_v27 = vcombine.low %v299_v11, %v303_v12  ;;  %p5452_p3 = por %p5451_p2, %p5450_p1 }
  0x6e   :  { %2500 = vmatpush1.bf16.msra.mxu0 %v4871_v61  ;;  %v4896_v19 = vcombine.high %v314_v14, %v318_v15  ;;  %v311_v62 = vld [vmem:[%s7457_s1 + $0x728] sm:$0xff]  ;;  %v322_v23 = vld [vmem:[%s7457_s1 + $0x780] sm:$0xff]  ;;  %v4895_v28 = vcombine.low %v314_v14, %v318_v15  ;;  %v5993_v61 = vpack.c.bf16 %v67_v52, %v67_v52 }
  0x6f   :  { %2501 = vmatprep.subr.bf16.mxu0 %v4880_v0  ;;  %v326_v25 = vld [vmem:[%s7457_s1 + $0x7a0] sm:$0xff]  ;;  %v4890_v29 = vcombine.high %v307_v21, %v311_v62  ;;  %v315_v31 = vld [vmem:[%s7457_s1 + $0x748] sm:$0xff]  ;;  %v4889_v38 = vcombine.low %v307_v21, %v311_v62  ;;  %p5453_p4 = pnand %p5452_p3, %p5446_p0 }
  0x70   :  { %2662 = vmatpush1.bf16.msra.mxu1 %v4865_v6  ;;  %v4904_v30 = vcombine.high %v322_v23, %v326_v25  ;;  %v319_v32 = vld [vmem:[%s7457_s1 + $0x768] sm:$0xff]  ;;  %v330_v33 = vld [vmem:[%s7457_s1 + $0x7c0] sm:$0xff]  ;;  %v4903_v39 = vcombine.low %v322_v23, %v326_v25 }
  0x71   :  { %2663 = vmatprep.subr.bf16.mxu1 %v4874_v8  ;;  %v334_v35 = vld [vmem:[%s7457_s1 + $0x7e0] sm:$0xff]  ;;  %v4898_v40 = vcombine.high %v315_v31, %v319_v32  ;;  %v323_v2 = vld [vmem:[%s7457_s1 + $0x788] sm:$0xff]  ;;  %v4897_v44 = vcombine.low %v315_v31, %v319_v32 }
  0x72   :  { %2502 = vmatpush1.bf16.msra.mxu0 %v4879_v7  ;;  %v4912_v41 = vcombine.high %v330_v33, %v334_v35  ;;  %v327_v42 = vld [vmem:[%s7457_s1 + $0x7a8] sm:$0xff]  ;;  %v338_v20 = vld [vmem:[%s7457_s1 + $0x800] sm:$0xff]  ;;  %v4911_v45 = vcombine.low %v330_v33, %v334_v35 }
  0x73   :  { %2503 = vmatprep.subr.bf16.mxu0 %v4888_v10  ;;  %v342_v26 = vld [vmem:[%s7457_s1 + $0x820] sm:$0xff]  ;;  %v4906_v46 = vcombine.high %v323_v2, %v327_v42  ;;  %v331_v48 = vld [vmem:[%s7457_s1 + $0x7c8] sm:$0xff]  ;;  %v4905_v54 = vcombine.low %v323_v2, %v327_v42 }
  0x74   :  { %2664 = vmatpush1.bf16.msra.mxu1 %v4873_v16  ;;  %v4920_v47 = vcombine.high %v338_v20, %v342_v26  ;;  %v335_v49 = vld [vmem:[%s7457_s1 + $0x7e8] sm:$0xff]  ;;  %v346_v50 = vld [vmem:[%s7457_s1 + $0x840] sm:$0xff]  ;;  %v4919_v55 = vcombine.low %v338_v20, %v342_v26 }
  0x75   :  { %2665 = vmatprep.subr.bf16.mxu1 %v4882_v18  ;;  %v350_v51 = vld [vmem:[%s7457_s1 + $0x860] sm:$0xff]  ;;  %v4914_v56 = vcombine.high %v331_v48, %v335_v49  ;;  %v339_v58 = vld [vmem:[%s7457_s1 + $0x808] sm:$0xff]  ;;  %v4913_v63 = vcombine.low %v331_v48, %v335_v49 }
  0x76   :  { %2504 = vmatpush1.bf16.msra.mxu0 %v4887_v17  ;;  %v4928_v57 = vcombine.high %v346_v50, %v350_v51  ;;  %v343_v59 = vld [vmem:[%s7457_s1 + $0x828] sm:$0xff]  ;;  %v354_v24 = vld [vmem:[%s7457_s1 + $0x880] sm:$0xff]  ;;  %v4927_v0 = vcombine.low %v346_v50, %v350_v51 }
  0x77   :  { %2505 = vmatprep.subr.bf16.mxu0 %v4896_v19  ;;  %v358_v60 = vld [vmem:[%s7457_s1 + $0x8a0] sm:$0xff]  ;;  %v4922_v1 = vcombine.high %v339_v58, %v343_v59  ;;  %v347_v4 = vld [vmem:[%s7457_s1 + $0x848] sm:$0xff]  ;;  %v4921_v8 = vcombine.low %v339_v58, %v343_v59 }
  0x78   :  { %2666 = vmatpush1.bf16.msra.mxu1 %v4881_v27  ;;  %v4936_v3 = vcombine.high %v354_v24, %v358_v60  ;;  %v351_v5 = vld [vmem:[%s7457_s1 + $0x868] sm:$0xff]  ;;  %v362_v6 = vld [vmem:[%s7457_s1 + $0x8c0] sm:$0xff]  ;;  %v4935_v10 = vcombine.low %v354_v24, %v358_v60 }
  0x79   :  { %2667 = vmatprep.subr.bf16.mxu1 %v4890_v29  ;;  %v366_v7 = vld [vmem:[%s7457_s1 + $0x8e0] sm:$0xff]  ;;  %v4930_v11 = vcombine.high %v347_v4, %v351_v5  ;;  %v355_v14 = vld [vmem:[%s7457_s1 + $0x888] sm:$0xff]  ;;  %v4929_v18 = vcombine.low %v347_v4, %v351_v5 }
  0x7a   :  { %2506 = vmatpush1.bf16.msra.mxu0 %v4895_v28  ;;  %v4944_v12 = vcombine.high %v362_v6, %v366_v7  ;;  %v359_v15 = vld [vmem:[%s7457_s1 + $0x8a8] sm:$0xff]  ;;  %v370_v16 = vld [vmem:[%s7457_s1 + $0x900] sm:$0xff]  ;;  %v4943_v19 = vcombine.low %v362_v6, %v366_v7 }
  0x7b   :  { %2507 = vmatprep.subr.bf16.mxu0 %v4904_v30  ;;  %v374_v17 = vld [vmem:[%s7457_s1 + $0x920] sm:$0xff]  ;;  %v4938_v21 = vcombine.high %v355_v14, %v359_v15  ;;  %v363_v23 = vld [vmem:[%s7457_s1 + $0x8c8] sm:$0xff]  ;;  %v4937_v29 = vcombine.low %v355_v14, %v359_v15 }
  0x7c   :  { %2668 = vmatpush1.bf16.msra.mxu1 %v4889_v38  ;;  %v4952_v62 = vcombine.high %v370_v16, %v374_v17  ;;  %v367_v25 = vld [vmem:[%s7457_s1 + $0x8e8] sm:$0xff]  ;;  %v378_v27 = vld [vmem:[%s7457_s1 + $0x940] sm:$0xff]  ;;  %v4951_v30 = vcombine.low %v370_v16, %v374_v17 }
  0x7d   :  { %2669 = vmatprep.subr.bf16.mxu1 %v4898_v40  ;;  %v382_v28 = vld [vmem:[%s7457_s1 + $0x960] sm:$0xff]  ;;  %v4946_v31 = vcombine.high %v363_v23, %v367_v25  ;;  %v371_v33 = vld [vmem:[%s7457_s1 + $0x908] sm:$0xff]  ;;  %v4945_v40 = vcombine.low %v363_v23, %v367_v25 }
  0x7e   :  { %2508 = vmatpush1.bf16.msra.mxu0 %v4903_v39  ;;  %v4960_v32 = vcombine.high %v378_v27, %v382_v28  ;;  %v375_v35 = vld [vmem:[%s7457_s1 + $0x928] sm:$0xff]  ;;  %v386_v38 = vld [vmem:[%s7457_s1 + $0x980] sm:$0xff] }
  0x7f   :  { %2509 = vmatprep.subr.bf16.mxu0 %v4912_v41  ;;  %v390_v39 = vld [vmem:[%s7457_s1 + $0x9a0] sm:$0xff]  ;;  %v4959_v41 = vcombine.low %v378_v27, %v382_v28  ;;  %v4954_v2 = vcombine.high %v371_v33, %v375_v35  ;;  %v379_v20 = vld [vmem:[%s7457_s1 + $0x948] sm:$0xff] }
  0x80   :  { %2670 = vmatpush1.bf16.msra.mxu1 %v4897_v44  ;;  %v4968_v42 = vcombine.high %v386_v38, %v390_v39  ;;  %v383_v26 = vld [vmem:[%s7457_s1 + $0x968] sm:$0xff]  ;;  %v394_v44 = vld [vmem:[%s7457_s1 + $0x9c0] sm:$0xff] }
  0x81   :  { %2671 = vmatprep.subr.bf16.mxu1 %v4906_v46  ;;  %v4953_v46 = vcombine.low %v371_v33, %v375_v35  ;;  %v4962_v48 = vcombine.high %v379_v20, %v383_v26  ;;  %v387_v50 = vld [vmem:[%s7457_s1 + $0x988] sm:$0xff]  ;;  %v402_v52 = vld [vmem:[%s7457_s1 + $0xa00] sm:$0xff] }
  0x82   :  { %2510 = vmatpush1.bf16.msra.mxu0 %v4911_v45  ;;  %v398_v45 = vld [vmem:[%s7457_s1 + $0x9e0] sm:$0xff]  ;;  %v391_v51 = vld [vmem:[%s7457_s1 + $0x9a8] sm:$0xff] }
  0x83   :  { %2520 = vmatprep.subr.bf16.mxu0 %v4920_v47  ;;  %v4967_v47 = vcombine.low %v386_v38, %v390_v39  ;;  %v4976_v49 = vcombine.high %v394_v44, %v398_v45  ;;  %v395_v59 = vld [vmem:[%s7457_s1 + $0x9c8] sm:$0xff]  ;;  %v410_v60 = vld [vmem:[%s7457_s1 + $0xa40] sm:$0xff] }
  0x84   :  { %2672 = vmatpush1.bf16.msra.mxu1 %v4905_v54  ;;  %v406_v54 = vld [vmem:[%s7457_s1 + $0xa20] sm:$0xff]  ;;  %v399_v24 = vld [vmem:[%s7457_s1 + $0x9e8] sm:$0xff] }
  0x85   :  { %2512 = vmatmul.mubr.bf16.vlgmr.msra.gmra.mrb[0].mxu0 %v5979_v53  ;;  %2673 = vmatprep.subr.bf16.mxu1 %v4914_v56  ;;  %v4975_v56 = vcombine.low %v394_v44, %v398_v45  ;;  %v4984_v58 = vcombine.high %v402_v52, %v406_v54  ;;  %v403_v5 = vld [vmem:[%s7457_s1 + $0xa08] sm:$0xff]  ;;  %v418_v7 = vld [vmem:[%s7457_s1 + $0xa80] sm:$0xff] }
  0x86   :  { %2521 = vmatpush1.bf16.msra.mxu0 %v4919_v55  ;;  %2552 = vmatprep.mubr.bf16.mxu0 %v5993_v61  ;;  %v4961_v55 = vcombine.low %v379_v20, %v383_v26  ;;  %v407_v6 = vld [vmem:[%s7457_s1 + $0xa28] sm:$0xff]  ;;  %v426_v17 = vld [vmem:[%s7457_s1 + $0xac0] sm:$0xff] }
  0x87   :  { %2522 = vmatprep.subr.bf16.mxu0 %v4928_v57  ;;  %v4970_v57 = vcombine.high %v387_v50, %v391_v51  ;;  %v411_v15 = vld [vmem:[%s7457_s1 + $0xa48] sm:$0xff]  ;;  %v434_v28 = vld [vmem:[%s7457_s1 + $0xb00] sm:$0xff] }
  0x88   :  { %2674 = vmatpush1.bf16.msra.mxu1 %v4913_v63  ;;  %v414_v63 = vld [vmem:[%s7457_s1 + $0xa60] sm:$0xff]  ;;  %v415_v16 = vld [vmem:[%s7457_s1 + $0xa68] sm:$0xff] }
  0x89   :  { %2684 = vmatprep.subr.bf16.mxu1 %v4922_v1  ;;  %v4983_v1 = vcombine.low %v402_v52, %v406_v54  ;;  %v4992_v4 = vcombine.high %v410_v60, %v414_v63  ;;  %v419_v25 = vld [vmem:[%s7457_s1 + $0xa88] sm:$0xff]  ;;  %v442_v39 = vld [vmem:[%s7457_s1 + $0xb40] sm:$0xff] }
  0x8a   :  { %2523 = vmatpush1.bf16.msra.mxu0 %v4927_v0  ;;  %v4969_v0 = vcombine.low %v387_v50, %v391_v51  ;;  %v423_v27 = vld [vmem:[%s7457_s1 + $0xaa8] sm:$0xff]  ;;  %v450_v45 = vld [vmem:[%s7457_s1 + $0xb80] sm:$0xff] }
  0x8b   :  { %2524 = vmatprep.subr.bf16.mxu0 %v4936_v3  ;;  %2676 = vmatmul.mubr.bf16.vlgmr.msra.gmra.mrb[4].mxu1 %v5979_v53  ;;  %v4978_v3 = vcombine.high %v395_v59, %v399_v24  ;;  %v427_v35 = vld [vmem:[%s7457_s1 + $0xac8] sm:$0xff]  ;;  %v458_v54 = vld [vmem:[%s7457_s1 + $0xbc0] sm:$0xff] }
  0x8c   :  { %2685 = vmatpush1.bf16.msra.mxu1 %v4921_v8  ;;  %2716 = vmatprep.mubr.bf16.mxu1 %v5993_v61  ;;  %v422_v8 = vld [vmem:[%s7457_s1 + $0xaa0] sm:$0xff]  ;;  %v431_v38 = vld [vmem:[%s7457_s1 + $0xae8] sm:$0xff] }
  0x8d   :  { %2686 = vmatprep.subr.bf16.mxu1 %v4930_v11  ;;  %v4991_v11 = vcombine.low %v410_v60, %v414_v63  ;;  %v5000_v14 = vcombine.high %v418_v7, %v422_v8  ;;  %v435_v26 = vld [vmem:[%s7457_s1 + $0xb08] sm:$0xff]  ;;  %v84_v63 = vld [vmem:[%s7457_s1 + $0x10] sm:$0xff] }
  0x8e   :  { %2525 = vmatpush1.bf16.msra.mxu0 %v4935_v10  ;;  %v4977_v10 = vcombine.low %v395_v59, %v399_v24  ;;  %v439_v44 = vld [vmem:[%s7457_s1 + $0xb28] sm:$0xff] }
  0x8f   :  { %2526 = vmatprep.subr.bf16.mxu0 %v4944_v12  ;;  %v4986_v12 = vcombine.high %v403_v5, %v407_v6  ;;  %v443_v51 = vld [vmem:[%s7457_s1 + $0xb48] sm:$0xff] }
  0x90   :  { %2687 = vmatpush1.bf16.msra.mxu1 %v4929_v18  ;;  %v430_v18 = vld [vmem:[%s7457_s1 + $0xae0] sm:$0xff]  ;;  %v447_v52 = vld [vmem:[%s7457_s1 + $0xb68] sm:$0xff] }
  0x91   :  { %2688 = vmatprep.subr.bf16.mxu1 %v4938_v21  ;;  %v4999_v21 = vcombine.low %v418_v7, %v422_v8  ;;  %v5008_v23 = vcombine.high %v426_v17, %v430_v18  ;;  %v451_v24 = vld [vmem:[%s7457_s1 + $0xb88] sm:$0xff]  ;;  %v92_v8 = vld [vmem:[%s7457_s1 + $0x50] sm:$0xff] }
  0x92   :  { %2527 = vmatpush1.bf16.msra.mxu0 %v4943_v19  ;;  %v4985_v19 = vcombine.low %v403_v5, %v407_v6  ;;  %v455_v60 = vld [vmem:[%s7457_s1 + $0xba8] sm:$0xff] }
  0x93   :  { %2528 = vmatprep.subr.bf16.mxu0 %v4952_v62  ;;  %v4994_v62 = vcombine.high %v411_v15, %v415_v16  ;;  %v459_v6 = vld [vmem:[%s7457_s1 + $0xbc8] sm:$0xff] }
  0x94   :  { %2689 = vmatpush1.bf16.msra.mxu1 %v4937_v29  ;;  %v438_v29 = vld [vmem:[%s7457_s1 + $0xb20] sm:$0xff]  ;;  %v463_v7 = vld [vmem:[%s7457_s1 + $0xbe8] sm:$0xff] }
  0x95   :  { %2690 = vmatprep.subr.bf16.mxu1 %v4946_v31  ;;  %v5007_v31 = vcombine.low %v426_v17, %v430_v18  ;;  %v5016_v33 = vcombine.high %v434_v28, %v438_v29  ;;  %v100_v17 = vld [vmem:[%s7457_s1 + $0x90] sm:$0xff]  ;;  %v467_v18 = vld [vmem:[%s7457_s1 + $0xc08] sm:$0xff] }
  0x96   :  { %2529 = vmatpush1.bf16.msra.mxu0 %v4951_v30  ;;  %v4993_v30 = vcombine.low %v411_v15, %v415_v16  ;;  %v5042_v15 = vcombine.high %v459_v6, %v463_v7 }
  0x97   :  { %2530 = vmatprep.subr.bf16.mxu0 %v4960_v32  ;;  %v5002_v32 = vcombine.high %v419_v25, %v423_v27 }
  0x98   :  { %2691 = vmatpush1.bf16.msra.mxu1 %v4945_v40  ;;  %v446_v40 = vld [vmem:[%s7457_s1 + $0xb60] sm:$0xff] }
  0x99   :  { %2692 = vmatprep.subr.bf16.mxu1 %v4954_v2  ;;  %v5015_v2 = vcombine.low %v434_v28, %v438_v29  ;;  %v5024_v20 = vcombine.high %v442_v39, %v446_v40  ;;  %v112_v28 = vld [vmem:[%s7457_s1 + $0xf0] sm:$0xff] }
  0x9a   :  { %2531 = vmatpush1.bf16.msra.mxu0 %v4959_v41  ;;  %v5001_v41 = vcombine.low %v419_v25, %v423_v27  ;;  %v108_v27 = vld [vmem:[%s7457_s1 + $0xd0] sm:$0xff] }
  0x9b   :  { %2532 = vmatprep.subr.bf16.mxu0 %v4968_v42  ;;  %v5010_v42 = vcombine.high %v427_v35, %v431_v38  ;;  %v468_v29 = vld [vmem:[%s7457_s1 + $0xc10] sm:$0xff] }
  0x9c   :  { %2693 = vmatpush1.bf16.msra.mxu1 %v4953_v46  ;;  %v454_v46 = vld [vmem:[%s7457_s1 + $0xba0] sm:$0xff] }
  0x9d   :  { %2694 = vmatprep.subr.bf16.mxu1 %v4962_v48  ;;  %v5023_v48 = vcombine.low %v442_v39, %v446_v40  ;;  %v5032_v50 = vcombine.high %v450_v45, %v454_v46  ;;  %v4691_v40 = vcombine.low %v108_v27, %v112_v28 }
  0x9e   :  { %2533 = vmatpush1.bf16.msra.mxu0 %v4967_v47  ;;  %v5009_v47 = vcombine.low %v427_v35, %v431_v38  ;;  %v116_v35 = vld [vmem:[%s7457_s1 + $0x110] sm:$0xff] }
  0x9f   :  { %2534 = vmatprep.subr.bf16.mxu0 %v4976_v49  ;;  %v5018_v49 = vcombine.high %v435_v26, %v439_v44  ;;  %v120_v38 = vld [vmem:[%s7457_s1 + $0x130] sm:$0xff] }
  0xa0   :  { %2695 = vmatpush1.bf16.msra.mxu1 %v4961_v55  ;;  %v462_v55 = vld [vmem:[%s7457_s1 + $0xbe0] sm:$0xff] }
  0xa1   :  { %2696 = vmatprep.subr.bf16.mxu1 %v4970_v57  ;;  %v5031_v57 = vcombine.low %v450_v45, %v454_v46  ;;  %v5040_v59 = vcombine.high %v458_v54, %v462_v55  ;;  %v136_v45 = vld [vmem:[%s7457_s1 + $0x1b0] sm:$0xff]  ;;  %v85_v46 = vld [vmem:[%s7457_s1 + $0x18] sm:$0xff] }
  0xa2   :  { %2535 = vmatpush1.bf16.msra.mxu0 %v4975_v56  ;;  %v5017_v56 = vcombine.low %v435_v26, %v439_v44  ;;  %v132_v44 = vld [vmem:[%s7457_s1 + $0x190] sm:$0xff] }
  0xa3   :  { %2536 = vmatprep.subr.bf16.mxu0 %v4984_v58  ;;  %v5026_v58 = vcombine.high %v443_v51, %v447_v52 }
  0xa4   :  { %2697 = vmatpush1.bf16.msra.mxu1 %v4969_v0  ;;  %v88_v0 = vld [vmem:[%s7457_s1 + $0x30] sm:$0xff] }
  0xa5   :  { %2698 = vmatprep.subr.bf16.mxu1 %v4978_v3  ;;  %v5039_v3 = vcombine.low %v458_v54, %v462_v55  ;;  %v4668_v5 = vcombine.high %v84_v63, %v88_v0  ;;  %v144_v54 = vld [vmem:[%s7457_s1 + $0x1f0] sm:$0xff]  ;;  %v4715_v55 = vcombine.low %v132_v44, %v136_v45 }
  0xa6   :  { %2537 = vmatpush1.bf16.msra.mxu0 %v4983_v1  ;;  %v5025_v1 = vcombine.low %v443_v51, %v447_v52  ;;  %v140_v52 = vld [vmem:[%s7457_s1 + $0x1d0] sm:$0xff] }
  0xa7   :  { %2538 = vmatprep.subr.bf16.mxu0 %v4992_v4  ;;  %v5034_v4 = vcombine.high %v451_v24, %v455_v60 }
  0xa8   :  { %2699 = vmatpush1.bf16.msra.mxu1 %v4977_v10  ;;  %v96_v10 = vld [vmem:[%s7457_s1 + $0x70] sm:$0xff] }
  0xa9   :  { %2700 = vmatprep.subr.bf16.mxu1 %v4986_v12  ;;  %v5033_v12 = vcombine.low %v451_v24, %v455_v60  ;;  %v4676_v16 = vcombine.high %v92_v8, %v96_v10  ;;  %v152_v24 = vld [vmem:[%s7457_s1 + $0x230] sm:$0xff] }
  0xaa   :  { %2539 = vmatpush1.bf16.msra.mxu0 %v4991_v11  ;;  %v6181_v11 = vpack.c.bf16 %v5775_v37, %v5775_v37  ;;  %v471_v37 = vld [vmem:[%s7457_s1 + $0xc28] sm:$0xff] }
  0xab   :  { %2540 = vmatprep.subr.bf16.mxu0 %v5000_v14  ;;  %v4667_v14 = vcombine.low %v84_v63, %v88_v0  ;;  %v4723_v63 = vcombine.low %v140_v52, %v144_v54 }
  0xac   :  { %2701 = vmatpush1.bf16.msra.mxu1 %v4985_v19  ;;  %v104_v19 = vld [vmem:[%s7457_s1 + $0xb0] sm:$0xff] }
  0xad   :  { %2702 = vmatprep.subr.bf16.mxu1 %v4994_v62  ;;  %v4675_v62 = vcombine.low %v92_v8, %v96_v10  ;;  %v4684_v25 = vcombine.high %v100_v17, %v104_v19 }
  0xae   :  { %2541 = vmatpush1.bf16.msra.mxu0 %v4999_v21  ;;  %v5041_v21 = vcombine.low %v459_v6, %v463_v7  ;;  %v156_v6 = vld [vmem:[%s7457_s1 + $0x250] sm:$0xff] }
  0xaf   :  { %2542 = vmatprep.subr.bf16.mxu0 %v5008_v23  ;;  %v5050_v23 = vcombine.high %v467_v18, %v471_v37  ;;  %v160_v7 = vld [vmem:[%s7457_s1 + $0x270] sm:$0xff] }
  0xb0   :  { %2703 = vmatpush1.bf16.msra.mxu1 %v4993_v30  ;;  %v472_v30 = vld [vmem:[%s7457_s1 + $0xc30] sm:$0xff] }
  0xb1   :  { %2704 = vmatprep.subr.bf16.mxu1 %v5002_v32  ;;  %v4683_v32 = vcombine.low %v100_v17, %v104_v19  ;;  %v5052_v39 = vcombine.high %v468_v29, %v472_v30  ;;  %v4740_v17 = vcombine.high %v156_v6, %v160_v7  ;;  %v164_v19 = vld [vmem:[%s7457_s1 + $0x290] sm:$0xff] }
  0xb2   :  { %2543 = vmatpush1.bf16.msra.mxu0 %v5007_v31  ;;  %v5049_v31 = vcombine.low %v467_v18, %v471_v37  ;;  %v109_v18 = vld [vmem:[%s7457_s1 + $0xd8] sm:$0xff] }
  0xb3   :  { %2544 = vmatprep.subr.bf16.mxu0 %v5016_v33  ;;  %v4692_v33 = vcombine.high %v108_v27, %v112_v28  ;;  %v113_v37 = vld [vmem:[%s7457_s1 + $0xf8] sm:$0xff] }
  0xb4   :  { %2705 = vmatpush1.bf16.msra.mxu1 %v5001_v41  ;;  %v4700_v41 = vcombine.high %v116_v35, %v120_v38  ;;  %v117_v28 = vld [vmem:[%s7457_s1 + $0x118] sm:$0xff] }
  0xb5   :  { %2706 = vmatprep.subr.bf16.mxu1 %v5010_v42  ;;  %v128_v42 = vld [vmem:[%s7457_s1 + $0x170] sm:$0xff] }
  0xb6   :  { %2545 = vmatpush1.bf16.msra.mxu0 %v5015_v2  ;;  %v124_v2 = vld [vmem:[%s7457_s1 + $0x150] sm:$0xff] }
  0xb7   :  { %2546 = vmatprep.subr.bf16.mxu0 %v5024_v20  ;;  %v4699_v20 = vcombine.low %v116_v35, %v120_v38  ;;  %v4708_v26 = vcombine.high %v124_v2, %v128_v42  ;;  %v125_v38 = vld [vmem:[%s7457_s1 + $0x158] sm:$0xff] }
  0xb8   :  { %2707 = vmatpush1.bf16.msra.mxu1 %v5009_v47  ;;  %v89_v47 = vld [vmem:[%s7457_s1 + $0x38] sm:$0xff] }
  0xb9   :  { %2708 = vmatprep.subr.bf16.mxu1 %v5018_v49  ;;  %v4707_v49 = vcombine.low %v124_v2, %v128_v42  ;;  %v4670_v51 = vcombine.high %v85_v46, %v89_v47  ;;  %v4669_v60 = vcombine.low %v85_v46, %v89_v47  ;;  %v188_v46 = vld [vmem:[%s7457_s1 + $0x350] sm:$0xff] }
  0xba   :  { %2547 = vmatpush1.bf16.msra.mxu0 %v5023_v48  ;;  %v5051_v48 = vcombine.low %v468_v29, %v472_v30  ;;  %v121_v29 = vld [vmem:[%s7457_s1 + $0x138] sm:$0xff]  ;;  %v176_v30 = vld [vmem:[%s7457_s1 + $0x2f0] sm:$0xff] }
  0xbb   :  { %2548 = vmatprep.subr.bf16.mxu0 %v5032_v50  ;;  %v4716_v50 = vcombine.high %v132_v44, %v136_v45  ;;  %v4701_v2 = vcombine.low %v117_v28, %v121_v29  ;;  %v133_v44 = vld [vmem:[%s7457_s1 + $0x198] sm:$0xff]  ;;  %v192_v47 = vld [vmem:[%s7457_s1 + $0x370] sm:$0xff] }
  0xbc   :  { %2709 = vmatpush1.bf16.msra.mxu1 %v5017_v56  ;;  %v4724_v56 = vcombine.high %v140_v52, %v144_v54  ;;  %v137_v45 = vld [vmem:[%s7457_s1 + $0x1b8] sm:$0xff] }
  0xbd   :  { %2710 = vmatprep.subr.bf16.mxu1 %v5026_v58  ;;  %v97_v58 = vld [vmem:[%s7457_s1 + $0x78] sm:$0xff] }
  0xbe   :  { %2549 = vmatpush1.bf16.msra.mxu0 %v5031_v57  ;;  %v93_v57 = vld [vmem:[%s7457_s1 + $0x58] sm:$0xff] }
  0xbf   :  { %2550 = vmatprep.subr.bf16.mxu0 %v5040_v59  ;;  %v148_v59 = vld [vmem:[%s7457_s1 + $0x210] sm:$0xff]  ;;  %v4678_v0 = vcombine.high %v93_v57, %v97_v58  ;;  %v141_v52 = vld [vmem:[%s7457_s1 + $0x1d8] sm:$0xff] }
  0xc0   :  { %2711 = vmatpush1.bf16.msra.mxu1 %v5025_v1  ;;  %v4732_v1 = vcombine.high %v148_v59, %v152_v24  ;;  %v145_v54 = vld [vmem:[%s7457_s1 + $0x1f8] sm:$0xff] }
  0xc1   :  { %2712 = vmatprep.subr.bf16.mxu1 %v5034_v4 }
  0xc2   :  { %2551 = vmatpush1.bf16.msra.mxu0 %v5039_v3  ;;  %v101_v3 = vld [vmem:[%s7457_s1 + $0x98] sm:$0xff] }
  0xc3   :  { %2766 = vmatprep.subr.bf16.mxu0 %v4668_v5  ;;  %v105_v5 = vld [vmem:[%s7457_s1 + $0xb8] sm:$0xff] }
  0xc4   :  { %2713 = vmatpush1.bf16.msra.mxu1 %v5033_v12  ;;  %v4677_v12 = vcombine.low %v93_v57, %v97_v58  ;;  %v4717_v57 = vcombine.low %v133_v44, %v137_v45  ;;  %v4771_v58 = vcombine.low %v188_v46, %v192_v47 }
  0xc5   :  { %2553 = vmatmul.mubr.bf16.vlgmr.msra.gmra.mrb[0].mxu0 %v6181_v11  ;;  %2714 = vmatprep.subr.bf16.mxu1 %v5042_v15 }
  0xc6   :  { %2767 = vmatpush1.bf16.msra.mxu0 %v4667_v14  ;;  %2798 = vmatprep.mubr.bf16.mxu0 %v5650_v13  ;;  %v4731_v14 = vcombine.low %v148_v59, %v152_v24  ;;  %v4726_v59 = vcombine.high %v141_v52, %v145_v54 }
  0xc7   :  { %2768 = vmatprep.subr.bf16.mxu0 %v4676_v16  ;;  %v4686_v16 = vcombine.high %v101_v3, %v105_v5 }
  0xc8   :  { %2715 = vmatpush1.bf16.msra.mxu1 %v5041_v21  ;;  %v168_v21 = vld [vmem:[%s7457_s1 + $0x2b0] sm:$0xff] }
  0xc9   :  { %2725 = vmatprep.subr.bf16.mxu1 %v5050_v23  ;;  %v4739_v23 = vcombine.low %v156_v6, %v160_v7  ;;  %v4748_v27 = vcombine.high %v164_v19, %v168_v21 }
  0xca   :  { %2769 = vmatpush1.bf16.msra.mxu0 %v4675_v62  ;;  %v4685_v62 = vcombine.low %v101_v3, %v105_v5  ;;  %v4725_v3 = vcombine.low %v141_v52, %v145_v54 }
  0xcb   :  { %2770 = vmatprep.subr.bf16.mxu0 %v4684_v25  ;;  %2717 = vmatmul.mubr.bf16.vlgmr.msra.gmra.mrb[4].mxu1 %v6181_v11  ;;  %v4694_v25 = vcombine.high %v109_v18, %v113_v37 }
  0xcc   :  { %2726 = vmatpush1.bf16.msra.mxu1 %v5049_v31  ;;  %2757 = vmatprep.mubr.bf16.mxu1 %v5469_v9  ;;  %v4693_v31 = vcombine.low %v109_v18, %v113_v37 }
  0xcd   :  { %2889 = vmatprep.subr.bf16.mxu1 %v5052_v39  ;;  %v129_v39 = vld [vmem:[%s7457_s1 + $0x178] sm:$0xff] }
  0xce   :  { %2771 = vmatpush1.bf16.msra.mxu0 %v4683_v32  ;;  %v4747_v32 = vcombine.low %v164_v19, %v168_v21  ;;  %v165_v19 = vld [vmem:[%s7457_s1 + $0x298] sm:$0xff] }
  0xcf   :  { %2772 = vmatprep.subr.bf16.mxu0 %v4692_v33  ;;  %v4702_v33 = vcombine.high %v117_v28, %v121_v29  ;;  %v169_v21 = vld [vmem:[%s7457_s1 + $0x2b8] sm:$0xff] }
  0xd0   :  { %v4750_v28 = vcombine.high %v165_v19, %v169_v21 }
  0xd2   :  { %2773 = vmatpush1.bf16.msra.mxu0 %v4691_v40  ;;  %v180_v40 = vld [vmem:[%s7457_s1 + $0x310] sm:$0xff] }
  0xd3   :  { %2774 = vmatprep.subr.bf16.mxu0 %v4700_v41  ;;  %v184_v41 = vld [vmem:[%s7457_s1 + $0x330] sm:$0xff] }
  0xd6   :  { %2775 = vmatpush1.bf16.msra.mxu0 %v4699_v20  ;;  %v4710_v20 = vcombine.high %v125_v38, %v129_v39 }
  0xd7   :  { %2776 = vmatprep.subr.bf16.mxu0 %v4708_v26  ;;  %5056 = vmatmul.mubr.msk.bf16.vlgmr.msra.gmra.mrb[4].mxu1 %vm2434_vm0, %v5575_v34  ;;  %v4764_v26 = vcombine.high %v180_v40, %v184_v41 }
  0xd8   :  { %2890 = vmatpush1.bf16.msra.mxu1 %v5051_v48  ;;  %2921 = vmatprep.mubr.bf16.mxu1 %v5469_v9  ;;  %v4709_v48 = vcombine.low %v125_v38, %v129_v39 }
  0xd9   :  { %2930 = vmatprep.subr.bf16.mxu1 %v4670_v51  ;;  %v4772_v51 = vcombine.high %v188_v46, %v192_v47  ;;  %v189_v46 = vld [vmem:[%s7457_s1 + $0x358] sm:$0xff] }
  0xda   :  { %2777 = vmatpush1.bf16.msra.mxu0 %v4707_v49  ;;  %v4763_v49 = vcombine.low %v180_v40, %v184_v41  ;;  %v181_v40 = vld [vmem:[%s7457_s1 + $0x318] sm:$0xff] }
  0xdb   :  { %2778 = vmatprep.subr.bf16.mxu0 %v4716_v50  ;;  %v4718_v50 = vcombine.high %v133_v44, %v137_v45  ;;  %v185_v41 = vld [vmem:[%s7457_s1 + $0x338] sm:$0xff] }
  0xdc   :  { %v4766_v44 = vcombine.high %v181_v40, %v185_v41  ;;  %v193_v47 = vld [vmem:[%s7457_s1 + $0x378] sm:$0xff] }
  0xdd   :  { %v4774_v52 = vcombine.high %v189_v46, %v193_v47 }
  0xde   :  { %2779 = vmatpush1.bf16.msra.mxu0 %v4715_v55  ;;  %v6259_v4 = vpop.f32.mrb[0].mxu1  ;;  %v196_v55 = vld [vmem:[%s7457_s1 + $0x390] sm:$0xff] }
  0xdf   :  { %2780 = vmatprep.subr.bf16.mxu0 %v4724_v56  ;;  %5057 = vmatmul.mubr.msk.bf16.vlgmr.msra.gmra.mrb[8].mxu1 %vm2434_vm0, %v5575_v34  ;;  %v6272_v8 = vpop.f32.mrb[1].mxu1  ;;  %v200_v56 = vld [vmem:[%s7457_s1 + $0x3b0] sm:$0xff] }
  0xe0   :  { %2931 = vmatpush1.bf16.msra.mxu1 %v4669_v60  ;;  %v2599_v10 = vpop.f32.mrb[2].mxu1  ;;  %2962 = vmatprep.mubr.bf16.mxu1 %v5650_v13  ;;  %v172_v13 = vld [vmem:[%s7457_s1 + $0x2d0] sm:$0xff]  ;;  %v4780_v24 = vcombine.high %v196_v55, %v200_v56  ;;  %v149_v60 = vld [vmem:[%s7457_s1 + $0x218] sm:$0xff]  ;;  %v4779_v5 = vcombine.low %v196_v55, %v200_v56 }
  0xe1   :  { %v2600_v15 = vpop.f32.mrb[3].mxu1  ;;  %2932 = vmatprep.subr.bf16.mxu1 %v4678_v0  ;;  %v4756_v35 = vcombine.high %v172_v13, %v176_v30  ;;  %v4755_v42 = vcombine.low %v172_v13, %v176_v30  ;;  %v204_v0 = vld [vmem:[%s7457_s1 + $0x3d0] sm:$0xff]  ;;  %v157_v10 = vld [vmem:[%s7457_s1 + $0x258] sm:$0xff] }
  0xe2   :  { %2781 = vmatpush1.bf16.msra.mxu0 %v4723_v63  ;;  %v153_v63 = vld [vmem:[%s7457_s1 + $0x238] sm:$0xff]  ;;  %v216_v15 = vld [vmem:[%s7457_s1 + $0x430] sm:$0xff] }
  0xe3   :  { %2782 = vmatprep.subr.bf16.mxu0 %v4732_v1  ;;  %v208_v1 = vld [vmem:[%s7457_s1 + $0x3f0] sm:$0xff]  ;;  %v4734_v6 = vcombine.high %v149_v60, %v153_v63  ;;  %v173_v13 = vld [vmem:[%s7457_s1 + $0x2d8] sm:$0xff] }
  0xe4   :  { %2933 = vmatpush1.bf16.msra.mxu1 %v4677_v12  ;;  %v4788_v7 = vcombine.high %v204_v0, %v208_v1  ;;  %v161_v12 = vld [vmem:[%s7457_s1 + $0x278] sm:$0xff] }
  0xe5   :  { %2934 = vmatprep.subr.bf16.mxu1 %v4686_v16  ;;  %v4733_v16 = vcombine.low %v149_v60, %v153_v63  ;;  %v4742_v18 = vcombine.high %v157_v10, %v161_v12  ;;  %v177_v30 = vld [vmem:[%s7457_s1 + $0x2f8] sm:$0xff] }
  0xe6   :  { %2783 = vmatpush1.bf16.msra.mxu0 %v4731_v14  ;;  %v212_v14 = vld [vmem:[%s7457_s1 + $0x410] sm:$0xff]  ;;  %v4758_v38 = vcombine.high %v173_v13, %v177_v30  ;;  %v197_v55 = vld [vmem:[%s7457_s1 + $0x398] sm:$0xff] }
  0xe7   :  { %2784 = vmatprep.subr.bf16.mxu0 %v4740_v17  ;;  %v4787_v17 = vcombine.low %v204_v0, %v208_v1  ;;  %v4796_v37 = vcombine.high %v212_v14, %v216_v15  ;;  %v201_v56 = vld [vmem:[%s7457_s1 + $0x3b8] sm:$0xff] }
  0xe8   :  { %2935 = vmatpush1.bf16.msra.mxu1 %v4685_v62  ;;  %v220_v62 = vld [vmem:[%s7457_s1 + $0x450] sm:$0xff]  ;;  %v4782_v60 = vcombine.high %v197_v55, %v201_v56  ;;  %v205_v0 = vld [vmem:[%s7457_s1 + $0x3d8] sm:$0xff] }
  0xe9   :  { %2936 = vmatprep.subr.bf16.mxu1 %v4694_v25  ;;  %v4741_v25 = vcombine.low %v157_v10, %v161_v12  ;;  %v209_v1 = vld [vmem:[%s7457_s1 + $0x3f8] sm:$0xff] }
  0xea   :  { %2785 = vmatpush1.bf16.msra.mxu0 %v4739_v23  ;;  %v224_v23 = vld [vmem:[%s7457_s1 + $0x470] sm:$0xff]  ;;  %v4790_v10 = vcombine.high %v205_v0, %v209_v1 }
  0xeb   :  { %2786 = vmatprep.subr.bf16.mxu0 %v4748_v27  ;;  %v4795_v27 = vcombine.low %v212_v14, %v216_v15  ;;  %v4804_v29 = vcombine.high %v220_v62, %v224_v23  ;;  %v213_v14 = vld [vmem:[%s7457_s1 + $0x418] sm:$0xff] }
  0xec   :  { %2937 = vmatpush1.bf16.msra.mxu1 %v4693_v31  ;;  %v228_v31 = vld [vmem:[%s7457_s1 + $0x490] sm:$0xff]  ;;  %v217_v15 = vld [vmem:[%s7457_s1 + $0x438] sm:$0xff] }
  0xed   :  { %2938 = vmatprep.subr.bf16.mxu1 %v4702_v33  ;;  %v4749_v33 = vcombine.low %v165_v19, %v169_v21  ;;  %v4798_v19 = vcombine.high %v213_v14, %v217_v15 }
  0xee   :  { %2787 = vmatpush1.bf16.msra.mxu0 %v4747_v32  ;;  %v232_v32 = vld [vmem:[%s7457_s1 + $0x4b0] sm:$0xff] }
  0xef   :  { %2788 = vmatprep.subr.bf16.mxu0 %v4756_v35  ;;  %v4803_v35 = vcombine.low %v220_v62, %v224_v23  ;;  %v4812_v39 = vcombine.high %v228_v31, %v232_v32  ;;  %v221_v62 = vld [vmem:[%s7457_s1 + $0x458] sm:$0xff] }
  0xf0   :  { %2939 = vmatpush1.bf16.msra.mxu1 %v4701_v2  ;;  %v236_v2 = vld [vmem:[%s7457_s1 + $0x4d0] sm:$0xff]  ;;  %v225_v23 = vld [vmem:[%s7457_s1 + $0x478] sm:$0xff] }
  0xf1   :  { %2940 = vmatprep.subr.bf16.mxu1 %v4710_v20  ;;  %v4757_v20 = vcombine.low %v173_v13, %v177_v30  ;;  %v4806_v13 = vcombine.high %v221_v62, %v225_v23 }
  0xf2   :  { %2789 = vmatpush1.bf16.msra.mxu0 %v4755_v42  ;;  %v240_v42 = vld [vmem:[%s7457_s1 + $0x4f0] sm:$0xff] }
  0xf3   :  { %2790 = vmatprep.subr.bf16.mxu0 %v4764_v26  ;;  %v4811_v26 = vcombine.low %v228_v31, %v232_v32  ;;  %v4820_v45 = vcombine.high %v236_v2, %v240_v42  ;;  %v229_v31 = vld [vmem:[%s7457_s1 + $0x498] sm:$0xff] }
  0xf4   :  { %2941 = vmatpush1.bf16.msra.mxu1 %v4709_v48  ;;  %v244_v48 = vld [vmem:[%s7457_s1 + $0x510] sm:$0xff]  ;;  %v233_v32 = vld [vmem:[%s7457_s1 + $0x4b8] sm:$0xff] }
  0xf5   :  { %2942 = vmatprep.subr.bf16.mxu1 %v4718_v50  ;;  %v4765_v50 = vcombine.low %v181_v40, %v185_v41  ;;  %v4814_v40 = vcombine.high %v229_v31, %v233_v32 }
  0xf6   :  { %2791 = vmatpush1.bf16.msra.mxu0 %v4763_v49  ;;  %v248_v49 = vld [vmem:[%s7457_s1 + $0x530] sm:$0xff] }
  0xf7   :  { %2792 = vmatprep.subr.bf16.mxu0 %v4772_v51  ;;  %v4819_v51 = vcombine.low %v236_v2, %v240_v42  ;;  %v4828_v54 = vcombine.high %v244_v48, %v248_v49  ;;  %v237_v2 = vld [vmem:[%s7457_s1 + $0x4d8] sm:$0xff] }
  0xf8   :  { %2943 = vmatpush1.bf16.msra.mxu1 %v4717_v57  ;;  %v252_v57 = vld [vmem:[%s7457_s1 + $0x550] sm:$0xff]  ;;  %v241_v42 = vld [vmem:[%s7457_s1 + $0x4f8] sm:$0xff] }
  0xf9   :  { %2944 = vmatprep.subr.bf16.mxu1 %v4726_v59  ;;  %v4773_v59 = vcombine.low %v189_v46, %v193_v47  ;;  %v245_v47 = vld [vmem:[%s7457_s1 + $0x518] sm:$0xff] }
  0xfa   :  { %2793 = vmatpush1.bf16.msra.mxu0 %v4771_v58  ;;  %v256_v58 = vld [vmem:[%s7457_s1 + $0x570] sm:$0xff] }
  0xfb   :  { %2794 = vmatprep.subr.bf16.mxu0 %v4780_v24  ;;  %v4827_v24 = vcombine.low %v244_v48, %v248_v49  ;;  %v4836_v63 = vcombine.high %v252_v57, %v256_v58  ;;  %v249_v48 = vld [vmem:[%s7457_s1 + $0x538] sm:$0xff]  ;;  %v304_v49 = vld [vmem:[%s7457_s1 + $0x6f0] sm:$0xff] }
  0xfc   :  { %2945 = vmatpush1.bf16.msra.mxu1 %v4725_v3  ;;  %v260_v3 = vld [vmem:[%s7457_s1 + $0x590] sm:$0xff] }
  0xfd   :  { %2946 = vmatprep.subr.bf16.mxu1 %v4734_v6  ;;  %v4781_v6 = vcombine.low %v197_v55, %v201_v56  ;;  %v253_v55 = vld [vmem:[%s7457_s1 + $0x558] sm:$0xff] }
  0xfe   :  { %2795 = vmatpush1.bf16.msra.mxu0 %v4779_v5  ;;  %v264_v5 = vld [vmem:[%s7457_s1 + $0x5b0] sm:$0xff]  ;;  %v257_v56 = vld [vmem:[%s7457_s1 + $0x578] sm:$0xff] }
  0xff   :  { %2796 = vmatprep.subr.bf16.mxu0 %v4788_v7  ;;  %v4835_v7 = vcombine.low %v252_v57, %v256_v58  ;;  %v4844_v12 = vcombine.high %v260_v3, %v264_v5  ;;  %v308_v57 = vld [vmem:[%s7457_s1 + $0x710] sm:$0xff] }
 0x100   :  { %2947 = vmatpush1.bf16.msra.mxu1 %v4733_v16  ;;  %v268_v16 = vld [vmem:[%s7457_s1 + $0x5d0] sm:$0xff] }
 0x101   :  { %2948 = vmatprep.subr.bf16.mxu1 %v4742_v18  ;;  %v4789_v18 = vcombine.low %v205_v0, %v209_v1  ;;  %v312_v58 = vld [vmem:[%s7457_s1 + $0x730] sm:$0xff]  ;;  %v261_v0 = vld [vmem:[%s7457_s1 + $0x598] sm:$0xff] }
 0x102   :  { %2797 = vmatpush1.bf16.msra.mxu0 %v4787_v17  ;;  %v272_v17 = vld [vmem:[%s7457_s1 + $0x5f0] sm:$0xff]  ;;  %v265_v1 = vld [vmem:[%s7457_s1 + $0x5b8] sm:$0xff] }
 0x103   :  { %2807 = vmatprep.subr.bf16.mxu0 %v4796_v37  ;;  %v4843_v37 = vcombine.low %v260_v3, %v264_v5  ;;  %v4852_v21 = vcombine.high %v268_v16, %v272_v17  ;;  %v316_v3 = vld [vmem:[%s7457_s1 + $0x750] sm:$0xff] }
 0x104   :  { %2949 = vmatpush1.bf16.msra.mxu1 %v4741_v25  ;;  %v276_v25 = vld [vmem:[%s7457_s1 + $0x610] sm:$0xff] }
 0x105   :  { %2799 = vmatmul.mubr.bf16.vlgmr.msra.gmra.mrb[4].mxu0 %v5771_v36  ;;  %2950 = vmatprep.subr.bf16.mxu1 %v4750_v28  ;;  %v4797_v28 = vcombine.low %v213_v14, %v217_v15  ;;  %v320_v5 = vld [vmem:[%s7457_s1 + $0x770] sm:$0xff]  ;;  %v269_v14 = vld [vmem:[%s7457_s1 + $0x5d8] sm:$0xff] }
 0x106   :  { %2808 = vmatpush1.bf16.msra.mxu0 %v4795_v27  ;;  %2839 = vmatprep.mubr.bf16.mxu0 %v5789_v43  ;;  %v280_v27 = vld [vmem:[%s7457_s1 + $0x630] sm:$0xff]  ;;  %v273_v15 = vld [vmem:[%s7457_s1 + $0x5f8] sm:$0xff] }
 0x107   :  { %2809 = vmatprep.subr.bf16.mxu0 %v4804_v29  ;;  %v4851_v29 = vcombine.low %v268_v16, %v272_v17  ;;  %v4860_v30 = vcombine.high %v276_v25, %v280_v27  ;;  %v324_v16 = vld [vmem:[%s7457_s1 + $0x790] sm:$0xff] }
 0x108   :  { %2951 = vmatpush1.bf16.msra.mxu1 %v4749_v33  ;;  %v284_v33 = vld [vmem:[%s7457_s1 + $0x650] sm:$0xff] }
 0x109   :  { %2952 = vmatprep.subr.bf16.mxu1 %v4758_v38  ;;  %v4805_v38 = vcombine.low %v221_v62, %v225_v23  ;;  %v328_v17 = vld [vmem:[%s7457_s1 + $0x7b0] sm:$0xff]  ;;  %v277_v62 = vld [vmem:[%s7457_s1 + $0x618] sm:$0xff] }
 0x10a   :  { %2810 = vmatpush1.bf16.msra.mxu0 %v4803_v35  ;;  %v288_v35 = vld [vmem:[%s7457_s1 + $0x670] sm:$0xff]  ;;  %v281_v23 = vld [vmem:[%s7457_s1 + $0x638] sm:$0xff] }
 0x10b   :  { %2811 = vmatprep.subr.bf16.mxu0 %v4812_v39  ;;  %v4859_v39 = vcombine.low %v276_v25, %v280_v27  ;;  %v4868_v41 = vcombine.high %v284_v33, %v288_v35  ;;  %v332_v25 = vld [vmem:[%s7457_s1 + $0x7d0] sm:$0xff] }
 0x10c   :  { %2953 = vmatpush1.bf16.msra.mxu1 %v4757_v20  ;;  %v296_v20 = vld [vmem:[%s7457_s1 + $0x6b0] sm:$0xff] }
 0x10d   :  { %2954 = vmatprep.subr.bf16.mxu1 %v4766_v44  ;;  %v4867_v44 = vcombine.low %v284_v33, %v288_v35  ;;  %v336_v27 = vld [vmem:[%s7457_s1 + $0x7f0] sm:$0xff] }
 0x10e   :  { %2812 = vmatpush1.bf16.msra.mxu0 %v4811_v26  ;;  %v4813_v26 = vcombine.low %v229_v31, %v233_v32  ;;  %v285_v31 = vld [vmem:[%s7457_s1 + $0x658] sm:$0xff]  ;;  %v340_v33 = vld [vmem:[%s7457_s1 + $0x810] sm:$0xff] }
 0x10f   :  { %2813 = vmatprep.subr.bf16.mxu0 %v4820_v45  ;;  %v4822_v45 = vcombine.high %v237_v2, %v241_v42  ;;  %v289_v32 = vld [vmem:[%s7457_s1 + $0x678] sm:$0xff]  ;;  %v344_v35 = vld [vmem:[%s7457_s1 + $0x830] sm:$0xff] }
 0x110   :  { %2955 = vmatpush1.bf16.msra.mxu1 %v4765_v50  ;;  %v4821_v50 = vcombine.low %v237_v2, %v241_v42  ;;  %v293_v2 = vld [vmem:[%s7457_s1 + $0x698] sm:$0xff] }
 0x111   :  { %2956 = vmatprep.subr.bf16.mxu1 %v4774_v52  ;;  %v4830_v52 = vcombine.high %v245_v47, %v249_v48  ;;  %v297_v42 = vld [vmem:[%s7457_s1 + $0x6b8] sm:$0xff] }
 0x112   :  { %2814 = vmatpush1.bf16.msra.mxu0 %v4819_v51 }
 0x113   :  { %2815 = vmatprep.subr.bf16.mxu0 %v4828_v54 }
 0x114   :  { %2957 = vmatpush1.bf16.msra.mxu1 %v4773_v59  ;;  %v4829_v59 = vcombine.low %v245_v47, %v249_v48  ;;  %v301_v47 = vld [vmem:[%s7457_s1 + $0x6d8] sm:$0xff] }
 0x115   :  { %2958 = vmatprep.subr.bf16.mxu1 %v4782_v60  ;;  %v4838_v60 = vcombine.high %v253_v55, %v257_v56  ;;  %v305_v48 = vld [vmem:[%s7457_s1 + $0x6f8] sm:$0xff] }
 0x116   :  { %2816 = vmatpush1.bf16.msra.mxu0 %v4827_v24 }
 0x117   :  { %2817 = vmatprep.subr.bf16.mxu0 %v4836_v63  ;;  %v4892_v63 = vcombine.high %v308_v57, %v312_v58 }
 0x118   :  { %2959 = vmatpush1.bf16.msra.mxu1 %v4781_v6  ;;  %v4837_v6 = vcombine.low %v253_v55, %v257_v56  ;;  %v309_v55 = vld [vmem:[%s7457_s1 + $0x718] sm:$0xff] }
 0x119   :  { %2960 = vmatprep.subr.bf16.mxu1 %v4790_v10  ;;  %v4846_v10 = vcombine.high %v261_v0, %v265_v1  ;;  %v313_v56 = vld [vmem:[%s7457_s1 + $0x738] sm:$0xff] }
 0x11a   :  { %2818 = vmatpush1.bf16.msra.mxu0 %v4835_v7  ;;  %v4891_v7 = vcombine.low %v308_v57, %v312_v58  ;;  %v364_v57 = vld [vmem:[%s7457_s1 + $0x8d0] sm:$0xff] }
 0x11b   :  { %2819 = vmatprep.subr.bf16.mxu0 %v4844_v12  ;;  %v4900_v12 = vcombine.high %v316_v3, %v320_v5  ;;  %v368_v58 = vld [vmem:[%s7457_s1 + $0x8f0] sm:$0xff] }
 0x11c   :  { %2961 = vmatpush1.bf16.msra.mxu1 %v4789_v18  ;;  %v4845_v18 = vcombine.low %v261_v0, %v265_v1  ;;  %v317_v0 = vld [vmem:[%s7457_s1 + $0x758] sm:$0xff] }
 0x11d   :  { %2971 = vmatprep.subr.bf16.mxu1 %v4798_v19  ;;  %v4854_v19 = vcombine.high %v269_v14, %v273_v15  ;;  %v321_v1 = vld [vmem:[%s7457_s1 + $0x778] sm:$0xff] }
 0x11e   :  { %2820 = vmatpush1.bf16.msra.mxu0 %v4843_v37  ;;  %v4899_v37 = vcombine.low %v316_v3, %v320_v5  ;;  %v372_v3 = vld [vmem:[%s7457_s1 + $0x910] sm:$0xff] }
 0x11f   :  { %2821 = vmatprep.subr.bf16.mxu0 %v4852_v21  ;;  %2963 = vmatmul.mubr.bf16.vlgmr.msra.gmra.mrb[12].mxu1 %v5771_v36  ;;  %v292_v36 = vld [vmem:[%s7457_s1 + $0x690] sm:$0xff]  ;;  %v4908_v21 = vcombine.high %v324_v16, %v328_v17 }
 0x120   :  { %2972 = vmatpush1.bf16.msra.mxu1 %v4797_v28  ;;  %3003 = vmatprep.mubr.bf16.mxu1 %v5789_v43  ;;  %v4876_v46 = vcombine.high %v292_v36, %v296_v20  ;;  %v300_v43 = vld [vmem:[%s7457_s1 + $0x6d0] sm:$0xff]  ;;  %v4875_v51 = vcombine.low %v292_v36, %v296_v20  ;;  %v4853_v28 = vcombine.low %v269_v14, %v273_v15  ;;  %v325_v14 = vld [vmem:[%s7457_s1 + $0x798] sm:$0xff] }
 0x121   :  { %2973 = vmatprep.subr.bf16.mxu1 %v4806_v13  ;;  %v4884_v54 = vcombine.high %v300_v43, %v304_v49  ;;  %v4883_v24 = vcombine.low %v300_v43, %v304_v49  ;;  %v4862_v13 = vcombine.high %v277_v62, %v281_v23  ;;  %v348_v36 = vld [vmem:[%s7457_s1 + $0x850] sm:$0xff]  ;;  %v329_v15 = vld [vmem:[%s7457_s1 + $0x7b8] sm:$0xff] }
 0x122   :  { %2822 = vmatpush1.bf16.msra.mxu0 %v4851_v29  ;;  %v4907_v29 = vcombine.low %v324_v16, %v328_v17  ;;  %v352_v20 = vld [vmem:[%s7457_s1 + $0x870] sm:$0xff] }
 0x123   :  { %2823 = vmatprep.subr.bf16.mxu0 %v4860_v30  ;;  %v4916_v30 = vcombine.high %v332_v25, %v336_v27  ;;  %v356_v43 = vld [vmem:[%s7457_s1 + $0x890] sm:$0xff] }
 0x124   :  { %2974 = vmatpush1.bf16.msra.mxu1 %v4805_v38  ;;  %v4861_v38 = vcombine.low %v277_v62, %v281_v23  ;;  %v360_v49 = vld [vmem:[%s7457_s1 + $0x8b0] sm:$0xff]  ;;  %v333_v62 = vld [vmem:[%s7457_s1 + $0x7d8] sm:$0xff] }
 0x125   :  { %2975 = vmatprep.subr.bf16.mxu1 %v4814_v40  ;;  %v4870_v40 = vcombine.high %v285_v31, %v289_v32  ;;  %v376_v5 = vld [vmem:[%s7457_s1 + $0x930] sm:$0xff]  ;;  %v337_v23 = vld [vmem:[%s7457_s1 + $0x7f8] sm:$0xff] }
 0x126   :  { %2824 = vmatpush1.bf16.msra.mxu0 %v4859_v39  ;;  %v4915_v39 = vcombine.low %v332_v25, %v336_v27  ;;  %v380_v16 = vld [vmem:[%s7457_s1 + $0x950] sm:$0xff] }
 0x127   :  { %2825 = vmatprep.subr.bf16.mxu0 %v4868_v41  ;;  %v4924_v41 = vcombine.high %v340_v33, %v344_v35  ;;  %v384_v17 = vld [vmem:[%s7457_s1 + $0x970] sm:$0xff] }
 0x128   :  { %2976 = vmatpush1.bf16.msra.mxu1 %v4813_v26  ;;  %v4869_v26 = vcombine.low %v285_v31, %v289_v32  ;;  %v388_v25 = vld [vmem:[%s7457_s1 + $0x990] sm:$0xff]  ;;  %v341_v31 = vld [vmem:[%s7457_s1 + $0x818] sm:$0xff] }
 0x129   :  { %2977 = vmatprep.subr.bf16.mxu1 %v4822_v45  ;;  %v4878_v45 = vcombine.high %v293_v2, %v297_v42  ;;  %v392_v27 = vld [vmem:[%s7457_s1 + $0x9b0] sm:$0xff]  ;;  %v345_v32 = vld [vmem:[%s7457_s1 + $0x838] sm:$0xff] }
 0x12a   :  { %2826 = vmatpush1.bf16.msra.mxu0 %v4867_v44  ;;  %v4923_v44 = vcombine.low %v340_v33, %v344_v35  ;;  %v396_v33 = vld [vmem:[%s7457_s1 + $0x9d0] sm:$0xff] }
 0x12b   :  { %2827 = vmatprep.subr.bf16.mxu0 %v4876_v46  ;;  %v4932_v46 = vcombine.high %v348_v36, %v352_v20  ;;  %v400_v35 = vld [vmem:[%s7457_s1 + $0x9f0] sm:$0xff] }
 0x12c   :  { %2978 = vmatpush1.bf16.msra.mxu1 %v4821_v50  ;;  %v4877_v50 = vcombine.low %v293_v2, %v297_v42  ;;  %v349_v2 = vld [vmem:[%s7457_s1 + $0x858] sm:$0xff] }
 0x12d   :  { %2979 = vmatprep.subr.bf16.mxu1 %v4830_v52  ;;  %v4886_v52 = vcombine.high %v301_v47, %v305_v48  ;;  %v353_v42 = vld [vmem:[%s7457_s1 + $0x878] sm:$0xff] }
 0x12e   :  { %2828 = vmatpush1.bf16.msra.mxu0 %v4875_v51  ;;  %v4931_v51 = vcombine.low %v348_v36, %v352_v20  ;;  %v404_v36 = vld [vmem:[%s7457_s1 + $0xa10] sm:$0xff] }
 0x12f   :  { %2829 = vmatprep.subr.bf16.mxu0 %v4884_v54  ;;  %v4940_v54 = vcombine.high %v356_v43, %v360_v49  ;;  %v408_v20 = vld [vmem:[%s7457_s1 + $0xa30] sm:$0xff] }
 0x130   :  { %2980 = vmatpush1.bf16.msra.mxu1 %v4829_v59  ;;  %v4885_v59 = vcombine.low %v301_v47, %v305_v48  ;;  %v357_v47 = vld [vmem:[%s7457_s1 + $0x898] sm:$0xff] }
 0x131   :  { %2981 = vmatprep.subr.bf16.mxu1 %v4838_v60  ;;  %v4894_v60 = vcombine.high %v309_v55, %v313_v56  ;;  %v361_v48 = vld [vmem:[%s7457_s1 + $0x8b8] sm:$0xff] }
 0x132   :  { %2830 = vmatpush1.bf16.msra.mxu0 %v4883_v24  ;;  %v4939_v24 = vcombine.low %v356_v43, %v360_v49  ;;  %v412_v43 = vld [vmem:[%s7457_s1 + $0xa50] sm:$0xff] }
 0x133   :  { %2831 = vmatprep.subr.bf16.mxu0 %v4892_v63  ;;  %v4948_v63 = vcombine.high %v364_v57, %v368_v58  ;;  %v416_v49 = vld [vmem:[%s7457_s1 + $0xa70] sm:$0xff] }
 0x134   :  { %2982 = vmatpush1.bf16.msra.mxu1 %v4837_v6  ;;  %v4893_v6 = vcombine.low %v309_v55, %v313_v56  ;;  %v365_v55 = vld [vmem:[%s7457_s1 + $0x8d8] sm:$0xff] }
 0x135   :  { %2983 = vmatprep.subr.bf16.mxu1 %v4846_v10  ;;  %v4902_v10 = vcombine.high %v317_v0, %v321_v1  ;;  %v369_v56 = vld [vmem:[%s7457_s1 + $0x8f8] sm:$0xff] }
 0x136   :  { %2832 = vmatpush1.bf16.msra.mxu0 %v4891_v7  ;;  %v4947_v7 = vcombine.low %v364_v57, %v368_v58  ;;  %v424_v57 = vld [vmem:[%s7457_s1 + $0xab0] sm:$0xff]  ;;  %v4941_v58 = vcombine.low %v357_v47, %v361_v48 }
 0x137   :  { %2833 = vmatprep.subr.bf16.mxu0 %v4900_v12  ;;  %v4956_v12 = vcombine.high %v372_v3, %v376_v5 }
 0x138   :  { %2984 = vmatpush1.bf16.msra.mxu1 %v4845_v18  ;;  %v4901_v18 = vcombine.low %v317_v0, %v321_v1  ;;  %v377_v0 = vld [vmem:[%s7457_s1 + $0x938] sm:$0xff]  ;;  %v432_v1 = vld [vmem:[%s7457_s1 + $0xaf0] sm:$0xff] }
 0x139   :  { %2985 = vmatprep.subr.bf16.mxu1 %v4854_v19  ;;  %v4910_v19 = vcombine.high %v325_v14, %v329_v15 }
 0x13a   :  { %2834 = vmatpush1.bf16.msra.mxu0 %v4899_v37  ;;  %v4955_v37 = vcombine.low %v372_v3, %v376_v5  ;;  %v4949_v3 = vcombine.low %v365_v55, %v369_v56 }
 0x13b   :  { %2835 = vmatprep.subr.bf16.mxu0 %v4908_v21  ;;  %v4964_v21 = vcombine.high %v380_v16, %v384_v17 }
 0x13c   :  { %2986 = vmatpush1.bf16.msra.mxu1 %v4853_v28  ;;  %v4909_v28 = vcombine.low %v325_v14, %v329_v15  ;;  %v436_v14 = vld [vmem:[%s7457_s1 + $0xb10] sm:$0xff] }
 0x13d   :  { %2987 = vmatprep.subr.bf16.mxu1 %v4862_v13  ;;  %v4918_v13 = vcombine.high %v333_v62, %v337_v23  ;;  %v440_v15 = vld [vmem:[%s7457_s1 + $0xb30] sm:$0xff] }
 0x13e   :  { %2836 = vmatpush1.bf16.msra.mxu0 %v4907_v29  ;;  %v4963_v29 = vcombine.low %v380_v16, %v384_v17 }
 0x13f   :  { %2837 = vmatprep.subr.bf16.mxu0 %v4916_v30  ;;  %v4972_v30 = vcombine.high %v388_v25, %v392_v27 }
 0x140   :  { %2988 = vmatpush1.bf16.msra.mxu1 %v4861_v38  ;;  %v4917_v38 = vcombine.low %v333_v62, %v337_v23  ;;  %v444_v62 = vld [vmem:[%s7457_s1 + $0xb50] sm:$0xff] }
 0x141   :  { %2989 = vmatprep.subr.bf16.mxu1 %v4870_v40  ;;  %v4926_v40 = vcombine.high %v341_v31, %v345_v32  ;;  %v448_v23 = vld [vmem:[%s7457_s1 + $0xb70] sm:$0xff] }
 0x142   :  { %2838 = vmatpush1.bf16.msra.mxu0 %v4915_v39  ;;  %v4971_v39 = vcombine.low %v388_v25, %v392_v27  ;;  %v5019_v27 = vcombine.low %v436_v14, %v440_v15 }
 0x143   :  { %2848 = vmatprep.subr.bf16.mxu0 %v4924_v41  ;;  %v4980_v41 = vcombine.high %v396_v33, %v400_v35 }
 0x144   :  { %2990 = vmatpush1.bf16.msra.mxu1 %v4869_v26  ;;  %v4925_v26 = vcombine.low %v341_v31, %v345_v32  ;;  %v452_v31 = vld [vmem:[%s7457_s1 + $0xb90] sm:$0xff] }
 0x145   :  { %2840 = vmatmul.mubr.bf16.vlgmr.msra.gmra.mrb[4].mxu0 %v5979_v53  ;;  %2991 = vmatprep.subr.bf16.mxu1 %v4878_v45  ;;  %v4934_v45 = vcombine.high %v349_v2, %v353_v42  ;;  %v456_v32 = vld [vmem:[%s7457_s1 + $0xbb0] sm:$0xff] }
 0x146   :  { %2849 = vmatpush1.bf16.msra.mxu0 %v4923_v44  ;;  %2880 = vmatprep.mubr.bf16.mxu0 %v5993_v61  ;;  %v4979_v44 = vcombine.low %v396_v33, %v400_v35  ;;  %v5027_v35 = vcombine.low %v444_v62, %v448_v23 }
 0x147   :  { %2850 = vmatprep.subr.bf16.mxu0 %v4932_v46  ;;  %v4988_v46 = vcombine.high %v404_v36, %v408_v20 }
 0x148   :  { %2992 = vmatpush1.bf16.msra.mxu1 %v4877_v50  ;;  %v4933_v50 = vcombine.low %v349_v2, %v353_v42  ;;  %v460_v2 = vld [vmem:[%s7457_s1 + $0xbd0] sm:$0xff] }
 0x149   :  { %2993 = vmatprep.subr.bf16.mxu1 %v4886_v52  ;;  %v4942_v52 = vcombine.high %v357_v47, %v361_v48  ;;  %v464_v42 = vld [vmem:[%s7457_s1 + $0xbf0] sm:$0xff]  ;;  %v3102_v47 = vld [vmem:[%s7458_s2] sm:$0xff] }
 0x14a   :  { %2851 = vmatpush1.bf16.msra.mxu0 %v4931_v51  ;;  %v4987_v51 = vcombine.low %v404_v36, %v408_v20  ;;  %v5035_v20 = vcombine.low %v452_v31, %v456_v32  ;;  %v3106_v48 = vld [vmem:[%s7458_s2 + $0x20] sm:$0xff] }
 0x14b   :  { %2852 = vmatprep.subr.bf16.mxu0 %v4940_v54  ;;  %v4996_v54 = vcombine.high %v412_v43, %v416_v49 }
 0x14c   :  { %2994 = vmatpush1.bf16.msra.mxu1 %v4885_v59  ;;  %v4995_v59 = vcombine.low %v412_v43, %v416_v49  ;;  %v5043_v49 = vcombine.low %v460_v2, %v464_v42 }
 0x14d   :  { %2995 = vmatprep.subr.bf16.mxu1 %v4894_v60 }
 0x14e   :  { %2853 = vmatpush1.bf16.msra.mxu0 %v4939_v24  ;;  %v4950_v24 = vcombine.high %v365_v55, %v369_v56  ;;  %v3110_v55 = vld [vmem:[%s7458_s2 + $0x40] sm:$0xff] }
 0x14f   :  { %2854 = vmatprep.subr.bf16.mxu0 %v4948_v63  ;;  %v373_v63 = vld [vmem:[%s7457_s1 + $0x918] sm:$0xff]  ;;  %v3114_v56 = vld [vmem:[%s7458_s2 + $0x60] sm:$0xff] }
 0x150   :  { %2996 = vmatpush1.bf16.msra.mxu1 %v4893_v6  ;;  %v4958_v6 = vcombine.high %v373_v63, %v377_v0  ;;  %v4957_v16 = vcombine.low %v373_v63, %v377_v0  ;;  %v3118_v63 = vld [vmem:[%s7458_s2 + $0x80] sm:$0xff] }
 0x151   :  { %2997 = vmatprep.subr.bf16.mxu1 %v4902_v10  ;;  %v381_v10 = vld [vmem:[%s7457_s1 + $0x958] sm:$0xff]  ;;  %v3122_v0 = vld [vmem:[%s7458_s2 + $0xa0] sm:$0xff] }
 0x152   :  { %2855 = vmatpush1.bf16.msra.mxu0 %v4947_v7 }
 0x153   :  { %2856 = vmatprep.subr.bf16.mxu0 %v4956_v12  ;;  %v385_v12 = vld [vmem:[%s7457_s1 + $0x978] sm:$0xff] }
 0x154   :  { %2998 = vmatpush1.bf16.msra.mxu1 %v4901_v18  ;;  %v4966_v18 = vcombine.high %v381_v10, %v385_v12  ;;  %v4965_v25 = vcombine.low %v381_v10, %v385_v12  ;;  %v3126_v10 = vld [vmem:[%s7458_s2 + $0xc0] sm:$0xff] }
 0x155   :  { %2999 = vmatprep.subr.bf16.mxu1 %v4910_v19  ;;  %v389_v19 = vld [vmem:[%s7457_s1 + $0x998] sm:$0xff]  ;;  %v3130_v12 = vld [vmem:[%s7458_s2 + $0xe0] sm:$0xff] }
 0x156   :  { %2857 = vmatpush1.bf16.msra.mxu0 %v4955_v37  ;;  %v5020_v37 = vcombine.high %v436_v14, %v440_v15  ;;  %v5075_v15 = vcombine.low %v3118_v63, %v3122_v0 }
 0x157   :  { %2858 = vmatprep.subr.bf16.mxu0 %v4964_v21  ;;  %v393_v21 = vld [vmem:[%s7457_s1 + $0x9b8] sm:$0xff] }
 0x158   :  { %3000 = vmatpush1.bf16.msra.mxu1 %v4909_v28  ;;  %v4974_v28 = vcombine.high %v389_v19, %v393_v21  ;;  %v4973_v33 = vcombine.low %v389_v19, %v393_v21  ;;  %v3134_v19 = vld [vmem:[%s7458_s2 + $0x100] sm:$0xff] }
 0x159   :  { %3001 = vmatprep.subr.bf16.mxu1 %v4918_v13  ;;  %v397_v13 = vld [vmem:[%s7457_s1 + $0x9d8] sm:$0xff]  ;;  %v3138_v21 = vld [vmem:[%s7458_s2 + $0x120] sm:$0xff] }
 0x15a   :  { %2859 = vmatpush1.bf16.msra.mxu0 %v4963_v29  ;;  %v5028_v29 = vcombine.high %v444_v62, %v448_v23  ;;  %v5083_v23 = vcombine.low %v3126_v10, %v3130_v12 }
 0x15b   :  { %2860 = vmatprep.subr.bf16.mxu0 %v4972_v30  ;;  %v401_v30 = vld [vmem:[%s7457_s1 + $0x9f8] sm:$0xff] }
 0x15c   :  { %3002 = vmatpush1.bf16.msra.mxu1 %v4917_v38  ;;  %v4982_v38 = vcombine.high %v397_v13, %v401_v30  ;;  %v4981_v36 = vcombine.low %v397_v13, %v401_v30  ;;  %v5091_v30 = vcombine.low %v3134_v19, %v3138_v21 }
 0x15d   :  { %3012 = vmatprep.subr.bf16.mxu1 %v4926_v40  ;;  %v405_v40 = vld [vmem:[%s7457_s1 + $0xa18] sm:$0xff] }
 0x15e   :  { %2861 = vmatpush1.bf16.msra.mxu0 %v4971_v39  ;;  %v5036_v39 = vcombine.high %v452_v31, %v456_v32  ;;  %v461_v32 = vld [vmem:[%s7457_s1 + $0xbd8] sm:$0xff] }
 0x15f   :  { %2862 = vmatprep.subr.bf16.mxu0 %v4980_v41  ;;  %3004 = vmatmul.mubr.bf16.vlgmr.msra.gmra.mrb[12].mxu1 %v5979_v53  ;;  %v420_v53 = vld [vmem:[%s7457_s1 + $0xa90] sm:$0xff]  ;;  %v409_v41 = vld [vmem:[%s7457_s1 + $0xa38] sm:$0xff] }
 0x160   :  { %3013 = vmatpush1.bf16.msra.mxu1 %v4925_v26  ;;  %3044 = vmatprep.mubr.bf16.mxu1 %v5993_v61  ;;  %v5004_v60 = vcombine.high %v420_v53, %v424_v57  ;;  %v428_v61 = vld [vmem:[%s7457_s1 + $0xad0] sm:$0xff]  ;;  %v5003_v5 = vcombine.low %v420_v53, %v424_v57  ;;  %v4990_v26 = vcombine.high %v405_v40, %v409_v41 }
 0x161   :  { %3014 = vmatprep.subr.bf16.mxu1 %v4934_v45  ;;  %v5012_v7 = vcombine.high %v428_v61, %v432_v1  ;;  %v5011_v17 = vcombine.low %v428_v61, %v432_v1  ;;  %v413_v45 = vld [vmem:[%s7457_s1 + $0xa58] sm:$0xff]  ;;  %v4989_v43 = vcombine.low %v405_v40, %v409_v41  ;;  %v5059_v57 = vcombine.low %v3102_v47, %v3106_v48 }
 0x162   :  { %2863 = vmatpush1.bf16.msra.mxu0 %v4979_v44  ;;  %v5044_v44 = vcombine.high %v460_v2, %v464_v42  ;;  %v5067_v1 = vcombine.low %v3110_v55, %v3114_v56  ;;  %v469_v40 = vld [vmem:[%s7457_s1 + $0xc18] sm:$0xff] }
 0x163   :  { %2864 = vmatprep.subr.bf16.mxu0 %v4988_v46  ;;  %v417_v46 = vld [vmem:[%s7457_s1 + $0xa78] sm:$0xff] }
 0x164   :  { %3015 = vmatpush1.bf16.msra.mxu1 %v4933_v50  ;;  %v4998_v50 = vcombine.high %v413_v45, %v417_v46  ;;  %v4997_v53 = vcombine.low %v413_v45, %v417_v46  ;;  %v473_v41 = vld [vmem:[%s7457_s1 + $0xc38] sm:$0xff]  ;;  %v3103_v46 = vld [vmem:[%s7458_s2 + $0x8] sm:$0xff] }
 0x165   :  { %3016 = vmatprep.subr.bf16.mxu1 %v4942_v52  ;;  %v5060_v52 = vcombine.high %v3102_v47, %v3106_v48  ;;  %v5054_v45 = vcombine.high %v469_v40, %v473_v41  ;;  %v3107_v47 = vld [vmem:[%s7458_s2 + $0x28] sm:$0xff] }
 0x166   :  { %2865 = vmatpush1.bf16.msra.mxu0 %v4987_v51  ;;  %v421_v51 = vld [vmem:[%s7457_s1 + $0xa98] sm:$0xff]  ;;  %v5062_v48 = vcombine.high %v3103_v46, %v3107_v47 }
 0x167   :  { %2866 = vmatprep.subr.bf16.mxu0 %v4996_v54  ;;  %v425_v54 = vld [vmem:[%s7457_s1 + $0xab8] sm:$0xff] }
 0x168   :  { %3017 = vmatpush1.bf16.msra.mxu1 %v4941_v58  ;;  %v5006_v58 = vcombine.high %v421_v51, %v425_v54  ;;  %v5005_v61 = vcombine.low %v421_v51, %v425_v54 }
 0x169   :  { %3018 = vmatprep.subr.bf16.mxu1 %v4950_v24  ;;  %v5068_v24 = vcombine.high %v3110_v55, %v3114_v56 }
 0x16a   :  { %2867 = vmatpush1.bf16.msra.mxu0 %v4995_v59  ;;  %v429_v59 = vld [vmem:[%s7457_s1 + $0xad8] sm:$0xff] }
 0x16b   :  { %2868 = vmatprep.subr.bf16.mxu0 %v5004_v60  ;;  %v433_v60 = vld [vmem:[%s7457_s1 + $0xaf8] sm:$0xff] }
 0x16c   :  { %3019 = vmatpush1.bf16.msra.mxu1 %v4949_v3  ;;  %v5014_v3 = vcombine.high %v429_v59, %v433_v60  ;;  %v5013_v14 = vcombine.low %v429_v59, %v433_v60  ;;  %v3127_v59 = vld [vmem:[%s7458_s2 + $0xc8] sm:$0xff] }
 0x16d   :  { %3020 = vmatprep.subr.bf16.mxu1 %v4958_v6  ;;  %v5076_v6 = vcombine.high %v3118_v63, %v3122_v0  ;;  %v3135_v0 = vld [vmem:[%s7458_s2 + $0x108] sm:$0xff] }
 0x16e   :  { %2869 = vmatpush1.bf16.msra.mxu0 %v5003_v5  ;;  %v437_v5 = vld [vmem:[%s7457_s1 + $0xb18] sm:$0xff] }
 0x16f   :  { %2870 = vmatprep.subr.bf16.mxu0 %v5012_v7  ;;  %v441_v7 = vld [vmem:[%s7457_s1 + $0xb38] sm:$0xff] }
 0x170   :  { %3021 = vmatpush1.bf16.msra.mxu1 %v4957_v16  ;;  %v5022_v16 = vcombine.high %v437_v5, %v441_v7  ;;  %v5021_v62 = vcombine.low %v437_v5, %v441_v7 }
 0x171   :  { %3022 = vmatprep.subr.bf16.mxu1 %v4966_v18  ;;  %v5084_v18 = vcombine.high %v3126_v10, %v3130_v12  ;;  %v3142_v12 = vld [vmem:[%s7458_s2 + $0x140] sm:$0xff] }
 0x172   :  { %2871 = vmatpush1.bf16.msra.mxu0 %v5011_v17  ;;  %v445_v17 = vld [vmem:[%s7457_s1 + $0xb58] sm:$0xff] }
 0x173   :  { %2872 = vmatprep.subr.bf16.mxu0 %v5020_v37  ;;  %v449_v37 = vld [vmem:[%s7457_s1 + $0xb78] sm:$0xff] }
 0x174   :  { %3023 = vmatpush1.bf16.msra.mxu1 %v4965_v25  ;;  %v5030_v25 = vcombine.high %v445_v17, %v449_v37  ;;  %v5029_v13 = vcombine.low %v445_v17, %v449_v37  ;;  %v3147_v17 = vld [vmem:[%s7458_s2 + $0x168] sm:$0xff] }
 0x175   :  { %3024 = vmatprep.subr.bf16.mxu1 %v4974_v28  ;;  %v453_v28 = vld [vmem:[%s7457_s1 + $0xb98] sm:$0xff] }
 0x176   :  { %2873 = vmatpush1.bf16.msra.mxu0 %v5019_v27  ;;  %v5092_v27 = vcombine.high %v3134_v19, %v3138_v21  ;;  %v3150_v21 = vld [vmem:[%s7458_s2 + $0x180] sm:$0xff] }
 0x177   :  { %2874 = vmatprep.subr.bf16.mxu0 %v5028_v29  ;;  %v457_v29 = vld [vmem:[%s7457_s1 + $0xbb8] sm:$0xff] }
 0x178   :  { %3025 = vmatpush1.bf16.msra.mxu1 %v4973_v33  ;;  %v5038_v31 = vcombine.high %v453_v28, %v457_v29  ;;  %v465_v33 = vld [vmem:[%s7457_s1 + $0xbf8] sm:$0xff] }
 0x179   :  { %3026 = vmatprep.subr.bf16.mxu1 %v4982_v38  ;;  %v5046_v38 = vcombine.high %v461_v32, %v465_v33 }
 0x17a   :  { %2875 = vmatpush1.bf16.msra.mxu0 %v5027_v35  ;;  %v5037_v35 = vcombine.low %v453_v28, %v457_v29  ;;  %v3155_v28 = vld [vmem:[%s7458_s2 + $0x1a8] sm:$0xff]  ;;  %v3158_v29 = vld [vmem:[%s7458_s2 + $0x1c0] sm:$0xff] }
 0x17b   :  { %2876 = vmatprep.subr.bf16.mxu0 %v5036_v39 }
 0x17c   :  { %3027 = vmatpush1.bf16.msra.mxu1 %v4981_v36 }
 0x17d   :  { %3028 = vmatprep.subr.bf16.mxu1 %v4990_v26  ;;  %v5045_v26 = vcombine.low %v461_v32, %v465_v33  ;;  %v3159_v33 = vld [vmem:[%s7458_s2 + $0x1c8] sm:$0xff] }
 0x17e   :  { %2877 = vmatpush1.bf16.msra.mxu0 %v5035_v20 }
 0x17f   :  { %2878 = vmatprep.subr.bf16.mxu0 %v5044_v44 }
 0x180   :  { %3029 = vmatpush1.bf16.msra.mxu1 %v4989_v43  ;;  %v3115_v43 = vld [vmem:[%s7458_s2 + $0x68] sm:$0xff] }
 0x181   :  { %3030 = vmatprep.subr.bf16.mxu1 %v4998_v50 }
 0x182   :  { %2879 = vmatpush1.bf16.msra.mxu0 %v5043_v49  ;;  %v5061_v49 = vcombine.low %v3103_v46, %v3107_v47  ;;  %v3174_v46 = vld [vmem:[%s7458_s2 + $0x240] sm:$0xff] }
 0x183   :  { %3870 = vmatprep.subr.bf16.mxu0 %v5060_v52  ;;  %v3178_v47 = vld [vmem:[%s7458_s2 + $0x260] sm:$0xff] }
 0x184   :  { %3031 = vmatpush1.bf16.msra.mxu1 %v4997_v53 }
 0x185   :  { %2881 = vmatmul.mubr.bf16.vlgmr.msra.gmra.mrb[4].mxu0 %v6181_v11  ;;  %3032 = vmatprep.subr.bf16.mxu1 %v5006_v58 }
 0x186   :  { %3871 = vmatpush1.bf16.msra.mxu0 %v5059_v57 }
 0x187   :  { %3872 = vmatprep.subr.bf16.mxu0 %v5068_v24  ;;  %v3131_v24 = vld [vmem:[%s7458_s2 + $0xe8] sm:$0xff] }
 0x188   :  { %3033 = vmatpush1.bf16.msra.mxu1 %v5005_v61  ;;  %v5086_v60 = vcombine.high %v3127_v59, %v3131_v24  ;;  %v3139_v61 = vld [vmem:[%s7458_s2 + $0x128] sm:$0xff]  ;;  %v5085_v5 = vcombine.low %v3127_v59, %v3131_v24 }
 0x189   :  { %3034 = vmatprep.subr.bf16.mxu1 %v5014_v3  ;;  %v5094_v7 = vcombine.high %v3135_v0, %v3139_v61  ;;  %v5093_v10 = vcombine.low %v3135_v0, %v3139_v61  ;;  %v3191_v0 = vld [vmem:[%s7458_s2 + $0x2c8] sm:$0xff] }
 0x18a   :  { %3873 = vmatpush1.bf16.msra.mxu0 %v5067_v1  ;;  %v3195_v61 = vld [vmem:[%s7458_s2 + $0x2e8] sm:$0xff] }
 0x18b   :  { %3874 = vmatprep.subr.bf16.mxu0 %v5076_v6 }
 0x18c   :  { %3035 = vmatpush1.bf16.msra.mxu1 %v5013_v14  ;;  %v3146_v14 = vld [vmem:[%s7458_s2 + $0x160] sm:$0xff] }
 0x18d   :  { %3036 = vmatprep.subr.bf16.mxu1 %v5022_v16  ;;  %v5100_v16 = vcombine.high %v3142_v12, %v3146_v14 }
 0x18e   :  { %3875 = vmatpush1.bf16.msra.mxu0 %v5075_v15  ;;  %v3143_v15 = vld [vmem:[%s7458_s2 + $0x148] sm:$0xff] }
 0x18f   :  { %3876 = vmatprep.subr.bf16.mxu0 %v5084_v18  ;;  %v5099_v18 = vcombine.low %v3142_v12, %v3146_v14  ;;  %v5101_v37 = vcombine.low %v3143_v15, %v3147_v17  ;;  %v5102_v19 = vcombine.high %v3143_v15, %v3147_v17  ;;  %v3202_v12 = vld [vmem:[%s7458_s2 + $0x320] sm:$0xff]  ;;  %v3199_v14 = vld [vmem:[%s7458_s2 + $0x308] sm:$0xff]  ;;  %v5149_v17 = vcombine.low %v3191_v0, %v3195_v61 }
 0x190   :  { %3037 = vmatpush1.bf16.msra.mxu1 %v5021_v62  ;;  %v3154_v62 = vld [vmem:[%s7458_s2 + $0x1a0] sm:$0xff]  ;;  %v3203_v15 = vld [vmem:[%s7458_s2 + $0x328] sm:$0xff] }
 0x191   :  { %3038 = vmatprep.subr.bf16.mxu1 %v5030_v25  ;;  %v5107_v25 = vcombine.low %v3150_v21, %v3154_v62 }
 0x192   :  { %3877 = vmatpush1.bf16.msra.mxu0 %v5083_v23  ;;  %v3151_v23 = vld [vmem:[%s7458_s2 + $0x188] sm:$0xff] }
 0x193   :  { %3878 = vmatprep.subr.bf16.mxu0 %v5092_v27  ;;  %v5108_v27 = vcombine.high %v3150_v21, %v3154_v62  ;;  %v3210_v21 = vld [vmem:[%s7458_s2 + $0x360] sm:$0xff]  ;;  %v3207_v62 = vld [vmem:[%s7458_s2 + $0x348] sm:$0xff] }
 0x194   :  { %3039 = vmatpush1.bf16.msra.mxu1 %v5029_v13  ;;  %v3162_v13 = vld [vmem:[%s7458_s2 + $0x1e0] sm:$0xff] }
 0x195   :  { %3040 = vmatprep.subr.bf16.mxu1 %v5038_v31  ;;  %v5110_v31 = vcombine.high %v3151_v23, %v3155_v28  ;;  %v5116_v32 = vcombine.high %v3158_v29, %v3162_v13 }
 0x196   :  { %3879 = vmatpush1.bf16.msra.mxu0 %v5091_v30  ;;  %v5109_v30 = vcombine.low %v3151_v23, %v3155_v28  ;;  %v3211_v23 = vld [vmem:[%s7458_s2 + $0x368] sm:$0xff] }
 0x197   :  { %3880 = vmatprep.subr.bf16.mxu0 %v5100_v16 }
 0x198   :  { %v2554_v39 = vpop.f32.mrb[0].mxu0  ;;  %3041 = vmatpush1.bf16.msra.mxu1 %v5037_v35  ;;  %v3163_v35 = vld [vmem:[%s7458_s2 + $0x1e8] sm:$0xff] }
 0x199   :  { %v6819_v2 = vadd.f32 %v6259_v4, %v2554_v39  ;;  %v2556_v42 = vpop.f32.mrb[1].mxu0  ;;  %3042 = vmatprep.subr.bf16.mxu1 %v5046_v38  ;;  %v5053_v4 = vcombine.low %v469_v40, %v473_v41  ;;  %v3166_v38 = vld [vmem:[%s7458_s2 + $0x200] sm:$0xff]  ;;  %v5118_v39 = vcombine.high %v3159_v33, %v3163_v35  ;;  %v3167_v41 = vld [vmem:[%s7458_s2 + $0x208] sm:$0xff] }
 0x19a   :  { %v6822_v36 = vadd.f32 %v6272_v8, %v2556_v42  ;;  %v2558_v20 = vpop.f32.mrb[2].mxu0  ;;  %v3111_v8 = vld [vmem:[%s7458_s2 + $0x48] sm:$0xff]  ;;  %3881 = vmatpush1.bf16.msra.mxu0 %v5099_v18  ;;  %v3170_v40 = vld [vmem:[%s7458_s2 + $0x220] sm:$0xff] }
 0x19b   :  { %v2559_v44 = vpop.f32.mrb[3].mxu0  ;;  %v5070_v50 = vcombine.high %v3111_v8, %v3115_v43  ;;  %v5069_v53 = vcombine.low %v3111_v8, %v3115_v43  ;;  %3882 = vmatprep.subr.bf16.mxu0 %v5108_v27  ;;  %v3171_v42 = vld [vmem:[%s7458_s2 + $0x228] sm:$0xff]  ;;  %v5115_v20 = vcombine.low %v3158_v29, %v3162_v13  ;;  %v5123_v8 = vcombine.low %v3166_v38, %v3170_v40  ;;  %v3214_v13 = vld [vmem:[%s7458_s2 + $0x380] sm:$0xff] }
 0x19c   :  { %3043 = vmatpush1.bf16.msra.mxu1 %v5045_v26  ;;  %v5117_v26 = vcombine.low %v3159_v33, %v3163_v35  ;;  %v5124_v44 = vcombine.high %v3166_v38, %v3170_v40  ;;  %v5125_v43 = vcombine.low %v3167_v41, %v3171_v42  ;;  %v5157_v27 = vcombine.low %v3199_v14, %v3203_v15 }
 0x19d   :  { %3053 = vmatprep.subr.bf16.mxu1 %v5054_v45  ;;  %v5126_v45 = vcombine.high %v3167_v41, %v3171_v42  ;;  %v5166_v29 = vcombine.high %v3207_v62, %v3211_v23  ;;  %v5165_v35 = vcombine.low %v3207_v62, %v3211_v23  ;;  %v3222_v42 = vld [vmem:[%s7458_s2 + $0x3c0] sm:$0xff]  ;;  %v3132_v62 = vld [vmem:[%s7458_s2 + $0xf0] sm:$0xff]  ;;  %v3129_v23 = vld [vmem:[%s7458_s2 + $0xd8] sm:$0xff] }
 0x19e   :  { %3883 = vmatpush1.bf16.msra.mxu0 %v5107_v25 }
 0x19f   :  { %3045 = vmatmul.mubr.bf16.vlgmr.msra.gmra.mrb[12].mxu1 %v6181_v11  ;;  %v3119_v11 = vld [vmem:[%s7458_s2 + $0x88] sm:$0xff]  ;;  %3884 = vmatprep.subr.bf16.mxu0 %v5116_v32 }
 0x1a0   :  { %3054 = vmatpush1.bf16.msra.mxu1 %v5053_v4  ;;  %3085 = vmatprep.mubr.bf16.mxu1 %v5469_v9  ;;  %v3123_v9 = vld [vmem:[%s7458_s2 + $0xa8] sm:$0xff] }
 0x1a1   :  { %3911 = vmatprep.subr.bf16.mxu1 %v5062_v48  ;;  %v5078_v58 = vcombine.high %v3119_v11, %v3123_v9  ;;  %v3175_v4 = vld [vmem:[%s7458_s2 + $0x248] sm:$0xff] }
 0x1a2   :  { %v3179_v48 = vld [vmem:[%s7458_s2 + $0x268] sm:$0xff]  ;;  %3885 = vmatpush1.bf16.msra.mxu0 %v5115_v20  ;;  %v3226_v20 = vld [vmem:[%s7458_s2 + $0x3e0] sm:$0xff] }
 0x1a3   :  { %3886 = vmatprep.subr.bf16.mxu0 %v5124_v44  ;;  %v3219_v32 = vld [vmem:[%s7458_s2 + $0x3a8] sm:$0xff]  ;;  %v5180_v44 = vcombine.high %v3222_v42, %v3226_v20 }
 0x1a6   :  { %3887 = vmatpush1.bf16.msra.mxu0 %v5123_v8  ;;  %v3108_v8 = vld [vmem:[%s7458_s2 + $0x30] sm:$0xff] }
 0x1aa   :  { %v6838_v51 = vpop.f32.mrb[4].mxu1 }
 0x1ab   :  { %v3094_v52 = vmax.f32 %v6819_v2, %v6838_v51  ;;  %5058 = vmatmul.mubr.msk.bf16.vlgmr.msra.gmra.mrb[12].mxu1 %vm2434_vm0, %v5575_v34  ;;  %v6850_v54 = vpop.f32.mrb[5].mxu1  ;;  %v5077_v34 = vcombine.low %v3119_v11, %v3123_v9  ;;  %v3182_v11 = vld [vmem:[%s7458_s2 + $0x280] sm:$0xff]  ;;  %v3113_v2 = vld [vmem:[%s7458_s2 + $0x58] sm:$0xff] }
 0x1ac   :  { %v3095_v55 = vmax.f32 %v6822_v36, %v6850_v54  ;;  %v2763_v56 = vpop.f32.mrb[6].mxu1  ;;  %3912 = vmatpush1.bf16.msra.mxu1 %v5061_v49  ;;  %v5132_v49 = vcombine.high %v3174_v46, %v3178_v47  ;;  %v3186_v9 = vld [vmem:[%s7458_s2 + $0x2a0] sm:$0xff]  ;;  %v3117_v36 = vld [vmem:[%s7458_s2 + $0x78] sm:$0xff]  ;;  %v3120_v54 = vld [vmem:[%s7458_s2 + $0x90] sm:$0xff] }
 0x1ad   :  { %v2764_v57 = vpop.f32.mrb[7].mxu1  ;;  %3913 = vmatprep.subr.bf16.mxu1 %v5070_v50  ;;  %v5134_v50 = vcombine.high %v3175_v4, %v3179_v48  ;;  %v3183_v56 = vld [vmem:[%s7458_s2 + $0x288] sm:$0xff]  ;;  %v5140_v59 = vcombine.high %v3182_v11, %v3186_v9 }
 0x1ae   :  { %v5131_v57 = vcombine.low %v3174_v46, %v3178_v47  ;;  %3888 = vmatprep.subr.bf16.mxu0 %v5132_v49  ;;  %v5179_v46 = vcombine.low %v3222_v42, %v3226_v20  ;;  %v3148_v42 = vld [vmem:[%s7458_s2 + $0x170] sm:$0xff]  ;;  %v3145_v20 = vld [vmem:[%s7458_s2 + $0x158] sm:$0xff] }
 0x1b0   :  { %3914 = vmatpush1.bf16.msra.mxu1 %v5069_v53  ;;  %v3187_v53 = vld [vmem:[%s7458_s2 + $0x2a8] sm:$0xff]  ;;  %3889 = vmatpush1.bf16.msra.mxu0 %v5131_v57 }
 0x1b1   :  { %3915 = vmatprep.subr.bf16.mxu1 %v5078_v58  ;;  %v5133_v58 = vcombine.low %v3175_v4, %v3179_v48  ;;  %v5142_v24 = vcombine.high %v3183_v56, %v3187_v53  ;;  %3890 = vmatprep.subr.bf16.mxu0 %v5140_v59  ;;  %v3104_v48 = vld [vmem:[%s7458_s2 + $0x10] sm:$0xff] }
 0x1b2   :  { %v6860_v63 = vpop.f32.mrb[8].mxu1  ;;  %v5064_v49 = vcombine.high %v3104_v48, %v3108_v8 }
 0x1b3   :  { %v6868_v1 = vpop.f32.mrb[9].mxu1 }
 0x1b4   :  { %v2927_v3 = vpop.f32.mrb[10].mxu1  ;;  %3916 = vmatpush1.bf16.msra.mxu1 %v5077_v34  ;;  %v3190_v34 = vld [vmem:[%s7458_s2 + $0x2c0] sm:$0xff] }
 0x1b5   :  { %v2928_v6 = vpop.f32.mrb[11].mxu1  ;;  %3917 = vmatprep.subr.bf16.mxu1 %v5086_v60  ;;  %v3194_v60 = vld [vmem:[%s7458_s2 + $0x2e0] sm:$0xff]  ;;  %v5139_v3 = vcombine.low %v3182_v11, %v3186_v9  ;;  %v5063_v11 = vcombine.low %v3104_v48, %v3108_v8  ;;  %v3156_v48 = vld [vmem:[%s7458_s2 + $0x1b0] sm:$0xff]  ;;  %v3153_v8 = vld [vmem:[%s7458_s2 + $0x198] sm:$0xff] }
 0x1b6   :  { %v5148_v6 = vcombine.high %v3190_v34, %v3194_v60  ;;  %v5147_v16 = vcombine.low %v3190_v34, %v3194_v60 }
 0x1b7   :  { %3891 = vmatpush1.bf16.msra.mxu0 %v5139_v3 }
 0x1b8   :  { %3918 = vmatpush1.bf16.msra.mxu1 %v5085_v5  ;;  %v5141_v5 = vcombine.low %v3183_v56, %v3187_v53  ;;  %3892 = vmatprep.subr.bf16.mxu0 %v5148_v6 }
 0x1b9   :  { %3919 = vmatprep.subr.bf16.mxu1 %v5094_v7  ;;  %v5150_v7 = vcombine.high %v3191_v0, %v3195_v61 }
 0x1bb   :  { %3893 = vmatpush1.bf16.msra.mxu0 %v5147_v16  ;;  %v3125_v16 = vld [vmem:[%s7458_s2 + $0xb8] sm:$0xff] }
 0x1bc   :  { %3920 = vmatpush1.bf16.msra.mxu1 %v5093_v10  ;;  %v3198_v10 = vld [vmem:[%s7458_s2 + $0x300] sm:$0xff] }
 0x1bd   :  { %3921 = vmatprep.subr.bf16.mxu1 %v5102_v19  ;;  %v5156_v18 = vcombine.high %v3198_v10, %v3202_v12  ;;  %v3206_v19 = vld [vmem:[%s7458_s2 + $0x340] sm:$0xff]  ;;  %v5155_v25 = vcombine.low %v3198_v10, %v3202_v12  ;;  %v3116_v10 = vld [vmem:[%s7458_s2 + $0x70] sm:$0xff]  ;;  %v5074_v12 = vcombine.high %v3113_v2, %v3117_v36 }
 0x1be   :  { %v5164_v28 = vcombine.high %v3206_v19, %v3210_v21  ;;  %v5163_v33 = vcombine.low %v3206_v19, %v3210_v21  ;;  %v3128_v21 = vld [vmem:[%s7458_s2 + $0xd0] sm:$0xff] }
 0x1bf   :  { %3894 = vmatprep.subr.bf16.mxu0 %v5156_v18  ;;  %v5073_v18 = vcombine.low %v3113_v2, %v3117_v36  ;;  %v3180_v2 = vld [vmem:[%s7458_s2 + $0x270] sm:$0xff]  ;;  %v3177_v36 = vld [vmem:[%s7458_s2 + $0x258] sm:$0xff] }
 0x1c0   :  { %3922 = vmatpush1.bf16.msra.mxu1 %v5101_v37  ;;  %v5158_v37 = vcombine.high %v3199_v14, %v3203_v15  ;;  %3895 = vmatpush1.bf16.msra.mxu0 %v5155_v25  ;;  %v3124_v14 = vld [vmem:[%s7458_s2 + $0xb0] sm:$0xff]  ;;  %v3121_v15 = vld [vmem:[%s7458_s2 + $0x98] sm:$0xff] }
 0x1c1   :  { %3923 = vmatprep.subr.bf16.mxu1 %v5110_v31  ;;  %v3215_v31 = vld [vmem:[%s7458_s2 + $0x388] sm:$0xff]  ;;  %3896 = vmatprep.subr.bf16.mxu0 %v5164_v28  ;;  %v5082_v19 = vcombine.high %v3121_v15, %v3125_v16  ;;  %v3133_v25 = vld [vmem:[%s7458_s2 + $0xf8] sm:$0xff]  ;;  %v5081_v28 = vcombine.low %v3121_v15, %v3125_v16  ;;  %v3184_v15 = vld [vmem:[%s7458_s2 + $0x290] sm:$0xff] }
 0x1c2   :  { %v5173_v41 = vcombine.low %v3215_v31, %v3219_v32  ;;  %v3188_v16 = vld [vmem:[%s7458_s2 + $0x2b0] sm:$0xff] }
 0x1c4   :  { %3924 = vmatpush1.bf16.msra.mxu1 %v5109_v30  ;;  %v3218_v30 = vld [vmem:[%s7458_s2 + $0x3a0] sm:$0xff]  ;;  %3897 = vmatpush1.bf16.msra.mxu0 %v5163_v33  ;;  %v3141_v33 = vld [vmem:[%s7458_s2 + $0x138] sm:$0xff] }
 0x1c5   :  { %3925 = vmatprep.subr.bf16.mxu1 %v5118_v39  ;;  %v5172_v38 = vcombine.high %v3214_v13, %v3218_v30  ;;  %v5174_v39 = vcombine.high %v3215_v31, %v3219_v32  ;;  %v5171_v40 = vcombine.low %v3214_v13, %v3218_v30  ;;  %v5090_v13 = vcombine.high %v3129_v23, %v3133_v25  ;;  %v3136_v30 = vld [vmem:[%s7458_s2 + $0x110] sm:$0xff]  ;;  %v3137_v32 = vld [vmem:[%s7458_s2 + $0x118] sm:$0xff] }
 0x1c6   :  { %v3140_v31 = vld [vmem:[%s7458_s2 + $0x130] sm:$0xff] }
 0x1c7   :  { %3898 = vmatprep.subr.bf16.mxu0 %v5172_v38  ;;  %v5089_v38 = vcombine.low %v3129_v23, %v3133_v25  ;;  %v3192_v23 = vld [vmem:[%s7458_s2 + $0x2d0] sm:$0xff] }
 0x1c8   :  { %3926 = vmatpush1.bf16.msra.mxu1 %v5117_v26  ;;  %3899 = vmatpush1.bf16.msra.mxu0 %v5171_v40  ;;  %v3223_v26 = vld [vmem:[%s7458_s2 + $0x3c8] sm:$0xff]  ;;  %v5098_v40 = vcombine.high %v3137_v32, %v3141_v33  ;;  %v3196_v25 = vld [vmem:[%s7458_s2 + $0x2f0] sm:$0xff] }
 0x1c9   :  { %3927 = vmatprep.subr.bf16.mxu1 %v5126_v45  ;;  %v3227_v45 = vld [vmem:[%s7458_s2 + $0x3e8] sm:$0xff]  ;;  %3900 = vmatprep.subr.bf16.mxu0 %v5180_v44  ;;  %v5095_v44 = vcombine.low %v3136_v30, %v3140_v31 }
 0x1ca   :  { %v5181_v47 = vcombine.low %v3223_v26, %v3227_v45  ;;  %v5182_v4 = vcombine.high %v3223_v26, %v3227_v45  ;;  %v3149_v26 = vld [vmem:[%s7458_s2 + $0x178] sm:$0xff]  ;;  %v5097_v45 = vcombine.low %v3137_v32, %v3141_v33  ;;  %v3200_v32 = vld [vmem:[%s7458_s2 + $0x310] sm:$0xff] }
 0x1cb   :  { %v3204_v33 = vld [vmem:[%s7458_s2 + $0x330] sm:$0xff] }
 0x1cc   :  { %3928 = vmatpush1.bf16.msra.mxu1 %v5125_v43  ;;  %3901 = vmatpush1.bf16.msra.mxu0 %v5179_v46  ;;  %v3105_v43 = vld [vmem:[%s7458_s2 + $0x18] sm:$0xff] }
 0x1cd   :  { %3929 = vmatprep.subr.bf16.mxu1 %v5134_v50  ;;  %v3109_v50 = vld [vmem:[%s7458_s2 + $0x38] sm:$0xff]  ;;  %3952 = vmatprep.subr.bf16.mxu0 %v5064_v49 }
 0x1ce   :  { %v5065_v9 = vcombine.low %v3105_v43, %v3109_v50  ;;  %v5066_v56 = vcombine.high %v3105_v43, %v3109_v50  ;;  %v3157_v43 = vld [vmem:[%s7458_s2 + $0x1b8] sm:$0xff]  ;;  %v5105_v50 = vcombine.low %v3145_v20, %v3149_v26 }
 0x1d0   :  { %3930 = vmatpush1.bf16.msra.mxu1 %v5133_v58 }
 0x1d1   :  { %3931 = vmatprep.subr.bf16.mxu1 %v5142_v24 }
 0x1d4   :  { %3932 = vmatpush1.bf16.msra.mxu1 %v5141_v5 }
 0x1d5   :  { %3933 = vmatprep.subr.bf16.mxu1 %v5150_v7 }
 0x1d8   :  { %3934 = vmatpush1.bf16.msra.mxu1 %v5149_v17 }
 0x1d9   :  { %3935 = vmatprep.subr.bf16.mxu1 %v5158_v37  ;;  %v5080_v37 = vcombine.high %v3120_v54, %v3124_v14 }
 0x1dc   :  { %3936 = vmatpush1.bf16.msra.mxu1 %v5157_v27  ;;  %v5079_v27 = vcombine.low %v3120_v54, %v3124_v14 }
 0x1dd   :  { %3937 = vmatprep.subr.bf16.mxu1 %v5166_v29  ;;  %v5088_v29 = vcombine.high %v3128_v21, %v3132_v62 }
 0x1e0   :  { %3938 = vmatpush1.bf16.msra.mxu1 %v5165_v35  ;;  %v5087_v35 = vcombine.low %v3128_v21, %v3132_v62  ;;  %v5144_v21 = vcombine.high %v3184_v15, %v3188_v16 }
 0x1e1   :  { %3939 = vmatprep.subr.bf16.mxu1 %v5174_v39  ;;  %v5096_v39 = vcombine.high %v3136_v30, %v3140_v31  ;;  %v5152_v30 = vcombine.high %v3192_v23, %v3196_v25 }
 0x1e4   :  { %3940 = vmatpush1.bf16.msra.mxu1 %v5173_v41  ;;  %v3144_v41 = vld [vmem:[%s7458_s2 + $0x150] sm:$0xff] }
 0x1e5   :  { %3941 = vmatprep.subr.bf16.mxu1 %v5182_v4  ;;  %v5104_v46 = vcombine.high %v3144_v41, %v3148_v42  ;;  %v3152_v4 = vld [vmem:[%s7458_s2 + $0x190] sm:$0xff]  ;;  %v5103_v49 = vcombine.low %v3144_v41, %v3148_v42  ;;  %v5160_v41 = vcombine.high %v3200_v32, %v3204_v33 }
 0x1e8   :  { %3942 = vmatpush1.bf16.msra.mxu1 %v5181_v47  ;;  %v5106_v47 = vcombine.high %v3145_v20, %v3149_v26  ;;  %v3208_v20 = vld [vmem:[%s7458_s2 + $0x350] sm:$0xff] }
 0x1e9   :  { %3993 = vmatprep.subr.bf16.mxu1 %v5066_v56  ;;  %v3160_v56 = vld [vmem:[%s7458_s2 + $0x1d0] sm:$0xff] }
 0x1ea   :  { %v3212_v26 = vld [vmem:[%s7458_s2 + $0x370] sm:$0xff] }
 0x258   :  { %v2882_v53 = vpop.f32.mrb[4].mxu0 }
 0x259   :  { %v5292_v57 = vadd.f32 %v6860_v63, %v2882_v53  ;;  %v2884_v58 = vpop.f32.mrb[5].mxu0  ;;  %v3112_v63 = vld [vmem:[%s7458_s2 + $0x50] sm:$0xff] }
 0x25a   :  { %v5293_v59 = vadd.f32 %v6868_v1, %v2884_v58  ;;  %v2886_v24 = vpop.f32.mrb[6].mxu0  ;;  %v5071_v17 = vcombine.low %v3112_v63, %v3116_v10  ;;  %v3164_v53 = vld [vmem:[%s7458_s2 + $0x1f0] sm:$0xff]  ;;  %v3165_v58 = vld [vmem:[%s7458_s2 + $0x1f8] sm:$0xff] }
 0x25b   :  { %v2887_v34 = vpop.f32.mrb[7].mxu0  ;;  %v3096_v60 = vmax.f32 %v3094_v52, %v5292_v57  ;;  %v3161_v57 = vld [vmem:[%s7458_s2 + $0x1d8] sm:$0xff]  ;;  %v5113_v24 = vcombine.low %v3153_v8, %v3157_v43 }
 0x25c   :  { %v3097_v0 = vmax.f32 %v3095_v55, %v5293_v59  ;;  %v5072_v55 = vcombine.high %v3112_v63, %v3116_v10  ;;  %v5111_v59 = vcombine.low %v3152_v4, %v3156_v48  ;;  %v5120_v34 = vcombine.high %v3160_v56, %v3164_v53  ;;  %v3176_v10 = vld [vmem:[%s7458_s2 + $0x250] sm:$0xff] }
 0x27e   :  { %v3087_v61 = vpop.f32.mrb[12].mxu1 }
 0x27f   :  { %v3098_v3 = vmax.f32 %v3096_v60, %v3087_v61  ;;  %v3089_v5 = vpop.f32.mrb[13].mxu1  ;;  %v5122_v60 = vcombine.high %v3161_v57, %v3165_v58  ;;  %v3172_v61 = vld [vmem:[%s7458_s2 + $0x230] sm:$0xff] }
 0x280   :  { %v3099_v6 = vmax.f32 %v3097_v0, %v3089_v5  ;;  %v3091_v7 = vpop.f32.mrb[14].mxu1  ;;  %v3168_v0 = vld [vmem:[%s7458_s2 + $0x210] sm:$0xff]  ;;  %v3173_v5 = vld [vmem:[%s7458_s2 + $0x238] sm:$0xff] }
 0x281   :  { %v3092_v1 = vpop.f32.mrb[15].mxu1  ;;  %v7034_v52 = vpack.c.bf16 %v3098_v3, %v3098_v3  ;;  %v3169_v3 = vld [vmem:[%s7458_s2 + $0x218] sm:$0xff]  ;;  %v5121_v7 = vcombine.low %v3161_v57, %v3165_v58  ;;  %v5128_v63 = vcombine.high %v3168_v0, %v3172_v61  ;;  %v5127_v54 = vcombine.low %v3168_v0, %v3172_v61  ;;  %v3224_v57 = vld [vmem:[%s7458_s2 + $0x3d0] sm:$0xff] }
 0x282   :  { %v3101_v51 = vpack.c.bf16 %v3099_v6, %v3099_v6  ;;  %v5119_v6 = vcombine.low %v3160_v56, %v3164_v53  ;;  %v5130_v1 = vcombine.high %v3169_v3, %v3173_v5  ;;  %v3228_v58 = vld [vmem:[%s7458_s2 + $0x3f0] sm:$0xff] }
 0x283   :  { %v5184_v0 = vcombine.high %v3224_v57, %v3228_v58 }
 0x284   :  { %3902 = vmatprep.mubr.bf16.mxu0 %v3101_v51  ;;  %3943 = vmatprep.mubr.bf16.mxu1 %v3101_v51 }
 0x285   :  { %3903 = vmatmul.mubr.bf16.vlgmr.msra.gmra.mrb[8].mxu0 %v7034_v52  ;;  %3944 = vmatmul.mubr.bf16.vlgmr.msra.gmra.mrb[16].mxu1 %v7034_v52 }
 0x286   :  { %3953 = vmatpush1.bf16.msra.mxu0 %v5063_v11  ;;  %3994 = vmatpush1.bf16.msra.mxu1 %v5065_v9  ;;  %v5112_v11 = vcombine.high %v3152_v4, %v3156_v48  ;;  %v5114_v9 = vcombine.high %v3153_v8, %v3157_v43  ;;  %v5168_v4 = vcombine.high %v3208_v20, %v3212_v26  ;;  %v3216_v8 = vld [vmem:[%s7458_s2 + $0x390] sm:$0xff] }
 0x287   :  { %3984 = vmatprep.mubr.bf16.mxu0 %v3101_v51  ;;  %4025 = vmatprep.mubr.bf16.mxu1 %v3101_v51  ;;  %v3181_v51 = vld [vmem:[%s7458_s2 + $0x278] sm:$0xff]  ;;  %v3220_v43 = vld [vmem:[%s7458_s2 + $0x3b0] sm:$0xff] }
 0x288   :  { %3954 = vmatprep.subr.bf16.mxu0 %v5072_v55  ;;  %3995 = vmatprep.subr.bf16.mxu1 %v5074_v12  ;;  %v5129_v55 = vcombine.low %v3169_v3, %v3173_v5  ;;  %v5136_v12 = vcombine.high %v3176_v10, %v3180_v2  ;;  %v5138_v14 = vcombine.high %v3177_v36, %v3181_v51 }
 0x289   :  { %v5176_v56 = vcombine.high %v3216_v8, %v3220_v43  ;;  %v5183_v3 = vcombine.low %v3224_v57, %v3228_v58  ;;  %v5424_v57 = vld [vmem:[%s7460_s4 + $0x1ac] ss:$16 sps:$4 sm:$0xff]   ;;  %v5419_v58 = vld [vmem:[%s7460_s4 + $0x1a0] ss:$16 sps:$4 sm:$0xff]  }
 0x28a   :  { %3955 = vmatpush1.bf16.msra.mxu0 %v5071_v17  ;;  %3996 = vmatpush1.bf16.msra.mxu1 %v5073_v18  ;;  %v3185_v17 = vld [vmem:[%s7458_s2 + $0x298] sm:$0xff] }
 0x28b   :  { %3956 = vmatprep.subr.bf16.mxu0 %v5080_v37  ;;  %3997 = vmatprep.subr.bf16.mxu1 %v5082_v19  ;;  %v3189_v18 = vld [vmem:[%s7458_s2 + $0x2b8] sm:$0xff]  ;;  %v5135_v37 = vcombine.low %v3176_v10, %v3180_v2  ;;  %v5137_v19 = vcombine.low %v3177_v36, %v3181_v51  ;;  %v5347_v2 = vld [vmem:[%s7460_s4 + $0x20] ss:$16 sps:$4 sm:$0xff]   ;;  %v5355_v51 = vld [vmem:[%s7460_s4 + $0x44] ss:$16 sps:$4 sm:$0xff]  }
 0x28c   :  { %v5146_v62 = vcombine.high %v3185_v17, %v3189_v18  ;;  %v5352_v10 = vld [vmem:[%s7460_s4 + $0x2c] ss:$16 sps:$4 sm:$0xff]   ;;  %v5350_v36 = vld [vmem:[%s7460_s4 + $0x28] ss:$16 sps:$4 sm:$0xff]  }
 0x28e   :  { %3957 = vmatpush1.bf16.msra.mxu0 %v5079_v27  ;;  %3998 = vmatpush1.bf16.msra.mxu1 %v5081_v28  ;;  %v3193_v27 = vld [vmem:[%s7458_s2 + $0x2d8] sm:$0xff] }
 0x28f   :  { %3958 = vmatprep.subr.bf16.mxu0 %v5088_v29  ;;  %3999 = vmatprep.subr.bf16.mxu1 %v5090_v13  ;;  %v3197_v28 = vld [vmem:[%s7458_s2 + $0x2f8] sm:$0xff]  ;;  %v5143_v29 = vcombine.low %v3184_v15, %v3188_v16  ;;  %v5145_v13 = vcombine.low %v3185_v17, %v3189_v18  ;;  %v5359_v16 = vld [vmem:[%s7460_s4 + $0x60] ss:$16 sps:$4 sm:$0xff]   ;;  %v5367_v18 = vld [vmem:[%s7460_s4 + $0x84] ss:$16 sps:$4 sm:$0xff]  }
 0x290   :  { %v5154_v31 = vcombine.high %v3193_v27, %v3197_v28  ;;  %v5364_v15 = vld [vmem:[%s7460_s4 + $0x6c] ss:$16 sps:$4 sm:$0xff]   ;;  %v5362_v17 = vld [vmem:[%s7460_s4 + $0x68] ss:$16 sps:$4 sm:$0xff]  }
 0x292   :  { %3959 = vmatpush1.bf16.msra.mxu0 %v5087_v35  ;;  %4000 = vmatpush1.bf16.msra.mxu1 %v5089_v38  ;;  %v3201_v35 = vld [vmem:[%s7458_s2 + $0x318] sm:$0xff] }
 0x293   :  { %3960 = vmatprep.subr.bf16.mxu0 %v5096_v39  ;;  %4001 = vmatprep.subr.bf16.mxu1 %v5098_v40  ;;  %v3205_v38 = vld [vmem:[%s7458_s2 + $0x338] sm:$0xff]  ;;  %v5151_v39 = vcombine.low %v3192_v23, %v3196_v25  ;;  %v5153_v40 = vcombine.low %v3193_v27, %v3197_v28  ;;  %v5371_v25 = vld [vmem:[%s7460_s4 + $0xa0] ss:$16 sps:$4 sm:$0xff]   ;;  %v5379_v28 = vld [vmem:[%s7460_s4 + $0xc4] ss:$16 sps:$4 sm:$0xff]  }
 0x294   :  { %v5162_v42 = vcombine.high %v3201_v35, %v3205_v38  ;;  %v5376_v23 = vld [vmem:[%s7460_s4 + $0xac] ss:$16 sps:$4 sm:$0xff]   ;;  %v5374_v27 = vld [vmem:[%s7460_s4 + $0xa8] ss:$16 sps:$4 sm:$0xff]  }
 0x296   :  { %3961 = vmatpush1.bf16.msra.mxu0 %v5095_v44  ;;  %4002 = vmatpush1.bf16.msra.mxu1 %v5097_v45  ;;  %v3209_v44 = vld [vmem:[%s7458_s2 + $0x358] sm:$0xff] }
 0x297   :  { %3962 = vmatprep.subr.bf16.mxu0 %v5104_v46  ;;  %4003 = vmatprep.subr.bf16.mxu1 %v5106_v47  ;;  %v3213_v45 = vld [vmem:[%s7458_s2 + $0x378] sm:$0xff]  ;;  %v5159_v46 = vcombine.low %v3200_v32, %v3204_v33  ;;  %v5161_v47 = vcombine.low %v3201_v35, %v3205_v38  ;;  %v5383_v33 = vld [vmem:[%s7460_s4 + $0xe0] ss:$16 sps:$4 sm:$0xff]   ;;  %v5391_v38 = vld [vmem:[%s7460_s4 + $0x104] ss:$16 sps:$4 sm:$0xff]  }
 0x298   :  { %v5170_v48 = vcombine.high %v3209_v44, %v3213_v45  ;;  %v5388_v32 = vld [vmem:[%s7460_s4 + $0xec] ss:$16 sps:$4 sm:$0xff]   ;;  %v5386_v35 = vld [vmem:[%s7460_s4 + $0xe8] ss:$16 sps:$4 sm:$0xff]  }
 0x29a   :  { %3963 = vmatpush1.bf16.msra.mxu0 %v5103_v49  ;;  %4004 = vmatpush1.bf16.msra.mxu1 %v5105_v50  ;;  %v3217_v49 = vld [vmem:[%s7458_s2 + $0x398] sm:$0xff] }
 0x29b   :  { %3964 = vmatprep.subr.bf16.mxu0 %v5112_v11  ;;  %4005 = vmatprep.subr.bf16.mxu1 %v5114_v9  ;;  %v3221_v50 = vld [vmem:[%s7458_s2 + $0x3b8] sm:$0xff]  ;;  %v5167_v11 = vcombine.low %v3208_v20, %v3212_v26  ;;  %v5169_v9 = vcombine.low %v3209_v44, %v3213_v45  ;;  %v5395_v26 = vld [vmem:[%s7460_s4 + $0x120] ss:$16 sps:$4 sm:$0xff]   ;;  %v5403_v45 = vld [vmem:[%s7460_s4 + $0x144] ss:$16 sps:$4 sm:$0xff]  }
 0x29c   :  { %v5178_v53 = vcombine.high %v3217_v49, %v3221_v50  ;;  %v5400_v20 = vld [vmem:[%s7460_s4 + $0x12c] ss:$16 sps:$4 sm:$0xff]   ;;  %v5398_v44 = vld [vmem:[%s7460_s4 + $0x128] ss:$16 sps:$4 sm:$0xff]  }
 0x29e   :  { %3965 = vmatpush1.bf16.msra.mxu0 %v5111_v59  ;;  %4006 = vmatpush1.bf16.msra.mxu1 %v5113_v24  ;;  %v3225_v59 = vld [vmem:[%s7458_s2 + $0x3d8] sm:$0xff] }
 0x29f   :  { %3966 = vmatprep.subr.bf16.mxu0 %v5120_v34  ;;  %4007 = vmatprep.subr.bf16.mxu1 %v5122_v60  ;;  %v3229_v24 = vld [vmem:[%s7458_s2 + $0x3f8] sm:$0xff]  ;;  %v5175_v34 = vcombine.low %v3216_v8, %v3220_v43  ;;  %v5177_v60 = vcombine.low %v3217_v49, %v3221_v50  ;;  %v5407_v43 = vld [vmem:[%s7460_s4 + $0x160] ss:$16 sps:$4 sm:$0xff]   ;;  %v5415_v50 = vld [vmem:[%s7460_s4 + $0x184] ss:$16 sps:$4 sm:$0xff]  }
 0x2a0   :  { %v5186_v61 = vcombine.high %v3225_v59, %v3229_v24  ;;  %v5185_v5 = vcombine.low %v3225_v59, %v3229_v24  ;;  %v5412_v8 = vld [vmem:[%s7460_s4 + $0x16c] ss:$16 sps:$4 sm:$0xff]   ;;  %v5410_v49 = vld [vmem:[%s7460_s4 + $0x168] ss:$16 sps:$4 sm:$0xff]   ;;  %v5427_v24 = vld [vmem:[%s7460_s4 + $0x1c4] ss:$16 sps:$4 sm:$0xff]  }
 0x2a1   :  { %v5422_v59 = vld [vmem:[%s7460_s4 + $0x1a8] ss:$16 sps:$4 sm:$0xff]  }
 0x2a2   :  { %3967 = vmatpush1.bf16.msra.mxu0 %v5119_v6  ;;  %4008 = vmatpush1.bf16.msra.mxu1 %v5121_v7  ;;  %v5341_v6 = vld [vmem:[%s7460_s4] ss:$16 sps:$4 sm:$0xff]   ;;  %v5343_v7 = vld [vmem:[%s7460_s4 + $0x4] ss:$16 sps:$4 sm:$0xff]  }
 0x2a3   :  { %3968 = vmatprep.subr.bf16.mxu0 %v5128_v63  ;;  %4009 = vmatprep.subr.bf16.mxu1 %v5130_v1  ;;  %v5344_v63 = vld [vmem:[%s7460_s4 + $0x8] ss:$16 sps:$4 sm:$0xff]   ;;  %v5346_v1 = vld [vmem:[%s7460_s4 + $0xc] ss:$16 sps:$4 sm:$0xff]  }
 0x2a6   :  { %3969 = vmatpush1.bf16.msra.mxu0 %v5127_v54  ;;  %4010 = vmatpush1.bf16.msra.mxu1 %v5129_v55  ;;  %v5358_v54 = vld [vmem:[%s7460_s4 + $0x4c] ss:$16 sps:$4 sm:$0xff]   ;;  %v5353_v55 = vld [vmem:[%s7460_s4 + $0x40] ss:$16 sps:$4 sm:$0xff]  }
 0x2a7   :  { %3970 = vmatprep.subr.bf16.mxu0 %v5136_v12  ;;  %4011 = vmatprep.subr.bf16.mxu1 %v5138_v14  ;;  %v5356_v12 = vld [vmem:[%s7460_s4 + $0x48] ss:$16 sps:$4 sm:$0xff]   ;;  %v5361_v14 = vld [vmem:[%s7460_s4 + $0x64] ss:$16 sps:$4 sm:$0xff]  }
 0x2aa   :  { %3971 = vmatpush1.bf16.msra.mxu0 %v5135_v37  ;;  %4012 = vmatpush1.bf16.msra.mxu1 %v5137_v19  ;;  %v5370_v37 = vld [vmem:[%s7460_s4 + $0x8c] ss:$16 sps:$4 sm:$0xff]   ;;  %v5365_v19 = vld [vmem:[%s7460_s4 + $0x80] ss:$16 sps:$4 sm:$0xff]  }
 0x2ab   :  { %3972 = vmatprep.subr.bf16.mxu0 %v5144_v21  ;;  %4013 = vmatprep.subr.bf16.mxu1 %v5146_v62  ;;  %v5368_v21 = vld [vmem:[%s7460_s4 + $0x88] ss:$16 sps:$4 sm:$0xff]   ;;  %v5373_v62 = vld [vmem:[%s7460_s4 + $0xa4] ss:$16 sps:$4 sm:$0xff]  }
 0x2ae   :  { %3973 = vmatpush1.bf16.msra.mxu0 %v5143_v29  ;;  %4014 = vmatpush1.bf16.msra.mxu1 %v5145_v13  ;;  %v5382_v29 = vld [vmem:[%s7460_s4 + $0xcc] ss:$16 sps:$4 sm:$0xff]   ;;  %v5377_v13 = vld [vmem:[%s7460_s4 + $0xc0] ss:$16 sps:$4 sm:$0xff]  }
 0x2af   :  { %3974 = vmatprep.subr.bf16.mxu0 %v5152_v30  ;;  %4015 = vmatprep.subr.bf16.mxu1 %v5154_v31  ;;  %v5380_v30 = vld [vmem:[%s7460_s4 + $0xc8] ss:$16 sps:$4 sm:$0xff]   ;;  %v5385_v31 = vld [vmem:[%s7460_s4 + $0xe4] ss:$16 sps:$4 sm:$0xff]  }
 0x2b2   :  { %3975 = vmatpush1.bf16.msra.mxu0 %v5151_v39  ;;  %4016 = vmatpush1.bf16.msra.mxu1 %v5153_v40  ;;  %v5394_v39 = vld [vmem:[%s7460_s4 + $0x10c] ss:$16 sps:$4 sm:$0xff]   ;;  %v5389_v40 = vld [vmem:[%s7460_s4 + $0x100] ss:$16 sps:$4 sm:$0xff]  }
 0x2b3   :  { %3976 = vmatprep.subr.bf16.mxu0 %v5160_v41  ;;  %4017 = vmatprep.subr.bf16.mxu1 %v5162_v42  ;;  %v5392_v41 = vld [vmem:[%s7460_s4 + $0x108] ss:$16 sps:$4 sm:$0xff]   ;;  %v5397_v42 = vld [vmem:[%s7460_s4 + $0x124] ss:$16 sps:$4 sm:$0xff]  }
 0x2b6   :  { %3977 = vmatpush1.bf16.msra.mxu0 %v5159_v46  ;;  %4018 = vmatpush1.bf16.msra.mxu1 %v5161_v47  ;;  %v5406_v46 = vld [vmem:[%s7460_s4 + $0x14c] ss:$16 sps:$4 sm:$0xff]   ;;  %v5401_v47 = vld [vmem:[%s7460_s4 + $0x140] ss:$16 sps:$4 sm:$0xff]  }
 0x2b7   :  { %3978 = vmatprep.subr.bf16.mxu0 %v5168_v4  ;;  %4019 = vmatprep.subr.bf16.mxu1 %v5170_v48  ;;  %v5404_v4 = vld [vmem:[%s7460_s4 + $0x148] ss:$16 sps:$4 sm:$0xff]   ;;  %v5409_v48 = vld [vmem:[%s7460_s4 + $0x164] ss:$16 sps:$4 sm:$0xff]  }
 0x2ba   :  { %3979 = vmatpush1.bf16.msra.mxu0 %v5167_v11  ;;  %4020 = vmatpush1.bf16.msra.mxu1 %v5169_v9  ;;  %v5418_v11 = vld [vmem:[%s7460_s4 + $0x18c] ss:$16 sps:$4 sm:$0xff]   ;;  %v5413_v9 = vld [vmem:[%s7460_s4 + $0x180] ss:$16 sps:$4 sm:$0xff]  }
 0x2bb   :  { %3980 = vmatprep.subr.bf16.mxu0 %v5176_v56  ;;  %4021 = vmatprep.subr.bf16.mxu1 %v5178_v53  ;;  %v5416_v56 = vld [vmem:[%s7460_s4 + $0x188] ss:$16 sps:$4 sm:$0xff]   ;;  %v5421_v53 = vld [vmem:[%s7460_s4 + $0x1a4] ss:$16 sps:$4 sm:$0xff]  }
 0x2be   :  { %3981 = vmatpush1.bf16.msra.mxu0 %v5175_v34  ;;  %4022 = vmatpush1.bf16.msra.mxu1 %v5177_v60  ;;  %v5430_v34 = vld [vmem:[%s7460_s4 + $0x1cc] ss:$16 sps:$4 sm:$0xff]   ;;  %v5425_v60 = vld [vmem:[%s7460_s4 + $0x1c0] ss:$16 sps:$4 sm:$0xff]  }
 0x2bf   :  { %3982 = vmatprep.subr.bf16.mxu0 %v5184_v0  ;;  %4023 = vmatprep.subr.bf16.mxu1 %v5186_v61  ;;  %v5428_v0 = vld [vmem:[%s7460_s4 + $0x1c8] ss:$16 sps:$4 sm:$0xff]   ;;  %v5433_v61 = vld [vmem:[%s7460_s4 + $0x1e4] ss:$16 sps:$4 sm:$0xff]  }
 0x2c2   :  { %3983 = vmatpush1.bf16.msra.mxu0 %v5183_v3  ;;  %4024 = vmatpush1.bf16.msra.mxu1 %v5185_v5  ;;  %v5436_v3 = vld [vmem:[%s7460_s4 + $0x1ec] ss:$16 sps:$4 sm:$0xff]   ;;  %v5431_v5 = vld [vmem:[%s7460_s4 + $0x1e0] ss:$16 sps:$4 sm:$0xff]  }
 0x2c3   :  { %4442 = vmatprep.subr.bf16.mxu0 %v5343_v7  ;;  %4483 = vmatprep.subr.bf16.mxu1 %v5346_v1  ;;  %v5471_v7 = vmov 0.0  }
 0x2c5   :  { %3985 = vmatmul.mubr.bf16.vlgmr.msra.gmra.mrb[12].mxu0 %v7034_v52  ;;  %4026 = vmatmul.mubr.bf16.vlgmr.msra.gmra.mrb[20].mxu1 %v7034_v52  ;;  %v5349_v52 = vld [vmem:[%s7460_s4 + $0x24] ss:$16 sps:$4 sm:$0xff]  }
 0x2c6   :  { %4443 = vmatpush1.bf16.msra.mxu0 %v5341_v6  ;;  %4484 = vmatpush1.bf16.msra.mxu1 %v5344_v63  ;;  %v5434_v6 = vld [vmem:[%s7460_s4 + $0x1e8] ss:$16 sps:$4 sm:$0xff]  }
 0x2c7   :  { %4444 = vmatprep.subr.bf16.mxu0 %v5349_v52  ;;  %4485 = vmatprep.subr.bf16.mxu1 %v5352_v10 }
 0x2ca   :  { %4445 = vmatpush1.bf16.msra.mxu0 %v5347_v2  ;;  %4486 = vmatpush1.bf16.msra.mxu1 %v5350_v36 }
 0x2cb   :  { %4446 = vmatprep.subr.bf16.mxu0 %v5355_v51  ;;  %4487 = vmatprep.subr.bf16.mxu1 %v5358_v54 }
 0x2ce   :  { %4447 = vmatpush1.bf16.msra.mxu0 %v5353_v55  ;;  %4488 = vmatpush1.bf16.msra.mxu1 %v5356_v12 }
 0x2cf   :  { %4448 = vmatprep.subr.bf16.mxu0 %v5361_v14  ;;  %4489 = vmatprep.subr.bf16.mxu1 %v5364_v15  ;;  %v4044_v14 = vsub.s32 0, %v5555_v22  ;;  %v4040_v15 = vld [vmem:[%s7459_s3] sm:$0x3] }
 0x2d2   :  { %4449 = vmatpush1.bf16.msra.mxu0 %v5359_v16  ;;  %4490 = vmatpush1.bf16.msra.mxu1 %v5362_v17  ;;  %v4048_v16 = vsub.s32 1, %v5555_v22  ;;  %v5437_v22 = vld [vmem:[%s7462_s6] sm:$0xff]  }
 0x2d3   :  { %4450 = vmatprep.subr.bf16.mxu0 %v5367_v18  ;;  %4491 = vmatprep.subr.bf16.mxu1 %v5370_v37 }
 0x2d6   :  { %4451 = vmatpush1.bf16.msra.mxu0 %v5365_v19  ;;  %4492 = vmatpush1.bf16.msra.mxu1 %v5368_v21  ;;  %v4045_v19 = vrot.slane %v4040_v15, %v4044_v14 }
 0x2d7   :  { %4452 = vmatprep.subr.bf16.mxu0 %v5373_v62  ;;  %4493 = vmatprep.subr.bf16.mxu1 %v5376_v23 }
 0x2da   :  { %4453 = vmatpush1.bf16.msra.mxu0 %v5371_v25  ;;  %4494 = vmatpush1.bf16.msra.mxu1 %v5374_v27  ;;  %v4049_v25 = vrot.slane %v4040_v15, %v4048_v16 }
 0x2db   :  { %4454 = vmatprep.subr.bf16.mxu0 %v5379_v28  ;;  %4495 = vmatprep.subr.bf16.mxu1 %v5382_v29 }
 0x2de   :  { %4455 = vmatpush1.bf16.msra.mxu0 %v5377_v13  ;;  %4496 = vmatpush1.bf16.msra.mxu1 %v5380_v30 }
 0x2df   :  { %4456 = vmatprep.subr.bf16.mxu0 %v5385_v31  ;;  %4497 = vmatprep.subr.bf16.mxu1 %v5388_v32 }
 0x2e2   :  { %4457 = vmatpush1.bf16.msra.mxu0 %v5383_v33  ;;  %4498 = vmatpush1.bf16.msra.mxu1 %v5386_v35 }
 0x2e3   :  { %4458 = vmatprep.subr.bf16.mxu0 %v5391_v38  ;;  %4499 = vmatprep.subr.bf16.mxu1 %v5394_v39 }
 0x2e6   :  { %4459 = vmatpush1.bf16.msra.mxu0 %v5389_v40  ;;  %4500 = vmatpush1.bf16.msra.mxu1 %v5392_v41  ;;  %v5438_v41 = vld [vmem:[%s7462_s6 + $0x8] sm:$0xff]  }
 0x2e7   :  { %4460 = vmatprep.subr.bf16.mxu0 %v5397_v42  ;;  %4501 = vmatprep.subr.bf16.mxu1 %v5400_v20  ;;  %v5439_v42 = vld [vmem:[%s7462_s6 + $0x10] sm:$0xff]   ;;  %v5440_v20 = vld [vmem:[%s7462_s6 + $0x18] sm:$0xff]  }
 0x2ea   :  { %4461 = vmatpush1.bf16.msra.mxu0 %v5395_v26  ;;  %4502 = vmatpush1.bf16.msra.mxu1 %v5398_v44  ;;  %v5441_v26 = vld [vmem:[%s7462_s6 + $0x20] sm:$0xff]   ;;  %v5442_v44 = vld [vmem:[%s7462_s6 + $0x28] sm:$0xff]  }
 0x2eb   :  { %4462 = vmatprep.subr.bf16.mxu0 %v5403_v45  ;;  %4503 = vmatprep.subr.bf16.mxu1 %v5406_v46  ;;  %v5443_v45 = vld [vmem:[%s7462_s6 + $0x30] sm:$0xff]   ;;  %v5444_v46 = vld [vmem:[%s7462_s6 + $0x38] sm:$0xff]  }
 0x2ee   :  { %4463 = vmatpush1.bf16.msra.mxu0 %v5401_v47  ;;  %4504 = vmatpush1.bf16.msra.mxu1 %v5404_v4 }
 0x2ef   :  { %4464 = vmatprep.subr.bf16.mxu0 %v5409_v48  ;;  %4505 = vmatprep.subr.bf16.mxu1 %v5412_v8 }
 0x2f2   :  { %4465 = vmatpush1.bf16.msra.mxu0 %v5407_v43  ;;  %4506 = vmatpush1.bf16.msra.mxu1 %v5410_v49 }
 0x2f3   :  { %4466 = vmatprep.subr.bf16.mxu0 %v5415_v50  ;;  %4507 = vmatprep.subr.bf16.mxu1 %v5418_v11 }
 0x2f6   :  { %4467 = vmatpush1.bf16.msra.mxu0 %v5413_v9  ;;  %4508 = vmatpush1.bf16.msra.mxu1 %v5416_v56 }
 0x2f7   :  { %4468 = vmatprep.subr.bf16.mxu0 %v5421_v53  ;;  %4509 = vmatprep.subr.bf16.mxu1 %v5424_v57  ;;  %v5251_v53 = vld [vmem:[%s7461_s5] ss:$0 sm:$0xff] }
 0x2fa   :  { %4469 = vmatpush1.bf16.msra.mxu0 %v5419_v58  ;;  %4510 = vmatpush1.bf16.msra.mxu1 %v5422_v59 }
 0x2fb   :  { %4470 = vmatprep.subr.bf16.mxu0 %v5427_v24  ;;  %4511 = vmatprep.subr.bf16.mxu1 %v5430_v34  ;;  %v5252_v34 = vld [vmem:[%s7463_s7] ss:$0 sm:$0xff] }
 0x2fe   :  { %4471 = vmatpush1.bf16.msra.mxu0 %v5425_v60  ;;  %4512 = vmatpush1.bf16.msra.mxu1 %v5428_v0 }
 0x2ff   :  { %4472 = vmatprep.subr.bf16.mxu0 %v5433_v61  ;;  %4513 = vmatprep.subr.bf16.mxu1 %v5436_v3 }
 0x302   :  { %4473 = vmatpush1.bf16.msra.mxu0 %v5431_v5  ;;  %4514 = vmatpush1.bf16.msra.mxu1 %v5434_v6 }
 0x303   :  { %5270 = vmatprep.subr.bf16.mxu0 %v5471_v7 }
 0x358   :  { %v3904_v63 = vpop.f32.mrb[8].mxu0  ;;  %v3945_v1 = vpop.f32.mrb[16].mxu1 }
 0x359   :  { %v4034_v52 = vmax.f32 %v3904_v63, %v3945_v1  ;;  %v3906_v10 = vpop.f32.mrb[9].mxu0  ;;  %v3947_v2 = vpop.f32.mrb[17].mxu1 }
 0x35a   :  { %v4035_v36 = vmax.f32 %v3906_v10, %v3947_v2  ;;  %v3908_v51 = vpop.f32.mrb[10].mxu0  ;;  %v3949_v54 = vpop.f32.mrb[18].mxu1 }
 0x35b   :  { %v3909_v55 = vpop.f32.mrb[11].mxu0  ;;  %v3950_v12 = vpop.f32.mrb[19].mxu1 }
 0x398   :  { %v3986_v17 = vpop.f32.mrb[12].mxu0  ;;  %v4027_v18 = vpop.f32.mrb[20].mxu1 }
 0x399   :  { %v4036_v37 = vmax.f32 %v4034_v52, %v3986_v17  ;;  %v3988_v21 = vpop.f32.mrb[13].mxu0  ;;  %v4029_v62 = vpop.f32.mrb[21].mxu1 }
 0x39a   :  { %v4037_v23 = vmax.f32 %v4035_v36, %v3988_v21  ;;  %v3990_v27 = vpop.f32.mrb[14].mxu0  ;;  %v4031_v28 = vpop.f32.mrb[22].mxu1 }
 0x39b   :  { %v4038_v29 = vmax.f32 %v4036_v37, %v4027_v18  ;;  %v3991_v13 = vpop.f32.mrb[15].mxu0  ;;  %v4032_v30 = vpop.f32.mrb[23].mxu1 }
 0x39c   :  { %v4039_v31 = vmax.f32 %v4037_v23, %v4029_v62 }
 0x39d   :  { %v4052_v32 = vadd.f32 %v4045_v19, %v4038_v29 }
 0x39e   :  { %v4053_v33 = vadd.f32 %v4049_v25, %v4039_v31 }
 0x39f   :  { %v4054_v35 = vmax.f32 %v4052_v32, 0.0 }
 0x3a0   :  { %v4055_v38 = vmax.f32 %v4053_v33, 0.0 }
 0x3a1   :  { %v4056_v40 = vpack.c.bf16 %v4054_v35, %v4054_v35 }
 0x3a2   :  { %v4057_v39 = vpack.c.bf16 %v4055_v38, %v4055_v38 }
 0x3a4   :  { %4474 = vmatprep.mubr.bf16.mxu0 %v4057_v39  ;;  %4515 = vmatprep.mubr.bf16.mxu1 %v4057_v39 }
 0x3a5   :  { %4475 = vmatmul.mubr.bf16.vlgmr.msra.gmra.mrb[16].mxu0 %v4056_v40  ;;  %4516 = vmatmul.mubr.bf16.vlgmr.msra.gmra.mrb[24].mxu1 %v4056_v40 }
 0x3a6   :  { %5271 = vmatpush3.bf16.msra.mxu0 %v5437_v22  ;;  %5286 = vmatprep.mubr.msk.bf16.mxu0 %vm5472_vm1, %v5471_v7 }
 0x3a7   :  { %5272 = vmatprep.subr.bf16.mxu0 %v5471_v7 }
 0x3aa   :  { %5273 = vmatpush3.bf16.msra.mxu0 %v5438_v41 }
 0x3ab   :  { %5274 = vmatprep.subr.bf16.mxu0 %v5471_v7 }
 0x3ae   :  { %5275 = vmatpush3.bf16.msra.mxu0 %v5439_v42 }
 0x3af   :  { %5276 = vmatprep.subr.bf16.mxu0 %v5471_v7 }
 0x3b2   :  { %5277 = vmatpush3.bf16.msra.mxu0 %v5440_v20 }
 0x3b3   :  { %5278 = vmatprep.subr.bf16.mxu0 %v5471_v7 }
 0x3b6   :  { %5279 = vmatpush3.bf16.msra.mxu0 %v5441_v26 }
 0x3b7   :  { %5280 = vmatprep.subr.bf16.mxu0 %v5471_v7 }
 0x3ba   :  { %5281 = vmatpush3.bf16.msra.mxu0 %v5442_v44 }
 0x3bb   :  { %5282 = vmatprep.subr.bf16.mxu0 %v5471_v7 }
 0x3be   :  { %5283 = vmatpush3.bf16.msra.mxu0 %v5443_v45 }
 0x3bf   :  { %5284 = vmatprep.subr.bf16.mxu0 %v5471_v7 }
 0x3c2   :  { %5285 = vmatpush3.bf16.msra.mxu0 %v5444_v46 }
 0x478   :  { %v4476_v47 = vpop.f32.mrb[16].mxu0  ;;  %v4517_v4 = vpop.f32.mrb[24].mxu1 }
 0x479   :  { %v4478_v48 = vpop.f32.mrb[17].mxu0  ;;  %v4519_v8 = vpop.f32.mrb[25].mxu1 }
 0x47a   :  { %v4524_v43 = vmax.f32 %v4476_v47, %v4478_v48  ;;  %v4480_v49 = vpop.f32.mrb[18].mxu0  ;;  %v4521_v50 = vpop.f32.mrb[26].mxu1 }
 0x47b   :  { %v4481_v11 = vpop.f32.mrb[19].mxu0  ;;  %v4522_v9 = vpop.f32.mrb[27].mxu1 }
 0x47c   :  { %v4525_v56 = vmax.f32 %v4524_v43, %v4517_v4 }
 0x47e   :  { %v4526_v57 = vmax.f32 %v4525_v56, %v4519_v8 }
 0x480   :  { %v4534_v58 = vadd.f32 %v5251_v53, %v4526_v57 }
 0x482   :  { %v4535_v59 = vmax.f32 %v4534_v58, 0.0 }
 0x484   :  { %v4536_v24 = vpack.c.bf16 %v4535_v59, %v4535_v59 }
 0x486   :  { %5287 = vmatmul.mubr.bf16.vlgmr.msra.gmra.mrb[20].mxu0 %v4536_v24 }
 0x559   :  { %v4642_v60 = vpop.f32.mrb[20].mxu0 }
 0x55a   :  { %v4643_v0 = vadd.f32 %v5252_v34, %v4642_v60  ;;  %v5288_v61 = vpop.f32.mrb[21].mxu0 }
 0x55b   :  { %v4645_v3 = vpop.f32.mrb[22].mxu0 }
 0x55c   :  { %4648 = vst [vmem:[#allocation2] sm:$0x3] %v4643_v0  ;;  %v5289_v5 = vpop.f32.mrb[23].mxu0 }
 0x55d   :  { %5456 = shalt.err (!%p5453_p4)
}
 0x55e   :  { %s5457_s7 = scalar_lea.hbm %s7464_s8, 32 }
 0x55f   :  { %p5458_p5 = scmp.ne.s32.totalorder %s7464_s8, %s5457_s7  ;;  %p5461_p6 = scmp.lt.u32.totalorder %s5457_s7, %s7464_s8 }
 0x561   :  { %p5463_p7 = pnand %p5461_p6, %p5458_p5 }
 0x563   :  { %5466 = shalt.err (!%p5463_p7)
}
 0x564   :  { %4658 = dma.vmem_to_hbm [thread:$0]  %s4656_s26, 32, %s7464_s8, [#allocation3]  }
 0x565   :  { %5467 = dma.done.wait [#allocation3], 32  }
 0x566   :  { %5468 = vsyncadd [#allocation3], 4294967264 }
 0x567   :  { %4662 = vsyncpa [#allocation3], 1 }

</bundles_post_ra>
